<compile_context>
chip_gen: v7x
topology: tpu7x:2x2x1
jax: 0.10.0
libtpu: 0.0.40
codegen_flags: <defaults>
</compile_context>

<pallas_src>
import jax
import jax.numpy as jnp
from jax.experimental import pallas as pl
from jax.experimental.pallas import tpu as pltpu

# --- small, module-consistent hyperparameters -------------------------------
BATCH = 2
SEQ = 8
DATA_DIM_PREDICT = 1   # lstm_predict input size (module default)
LSTM_DIM = 128         # hidden size (module default 1024, scaled down; 128 keeps
                       # every gate slice lane-aligned to the 128-lane vreg)
LSTM_DEPTH = 2
OUT_LANES = 128        # lane-dense (zero-padded) output width for fc1
# dropout(p=0.2) is stochastic / training-only -> eval-mode identity here.


def _lstm_predict_kernel(x_ref, h0_ref, c0_ref,
                         wih0_ref, whh0_ref, b0_ref,
                         w1_ref, b1_ref,
                         wfc_ref, bfc_ref,
                         y_ref, hN_ref, cN_ref,
                         xg_scr, hstash_scr):
    """Full 2-layer LSTM recurrence + relu + fc1 for all T steps in one kernel."""
    TB, H4 = xg_scr.shape
    Bp = h0_ref.shape[1]
    H = hstash_scr.shape[-1]
    T = TB // Bp               # static python int -> full unroll below
    NOUT = y_ref.shape[-1]     # lane-dense (padded) output width

    # ---- prologue: hoisted layer-0 input projection for ALL timesteps -------
    # data_dim_predict == 1 -> pure VPU broadcast mul+add (no K=1 MXU matmul);
    # b0 = b_ih0 + b_hh0 folded in so no per-step bias broadcast exists.
    if x_ref.shape[-1] == 1:
        xg_scr[...] = x_ref[...] * wih0_ref[...] + b0_ref[...]
    else:  # general fallback (not used at the module-default input size)
        xg_scr[...] = (jnp.dot(x_ref[...], wih0_ref[...],
                               preferred_element_type=jnp.float32)
                       + jnp.broadcast_to(b0_ref[...], (TB, H4)))

    # hoisted layer-1 bias broadcast (JAX does not CSE broadcast_in_dim)
    b1b = jnp.broadcast_to(b1_ref[...], (Bp, H4))

    def gates_to_hc(g, c_prev):
        # PyTorch gate order: [i, f, g, o]; each slice is a lane-aligned block.
        i = jax.nn.sigmoid(g[:, 0 * H:1 * H])
        f = jax.nn.sigmoid(g[:, 1 * H:2 * H])
        gg = jnp.tanh(g[:, 2 * H:3 * H])
        o = jax.nn.sigmoid(g[:, 3 * H:4 * H])
        c_new = f * c_prev + i * gg
        h_new = o * jnp.tanh(c_new)
        return h_new, c_new

    # ---- state carried in vregs across the fully unrolled time loop ---------
    h0v = h0_ref[0]
    c0v = c0_ref[0]
    h1v = h0_ref[1]
    c1v = c0_ref[1]

    for t in range(T):  # T static -> unrolled; LLO interleaves EUP/MXU across steps
        # layer 0: only the h-recurrent matmul sits on the critical path
        g0 = xg_scr[pl.ds(t * Bp, Bp), :] + jnp.dot(
            h0v, whh0_ref[...], preferred_element_type=jnp.float32)
        h0v, c0v = gates_to_hc(g0, c0v)

        # TODO(synk): inter-layer LSTM dropout (p=0.2) is training-only noise;
        #             implemented as eval-mode identity.

        # layer 1: single fused K=2H matmul over [h0 ; h1] (one MXU fill
        # instead of two, and one fewer VPU add on the serial path).
        h01 = jnp.concatenate([h0v, h1v], axis=-1)          # (Bp, 2H)
        g1 = jnp.dot(h01, w1_ref[...],
                     preferred_element_type=jnp.float32) + b1b
        h1v, c1v = gates_to_hc(g1, c1v)

        # dropout1 (eval identity) -> relu; stash for the batched fc1 matmul.
        # (8,128)-aligned unmasked store.
        hstash_scr[pl.ds(t * Bp, Bp), :] = jnp.maximum(h1v, 0.0)

    # ---- epilogue: one batched fc1 matmul + single lane-dense output store --
    y = (jnp.dot(hstash_scr[...], wfc_ref[...],
                 preferred_element_type=jnp.float32)
         + jnp.broadcast_to(bfc_ref[...], (TB, NOUT)))
    y_ref[...] = y.astype(y_ref.dtype)

    # final carried state, written once (outputs alias h0/c0 buffers)
    hN_ref[0] = h0v
    hN_ref[1] = h1v
    cN_ref[0] = c0v
    cN_ref[1] = c1v


@jax.jit
def rad_recurrent_forward(x_btd, h0, c0, params):
    """x_btd: (B, T, data_dim_predict); h0/c0: (L, B, H).  Returns (y, (hN, cN))."""
    B, T, I = x_btd.shape
    L, _, H = h0.shape
    d_out = params["wfc_t"].shape[1]       # true (unpadded) output width
    Bp = ((B + 7) // 8) * 8                # pad batch to the f32 sublane count

    # time-major, batch-padded, flattened to (T*Bp, I) for the hoisted projection
    x_tbd = jnp.transpose(x_btd, (1, 0, 2))                 # (T, B, I)
    x_pad = jnp.pad(x_tbd, ((0, 0), (0, Bp - B), (0, 0)))   # (T, Bp, I)
    x_flat = x_pad.reshape(T * Bp, I)
    h0p = jnp.pad(h0, ((0, 0), (0, Bp - B), (0, 0)))        # (L, Bp, H)
    c0p = jnp.pad(c0, ((0, 0), (0, Bp - B), (0, 0)))

    vmem = pl.BlockSpec(memory_space=pltpu.MemorySpace.VMEM)
    args = (x_flat, h0p, c0p,
            params["wih0_t"], params["whh0_t"], params["b0"],
            params["w1_t"], params["b1"],
            params["wfc_pad"], params["bfc_pad"])

    y_flat, hN, cN = pl.pallas_call(
        _lstm_predict_kernel,
        out_shape=(
            jax.ShapeDtypeStruct((T * Bp, OUT_LANES), x_btd.dtype),
            jax.ShapeDtypeStruct((L, Bp, H), jnp.float32),
            jax.ShapeDtypeStruct((L, Bp, H), jnp.float32),
        ),
        in_specs=[vmem] * len(args),
        out_specs=(vmem, vmem, vmem),
        scratch_shapes=[
            pltpu.VMEM((T * Bp, 4 * H), jnp.float32),   # precomputed input gates
            pltpu.VMEM((T * Bp, H), jnp.float32),       # relu(h1) stash for fc1
        ],
        input_output_aliases={1: 1, 2: 2},              # h0 -> hN, c0 -> cN
    )(*args)

    # drop batch padding and the zero-padded output lanes
    y = y_flat.reshape(T, Bp, OUT_LANES)[:, :B, :d_out]
    return jnp.transpose(y, (1, 0, 2)), (hN[:, :B, :], cN[:, :B, :])


# --- deterministic parameter construction (PyTorch-default-style uniform) ----
def make_params(key, in_dim, hidden, out_dim):
    k = 1.0 / jnp.sqrt(hidden)
    keys = jax.random.split(key, 10)

    def u(kk, shape):
        return jax.random.uniform(kk, shape, jnp.float32, minval=-k, maxval=k)

    # layer 0: input size = in_dim ; layer 1: input size = hidden
    w_ih0 = u(keys[0], (4 * hidden, in_dim))
    w_hh0 = u(keys[1], (4 * hidden, hidden))
    b_ih0 = u(keys[2], (4 * hidden,))
    b_hh0 = u(keys[3], (4 * hidden,))
    w_ih1 = u(keys[4], (4 * hidden, hidden))
    w_hh1 = u(keys[5], (4 * hidden, hidden))
    b_ih1 = u(keys[6], (4 * hidden,))
    b_hh1 = u(keys[7], (4 * hidden,))
    w_fc = u(keys[8], (out_dim, hidden))
    b_fc = u(keys[9], (out_dim,))

    wih1_t = w_ih1.T                                     # (H, 4H)
    whh1_t = w_hh1.T                                     # (H, 4H)
    wfc_t = w_fc.T                                       # (H, out_dim)
    bfc = b_fc.reshape(1, out_dim)                       # (1, out_dim)

    return dict(
        wih0_t=w_ih0.T,                                  # (in_dim, 4H)
        whh0_t=w_hh0.T,                                  # (H, 4H)
        b0=(b_ih0 + b_hh0).reshape(1, 4 * hidden),       # (1, 4H)
        wih1_t=wih1_t,                                   # (H, 4H)  (reference)
        whh1_t=whh1_t,                                   # (H, 4H)  (reference)
        w1_t=jnp.concatenate([wih1_t, whh1_t], axis=0),  # (2H, 4H) fused layer-1
        b1=(b_ih1 + b_hh1).reshape(1, 4 * hidden),       # (1, 4H)
        wfc_t=wfc_t,                                     # (H, out_dim) (reference)
        bfc=bfc,                                         # (1, out_dim) (reference)
        # lane-dense (zero-padded) fc1 operands for the kernel
        wfc_pad=jnp.pad(wfc_t, ((0, 0), (0, OUT_LANES - out_dim))),  # (H, 128)
        bfc_pad=jnp.pad(bfc, ((0, 0), (0, OUT_LANES - out_dim))),    # (1, 128)
    )


# --- pure-JAX reference (mirrors torch.nn.LSTM + relu + Linear, eval mode) ---
def reference_forward(x_btd, h0, c0, params):
    H = h0.shape[-1]

    def cell(x_t, h, c, wih_t, whh_t, b):
        gates = x_t @ wih_t + h @ whh_t + b
        i = jax.nn.sigmoid(gates[:, :H])
        f = jax.nn.sigmoid(gates[:, H:2 * H])
        g = jnp.tanh(gates[:, 2 * H:3 * H])
        o = jax.nn.sigmoid(gates[:, 3 * H:])
        c = f * c + i * g
        h = o * jnp.tanh(c)
        return h, c

    B, T, _ = x_btd.shape
    h = [h0[0], h0[1]]
    c = [c0[0], c0[1]]
    ys = []
    for t in range(T):
        x_t = x_btd[:, t, :]
        h[0], c[0] = cell(x_t, h[0], c[0],
                          params["wih0_t"], params["whh0_t"], params["b0"])
        h[1], c[1] = cell(h[0], h[1], c[1],
                          params["wih1_t"], params["whh1_t"], params["b1"])
        ys.append(jnp.maximum(h[1], 0.0) @ params["wfc_t"] + params["bfc"])
    return jnp.stack(ys, axis=1), (jnp.stack(h, 0), jnp.stack(c, 0))


if __name__ == "__main__":
    key = jax.random.PRNGKey(0)
    k_x, k_h, k_c, k_p = jax.random.split(key, 4)

    x = jax.random.normal(k_x, (BATCH, SEQ, DATA_DIM_PREDICT), jnp.float32)
    # hidden_predict would normally come from forward_context; use small random
    # state here to exercise the carried-state path.
    h0 = 0.1 * jax.random.normal(k_h, (LSTM_DEPTH, BATCH, LSTM_DIM), jnp.float32)
    c0 = 0.1 * jax.random.normal(k_c, (LSTM_DEPTH, BATCH, LSTM_DIM), jnp.float32)
    params = make_params(k_p, DATA_DIM_PREDICT, LSTM_DIM, DATA_DIM_PREDICT)

    y, (hN, cN) = rad_recurrent_forward(x, h0, c0, params)
    jax.block_until_ready((y, hN, cN))

    y_ref, (hN_ref, cN_ref) = reference_forward(x, h0, c0, params)
    assert y.shape == (BATCH, SEQ, DATA_DIM_PREDICT)
    assert jnp.max(jnp.abs(y - y_ref)) < 1e-4, "y mismatch vs pure-JAX reference"
    assert jnp.max(jnp.abs(hN - hN_ref)) < 1e-4, "hN mismatch vs pure-JAX reference"
    assert jnp.max(jnp.abs(cN - cN_ref)) < 1e-4, "cN mismatch vs pure-JAX reference"

    print("KERNEL_OK")
</pallas_src>

<mosaic_0001>
module attributes {stable_mosaic.version = 11 : i64} {
  func.func @_lstm_predict_kernel(%arg0: memref<64x1xf32, #tpu.memory_space<vmem>>, %arg1: memref<2x8x128xf32, #tpu.memory_space<vmem>>, %arg2: memref<2x8x128xf32, #tpu.memory_space<vmem>>, %arg3: memref<1x512xf32, #tpu.memory_space<vmem>>, %arg4: memref<128x512xf32, #tpu.memory_space<vmem>>, %arg5: memref<1x512xf32, #tpu.memory_space<vmem>>, %arg6: memref<256x512xf32, #tpu.memory_space<vmem>>, %arg7: memref<1x512xf32, #tpu.memory_space<vmem>>, %arg8: memref<128x128xf32, #tpu.memory_space<vmem>>, %arg9: memref<1x128xf32, #tpu.memory_space<vmem>>, %arg10: memref<64x128xf32, #tpu.memory_space<vmem>>, %arg11: memref<2x8x128xf32, #tpu.memory_space<vmem>>, %arg12: memref<2x8x128xf32, #tpu.memory_space<vmem>>, %arg13: memref<64x512xf32, #tpu.memory_space<vmem>>, %arg14: memref<64x128xf32, #tpu.memory_space<vmem>>) attributes {dimension_semantics = [], scalar_prefetch = 0 : i64, scratch_operands = 2 : i64, tpu.core_type = #tpu.core_type<tc>} {
    %c0 = arith.constant 0 : index
    %c0_0 = arith.constant 0 : index
    %0 = vector.load %arg0[%c0, %c0_0] : memref<64x1xf32, #tpu.memory_space<vmem>>, vector<64x1xf32>
    %c0_1 = arith.constant 0 : index
    %c0_2 = arith.constant 0 : index
    %1 = vector.load %arg3[%c0_1, %c0_2] : memref<1x512xf32, #tpu.memory_space<vmem>>, vector<1x512xf32>
    %2 = vector.broadcast %0 : vector<64x1xf32> to vector<64x512xf32>
    %3 = vector.broadcast %1 : vector<1x512xf32> to vector<64x512xf32>
    %4 = arith.mulf %2, %3 : vector<64x512xf32>
    %c0_3 = arith.constant 0 : index
    %c0_4 = arith.constant 0 : index
    %5 = vector.load %arg5[%c0_3, %c0_4] : memref<1x512xf32, #tpu.memory_space<vmem>>, vector<1x512xf32>
    %6 = vector.broadcast %5 : vector<1x512xf32> to vector<64x512xf32>
    %7 = arith.addf %4, %6 : vector<64x512xf32>
    %c0_5 = arith.constant 0 : index
    %c0_6 = arith.constant 0 : index
    %8 = vector.load %arg13[%c0_5, %c0_6] : memref<64x512xf32, #tpu.memory_space<vmem>>, vector<64x512xf32>
    tpu.vector_store %arg13[%c0_5, %c0_6], %7 {strides = array<i32>} : memref<64x512xf32, #tpu.memory_space<vmem>>, vector<64x512xf32>,
    %c0_7 = arith.constant 0 : index
    %c0_8 = arith.constant 0 : index
    %9 = vector.load %arg7[%c0_7, %c0_8] : memref<1x512xf32, #tpu.memory_space<vmem>>, vector<1x512xf32>
    %10 = vector.shape_cast %9 : vector<1x512xf32> to vector<1x512xf32>
    %11 = vector.broadcast %10 : vector<1x512xf32> to vector<8x512xf32>
    %c0_9 = arith.constant 0 : index
    %c0_10 = arith.constant 0 : index
    %c0_11 = arith.constant 0 : index
    %12 = vector.load %arg1[%c0_9, %c0_10, %c0_11] : memref<2x8x128xf32, #tpu.memory_space<vmem>>, vector<1x8x128xf32>
    %13 = vector.shape_cast %12 : vector<1x8x128xf32> to vector<8x128xf32>
    %c0_12 = arith.constant 0 : index
    %c0_13 = arith.constant 0 : index
    %c0_14 = arith.constant 0 : index
    %14 = vector.load %arg2[%c0_12, %c0_13, %c0_14] : memref<2x8x128xf32, #tpu.memory_space<vmem>>, vector<1x8x128xf32>
    %15 = vector.shape_cast %14 : vector<1x8x128xf32> to vector<8x128xf32>
    %c1 = arith.constant 1 : index
    %c0_15 = arith.constant 0 : index
    %c0_16 = arith.constant 0 : index
    %16 = vector.load %arg1[%c1, %c0_15, %c0_16] : memref<2x8x128xf32, #tpu.memory_space<vmem>>, vector<1x8x128xf32>
    %17 = vector.shape_cast %16 : vector<1x8x128xf32> to vector<8x128xf32>
    %c1_17 = arith.constant 1 : index
    %c0_18 = arith.constant 0 : index
    %c0_19 = arith.constant 0 : index
    %18 = vector.load %arg2[%c1_17, %c0_18, %c0_19] : memref<2x8x128xf32, #tpu.memory_space<vmem>>, vector<1x8x128xf32>
    %19 = vector.shape_cast %18 : vector<1x8x128xf32> to vector<8x128xf32>
    %c0_20 = arith.constant 0 : index
    %c0_21 = arith.constant 0 : index
    %20 = vector.load %arg13[%c0_20, %c0_21] : memref<64x512xf32, #tpu.memory_space<vmem>>, vector<8x512xf32>
    %c0_22 = arith.constant 0 : index
    %c0_23 = arith.constant 0 : index
    %21 = vector.load %arg4[%c0_22, %c0_23] : memref<128x512xf32, #tpu.memory_space<vmem>>, vector<128x512xf32>
    %cst = arith.constant dense<0.000000e+00> : vector<8x512xf32>
    %22 = tpu.matmul %13, %21, %cst {dimension_numbers = #tpu.dot_dimension_numbers<[1], [0], [0], [1], [0, 0, 1, 1], [], []>} : vector<8x128xf32>, vector<128x512xf32>, vector<8x512xf32> -> vector<8x512xf32>
    %23 = arith.addf %20, %22 : vector<8x512xf32>
    %24 = vector.extract_strided_slice %23 {offsets = [0, 0], sizes = [8, 128], strides = [1, 1]} : vector<8x512xf32> to vector<8x128xf32>
    %25 = arith.negf %24 : vector<8x128xf32>
    %26 = math.exp %25 : vector<8x128xf32>
    %cst_24 = arith.constant 1.000000e+00 : f32
    %27 = vector.broadcast %cst_24 : f32 to vector<8x128xf32>
    %28 = arith.addf %27, %26 : vector<8x128xf32>
    %29 = arith.divf %27, %28 : vector<8x128xf32>
    %30 = vector.extract_strided_slice %23 {offsets = [0, 128], sizes = [8, 128], strides = [1, 1]} : vector<8x512xf32> to vector<8x128xf32>
    %31 = arith.negf %30 : vector<8x128xf32>
    %32 = math.exp %31 : vector<8x128xf32>
    %cst_25 = arith.constant 1.000000e+00 : f32
    %33 = vector.broadcast %cst_25 : f32 to vector<8x128xf32>
    %34 = arith.addf %33, %32 : vector<8x128xf32>
    %35 = arith.divf %33, %34 : vector<8x128xf32>
    %36 = vector.extract_strided_slice %23 {offsets = [0, 256], sizes = [8, 128], strides = [1, 1]} : vector<8x512xf32> to vector<8x128xf32>
    %37 = math.tanh %36 : vector<8x128xf32>
    %38 = vector.extract_strided_slice %23 {offsets = [0, 384], sizes = [8, 128], strides = [1, 1]} : vector<8x512xf32> to vector<8x128xf32>
    %39 = arith.negf %38 : vector<8x128xf32>
    %40 = math.exp %39 : vector<8x128xf32>
    %cst_26 = arith.constant 1.000000e+00 : f32
    %41 = vector.broadcast %cst_26 : f32 to vector<8x128xf32>
    %42 = arith.addf %41, %40 : vector<8x128xf32>
    %43 = arith.divf %41, %42 : vector<8x128xf32>
    %44 = arith.mulf %35, %15 : vector<8x128xf32>
    %45 = arith.mulf %29, %37 : vector<8x128xf32>
    %46 = arith.addf %44, %45 : vector<8x128xf32>
    %47 = math.tanh %46 : vector<8x128xf32>
    %48 = arith.mulf %43, %47 : vector<8x128xf32>
    %49 = tpu.concatenate %48, %17 in 1 : vector<8x128xf32>, vector<8x128xf32> -> vector<8x256xf32>
    %c0_27 = arith.constant 0 : index
    %c0_28 = arith.constant 0 : index
    %50 = vector.load %arg6[%c0_27, %c0_28] : memref<256x512xf32, #tpu.memory_space<vmem>>, vector<256x512xf32>
    %cst_29 = arith.constant dense<0.000000e+00> : vector<8x512xf32>
    %51 = tpu.matmul %49, %50, %cst_29 {dimension_numbers = #tpu.dot_dimension_numbers<[1], [0], [0], [1], [0, 0, 1, 1], [], []>} : vector<8x256xf32>, vector<256x512xf32>, vector<8x512xf32> -> vector<8x512xf32>
    %52 = arith.addf %51, %11 : vector<8x512xf32>
    %53 = vector.extract_strided_slice %52 {offsets = [0, 0], sizes = [8, 128], strides = [1, 1]} : vector<8x512xf32> to vector<8x128xf32>
    %54 = arith.negf %53 : vector<8x128xf32>
    %55 = math.exp %54 : vector<8x128xf32>
    %cst_30 = arith.constant 1.000000e+00 : f32
    %56 = vector.broadcast %cst_30 : f32 to vector<8x128xf32>
    %57 = arith.addf %56, %55 : vector<8x128xf32>
    %58 = arith.divf %56, %57 : vector<8x128xf32>
    %59 = vector.extract_strided_slice %52 {offsets = [0, 128], sizes = [8, 128], strides = [1, 1]} : vector<8x512xf32> to vector<8x128xf32>
    %60 = arith.negf %59 : vector<8x128xf32>
    %61 = math.exp %60 : vector<8x128xf32>
    %cst_31 = arith.constant 1.000000e+00 : f32
    %62 = vector.broadcast %cst_31 : f32 to vector<8x128xf32>
    %63 = arith.addf %62, %61 : vector<8x128xf32>
    %64 = arith.divf %62, %63 : vector<8x128xf32>
    %65 = vector.extract_strided_slice %52 {offsets = [0, 256], sizes = [8, 128], strides = [1, 1]} : vector<8x512xf32> to vector<8x128xf32>
    %66 = math.tanh %65 : vector<8x128xf32>
    %67 = vector.extract_strided_slice %52 {offsets = [0, 384], sizes = [8, 128], strides = [1, 1]} : vector<8x512xf32> to vector<8x128xf32>
    %68 = arith.negf %67 : vector<8x128xf32>
    %69 = math.exp %68 : vector<8x128xf32>
    %cst_32 = arith.constant 1.000000e+00 : f32
    %70 = vector.broadcast %cst_32 : f32 to vector<8x128xf32>
    %71 = arith.addf %70, %69 : vector<8x128xf32>
    %72 = arith.divf %70, %71 : vector<8x128xf32>
    %73 = arith.mulf %64, %19 : vector<8x128xf32>
    %74 = arith.mulf %58, %66 : vector<8x128xf32>
    %75 = arith.addf %73, %74 : vector<8x128xf32>
    %76 = math.tanh %75 : vector<8x128xf32>
    %77 = arith.mulf %72, %76 : vector<8x128xf32>
    %cst_33 = arith.constant 0.000000e+00 : f32
    %78 = vector.broadcast %cst_33 : f32 to vector<8x128xf32>
    %79 = arith.maximumf %77, %78 : vector<8x128xf32>
    %c0_34 = arith.constant 0 : index
    %c0_35 = arith.constant 0 : index
    %80 = vector.load %arg14[%c0_34, %c0_35] : memref<64x128xf32, #tpu.memory_space<vmem>>, vector<8x128xf32>
    tpu.vector_store %arg14[%c0_34, %c0_35], %79 {strides = array<i32>} : memref<64x128xf32, #tpu.memory_space<vmem>>, vector<8x128xf32>,
    %c8 = arith.constant 8 : index
    %c0_36 = arith.constant 0 : index
    %81 = vector.load %arg13[%c8, %c0_36] : memref<64x512xf32, #tpu.memory_space<vmem>>, vector<8x512xf32>
    %c0_37 = arith.constant 0 : index
    %c0_38 = arith.constant 0 : index
    %82 = vector.load %arg4[%c0_37, %c0_38] : memref<128x512xf32, #tpu.memory_space<vmem>>, vector<128x512xf32>
    %cst_39 = arith.constant dense<0.000000e+00> : vector<8x512xf32>
    %83 = tpu.matmul %48, %82, %cst_39 {dimension_numbers = #tpu.dot_dimension_numbers<[1], [0], [0], [1], [0, 0, 1, 1], [], []>} : vector<8x128xf32>, vector<128x512xf32>, vector<8x512xf32> -> vector<8x512xf32>
    %84 = arith.addf %81, %83 : vector<8x512xf32>
    %85 = vector.extract_strided_slice %84 {offsets = [0, 0], sizes = [8, 128], strides = [1, 1]} : vector<8x512xf32> to vector<8x128xf32>
    %86 = arith.negf %85 : vector<8x128xf32>
    %87 = math.exp %86 : vector<8x128xf32>
    %cst_40 = arith.constant 1.000000e+00 : f32
    %88 = vector.broadcast %cst_40 : f32 to vector<8x128xf32>
    %89 = arith.addf %88, %87 : vector<8x128xf32>
    %90 = arith.divf %88, %89 : vector<8x128xf32>
    %91 = vector.extract_strided_slice %84 {offsets = [0, 128], sizes = [8, 128], strides = [1, 1]} : vector<8x512xf32> to vector<8x128xf32>
    %92 = arith.negf %91 : vector<8x128xf32>
    %93 = math.exp %92 : vector<8x128xf32>
    %cst_41 = arith.constant 1.000000e+00 : f32
    %94 = vector.broadcast %cst_41 : f32 to vector<8x128xf32>
    %95 = arith.addf %94, %93 : vector<8x128xf32>
    %96 = arith.divf %94, %95 : vector<8x128xf32>
    %97 = vector.extract_strided_slice %84 {offsets = [0, 256], sizes = [8, 128], strides = [1, 1]} : vector<8x512xf32> to vector<8x128xf32>
    %98 = math.tanh %97 : vector<8x128xf32>
    %99 = vector.extract_strided_slice %84 {offsets = [0, 384], sizes = [8, 128], strides = [1, 1]} : vector<8x512xf32> to vector<8x128xf32>
    %100 = arith.negf %99 : vector<8x128xf32>
    %101 = math.exp %100 : vector<8x128xf32>
    %cst_42 = arith.constant 1.000000e+00 : f32
    %102 = vector.broadcast %cst_42 : f32 to vector<8x128xf32>
    %103 = arith.addf %102, %101 : vector<8x128xf32>
    %104 = arith.divf %102, %103 : vector<8x128xf32>
    %105 = arith.mulf %96, %46 : vector<8x128xf32>
    %106 = arith.mulf %90, %98 : vector<8x128xf32>
    %107 = arith.addf %105, %106 : vector<8x128xf32>
    %108 = math.tanh %107 : vector<8x128xf32>
    %109 = arith.mulf %104, %108 : vector<8x128xf32>
    %110 = tpu.concatenate %109, %77 in 1 : vector<8x128xf32>, vector<8x128xf32> -> vector<8x256xf32>
    %c0_43 = arith.constant 0 : index
    %c0_44 = arith.constant 0 : index
    %111 = vector.load %arg6[%c0_43, %c0_44] : memref<256x512xf32, #tpu.memory_space<vmem>>, vector<256x512xf32>
    %cst_45 = arith.constant dense<0.000000e+00> : vector<8x512xf32>
    %112 = tpu.matmul %110, %111, %cst_45 {dimension_numbers = #tpu.dot_dimension_numbers<[1], [0], [0], [1], [0, 0, 1, 1], [], []>} : vector<8x256xf32>, vector<256x512xf32>, vector<8x512xf32> -> vector<8x512xf32>
    %113 = arith.addf %112, %11 : vector<8x512xf32>
    %114 = vector.extract_strided_slice %113 {offsets = [0, 0], sizes = [8, 128], strides = [1, 1]} : vector<8x512xf32> to vector<8x128xf32>
    %115 = arith.negf %114 : vector<8x128xf32>
    %116 = math.exp %115 : vector<8x128xf32>
    %cst_46 = arith.constant 1.000000e+00 : f32
    %117 = vector.broadcast %cst_46 : f32 to vector<8x128xf32>
    %118 = arith.addf %117, %116 : vector<8x128xf32>
    %119 = arith.divf %117, %118 : vector<8x128xf32>
    %120 = vector.extract_strided_slice %113 {offsets = [0, 128], sizes = [8, 128], strides = [1, 1]} : vector<8x512xf32> to vector<8x128xf32>
    %121 = arith.negf %120 : vector<8x128xf32>
    %122 = math.exp %121 : vector<8x128xf32>
    %cst_47 = arith.constant 1.000000e+00 : f32
    %123 = vector.broadcast %cst_47 : f32 to vector<8x128xf32>
    %124 = arith.addf %123, %122 : vector<8x128xf32>
    %125 = arith.divf %123, %124 : vector<8x128xf32>
    %126 = vector.extract_strided_slice %113 {offsets = [0, 256], sizes = [8, 128], strides = [1, 1]} : vector<8x512xf32> to vector<8x128xf32>
    %127 = math.tanh %126 : vector<8x128xf32>
    %128 = vector.extract_strided_slice %113 {offsets = [0, 384], sizes = [8, 128], strides = [1, 1]} : vector<8x512xf32> to vector<8x128xf32>
    %129 = arith.negf %128 : vector<8x128xf32>
    %130 = math.exp %129 : vector<8x128xf32>
    %cst_48 = arith.constant 1.000000e+00 : f32
    %131 = vector.broadcast %cst_48 : f32 to vector<8x128xf32>
    %132 = arith.addf %131, %130 : vector<8x128xf32>
    %133 = arith.divf %131, %132 : vector<8x128xf32>
    %134 = arith.mulf %125, %75 : vector<8x128xf32>
    %135 = arith.mulf %119, %127 : vector<8x128xf32>
    %136 = arith.addf %134, %135 : vector<8x128xf32>
    %137 = math.tanh %136 : vector<8x128xf32>
    %138 = arith.mulf %133, %137 : vector<8x128xf32>
    %cst_49 = arith.constant 0.000000e+00 : f32
    %139 = vector.broadcast %cst_49 : f32 to vector<8x128xf32>
    %140 = arith.maximumf %138, %139 : vector<8x128xf32>
    %c8_50 = arith.constant 8 : index
    %c0_51 = arith.constant 0 : index
    %141 = vector.load %arg14[%c8_50, %c0_51] : memref<64x128xf32, #tpu.memory_space<vmem>>, vector<8x128xf32>
    tpu.vector_store %arg14[%c8_50, %c0_51], %140 {strides = array<i32>} : memref<64x128xf32, #tpu.memory_space<vmem>>, vector<8x128xf32>,
    %c16 = arith.constant 16 : index
    %c0_52 = arith.constant 0 : index
    %142 = vector.load %arg13[%c16, %c0_52] : memref<64x512xf32, #tpu.memory_space<vmem>>, vector<8x512xf32>
    %c0_53 = arith.constant 0 : index
    %c0_54 = arith.constant 0 : index
    %143 = vector.load %arg4[%c0_53, %c0_54] : memref<128x512xf32, #tpu.memory_space<vmem>>, vector<128x512xf32>
    %cst_55 = arith.constant dense<0.000000e+00> : vector<8x512xf32>
    %144 = tpu.matmul %109, %143, %cst_55 {dimension_numbers = #tpu.dot_dimension_numbers<[1], [0], [0], [1], [0, 0, 1, 1], [], []>} : vector<8x128xf32>, vector<128x512xf32>, vector<8x512xf32> -> vector<8x512xf32>
    %145 = arith.addf %142, %144 : vector<8x512xf32>
    %146 = vector.extract_strided_slice %145 {offsets = [0, 0], sizes = [8, 128], strides = [1, 1]} : vector<8x512xf32> to vector<8x128xf32>
    %147 = arith.negf %146 : vector<8x128xf32>
    %148 = math.exp %147 : vector<8x128xf32>
    %cst_56 = arith.constant 1.000000e+00 : f32
    %149 = vector.broadcast %cst_56 : f32 to vector<8x128xf32>
    %150 = arith.addf %149, %148 : vector<8x128xf32>
    %151 = arith.divf %149, %150 : vector<8x128xf32>
    %152 = vector.extract_strided_slice %145 {offsets = [0, 128], sizes = [8, 128], strides = [1, 1]} : vector<8x512xf32> to vector<8x128xf32>
    %153 = arith.negf %152 : vector<8x128xf32>
    %154 = math.exp %153 : vector<8x128xf32>
    %cst_57 = arith.constant 1.000000e+00 : f32
    %155 = vector.broadcast %cst_57 : f32 to vector<8x128xf32>
    %156 = arith.addf %155, %154 : vector<8x128xf32>
    %157 = arith.divf %155, %156 : vector<8x128xf32>
    %158 = vector.extract_strided_slice %145 {offsets = [0, 256], sizes = [8, 128], strides = [1, 1]} : vector<8x512xf32> to vector<8x128xf32>
    %159 = math.tanh %158 : vector<8x128xf32>
    %160 = vector.extract_strided_slice %145 {offsets = [0, 384], sizes = [8, 128], strides = [1, 1]} : vector<8x512xf32> to vector<8x128xf32>
    %161 = arith.negf %160 : vector<8x128xf32>
    %162 = math.exp %161 : vector<8x128xf32>
    %cst_58 = arith.constant 1.000000e+00 : f32
    %163 = vector.broadcast %cst_58 : f32 to vector<8x128xf32>
    %164 = arith.addf %163, %162 : vector<8x128xf32>
    %165 = arith.divf %163, %164 : vector<8x128xf32>
    %166 = arith.mulf %157, %107 : vector<8x128xf32>
    %167 = arith.mulf %151, %159 : vector<8x128xf32>
    %168 = arith.addf %166, %167 : vector<8x128xf32>
    %169 = math.tanh %168 : vector<8x128xf32>
    %170 = arith.mulf %165, %169 : vector<8x128xf32>
    %171 = tpu.concatenate %170, %138 in 1 : vector<8x128xf32>, vector<8x128xf32> -> vector<8x256xf32>
    %c0_59 = arith.constant 0 : index
    %c0_60 = arith.constant 0 : index
    %172 = vector.load %arg6[%c0_59, %c0_60] : memref<256x512xf32, #tpu.memory_space<vmem>>, vector<256x512xf32>
    %cst_61 = arith.constant dense<0.000000e+00> : vector<8x512xf32>
    %173 = tpu.matmul %171, %172, %cst_61 {dimension_numbers = #tpu.dot_dimension_numbers<[1], [0], [0], [1], [0, 0, 1, 1], [], []>} : vector<8x256xf32>, vector<256x512xf32>, vector<8x512xf32> -> vector<8x512xf32>
    %174 = arith.addf %173, %11 : vector<8x512xf32>
    %175 = vector.extract_strided_slice %174 {offsets = [0, 0], sizes = [8, 128], strides = [1, 1]} : vector<8x512xf32> to vector<8x128xf32>
    %176 = arith.negf %175 : vector<8x128xf32>
    %177 = math.exp %176 : vector<8x128xf32>
    %cst_62 = arith.constant 1.000000e+00 : f32
    %178 = vector.broadcast %cst_62 : f32 to vector<8x128xf32>
    %179 = arith.addf %178, %177 : vector<8x128xf32>
    %180 = arith.divf %178, %179 : vector<8x128xf32>
    %181 = vector.extract_strided_slice %174 {offsets = [0, 128], sizes = [8, 128], strides = [1, 1]} : vector<8x512xf32> to vector<8x128xf32>
    %182 = arith.negf %181 : vector<8x128xf32>
    %183 = math.exp %182 : vector<8x128xf32>
    %cst_63 = arith.constant 1.000000e+00 : f32
    %184 = vector.broadcast %cst_63 : f32 to vector<8x128xf32>
    %185 = arith.addf %184, %183 : vector<8x128xf32>
    %186 = arith.divf %184, %185 : vector<8x128xf32>
    %187 = vector.extract_strided_slice %174 {offsets = [0, 256], sizes = [8, 128], strides = [1, 1]} : vector<8x512xf32> to vector<8x128xf32>
    %188 = math.tanh %187 : vector<8x128xf32>
    %189 = vector.extract_strided_slice %174 {offsets = [0, 384], sizes = [8, 128], strides = [1, 1]} : vector<8x512xf32> to vector<8x128xf32>
    %190 = arith.negf %189 : vector<8x128xf32>
    %191 = math.exp %190 : vector<8x128xf32>
    %cst_64 = arith.constant 1.000000e+00 : f32
    %192 = vector.broadcast %cst_64 : f32 to vector<8x128xf32>
    %193 = arith.addf %192, %191 : vector<8x128xf32>
    %194 = arith.divf %192, %193 : vector<8x128xf32>
    %195 = arith.mulf %186, %136 : vector<8x128xf32>
    %196 = arith.mulf %180, %188 : vector<8x128xf32>
    %197 = arith.addf %195, %196 : vector<8x128xf32>
    %198 = math.tanh %197 : vector<8x128xf32>
    %199 = arith.mulf %194, %198 : vector<8x128xf32>
    %cst_65 = arith.constant 0.000000e+00 : f32
    %200 = vector.broadcast %cst_65 : f32 to vector<8x128xf32>
    %201 = arith.maximumf %199, %200 : vector<8x128xf32>
    %c16_66 = arith.constant 16 : index
    %c0_67 = arith.constant 0 : index
    %202 = vector.load %arg14[%c16_66, %c0_67] : memref<64x128xf32, #tpu.memory_space<vmem>>, vector<8x128xf32>
    tpu.vector_store %arg14[%c16_66, %c0_67], %201 {strides = array<i32>} : memref<64x128xf32, #tpu.memory_space<vmem>>, vector<8x128xf32>,
    %c24 = arith.constant 24 : index
    %c0_68 = arith.constant 0 : index
    %203 = vector.load %arg13[%c24, %c0_68] : memref<64x512xf32, #tpu.memory_space<vmem>>, vector<8x512xf32>
    %c0_69 = arith.constant 0 : index
    %c0_70 = arith.constant 0 : index
    %204 = vector.load %arg4[%c0_69, %c0_70] : memref<128x512xf32, #tpu.memory_space<vmem>>, vector<128x512xf32>
    %cst_71 = arith.constant dense<0.000000e+00> : vector<8x512xf32>
    %205 = tpu.matmul %170, %204, %cst_71 {dimension_numbers = #tpu.dot_dimension_numbers<[1], [0], [0], [1], [0, 0, 1, 1], [], []>} : vector<8x128xf32>, vector<128x512xf32>, vector<8x512xf32> -> vector<8x512xf32>
    %206 = arith.addf %203, %205 : vector<8x512xf32>
    %207 = vector.extract_strided_slice %206 {offsets = [0, 0], sizes = [8, 128], strides = [1, 1]} : vector<8x512xf32> to vector<8x128xf32>
    %208 = arith.negf %207 : vector<8x128xf32>
    %209 = math.exp %208 : vector<8x128xf32>
    %cst_72 = arith.constant 1.000000e+00 : f32
    %210 = vector.broadcast %cst_72 : f32 to vector<8x128xf32>
    %211 = arith.addf %210, %209 : vector<8x128xf32>
    %212 = arith.divf %210, %211 : vector<8x128xf32>
    %213 = vector.extract_strided_slice %206 {offsets = [0, 128], sizes = [8, 128], strides = [1, 1]} : vector<8x512xf32> to vector<8x128xf32>
    %214 = arith.negf %213 : vector<8x128xf32>
    %215 = math.exp %214 : vector<8x128xf32>
    %cst_73 = arith.constant 1.000000e+00 : f32
    %216 = vector.broadcast %cst_73 : f32 to vector<8x128xf32>
    %217 = arith.addf %216, %215 : vector<8x128xf32>
    %218 = arith.divf %216, %217 : vector<8x128xf32>
    %219 = vector.extract_strided_slice %206 {offsets = [0, 256], sizes = [8, 128], strides = [1, 1]} : vector<8x512xf32> to vector<8x128xf32>
    %220 = math.tanh %219 : vector<8x128xf32>
    %221 = vector.extract_strided_slice %206 {offsets = [0, 384], sizes = [8, 128], strides = [1, 1]} : vector<8x512xf32> to vector<8x128xf32>
    %222 = arith.negf %221 : vector<8x128xf32>
    %223 = math.exp %222 : vector<8x128xf32>
    %cst_74 = arith.constant 1.000000e+00 : f32
    %224 = vector.broadcast %cst_74 : f32 to vector<8x128xf32>
    %225 = arith.addf %224, %223 : vector<8x128xf32>
    %226 = arith.divf %224, %225 : vector<8x128xf32>
    %227 = arith.mulf %218, %168 : vector<8x128xf32>
    %228 = arith.mulf %212, %220 : vector<8x128xf32>
    %229 = arith.addf %227, %228 : vector<8x128xf32>
    %230 = math.tanh %229 : vector<8x128xf32>
    %231 = arith.mulf %226, %230 : vector<8x128xf32>
    %232 = tpu.concatenate %231, %199 in 1 : vector<8x128xf32>, vector<8x128xf32> -> vector<8x256xf32>
    %c0_75 = arith.constant 0 : index
    %c0_76 = arith.constant 0 : index
    %233 = vector.load %arg6[%c0_75, %c0_76] : memref<256x512xf32, #tpu.memory_space<vmem>>, vector<256x512xf32>
    %cst_77 = arith.constant dense<0.000000e+00> : vector<8x512xf32>
    %234 = tpu.matmul %232, %233, %cst_77 {dimension_numbers = #tpu.dot_dimension_numbers<[1], [0], [0], [1], [0, 0, 1, 1], [], []>} : vector<8x256xf32>, vector<256x512xf32>, vector<8x512xf32> -> vector<8x512xf32>
    %235 = arith.addf %234, %11 : vector<8x512xf32>
    %236 = vector.extract_strided_slice %235 {offsets = [0, 0], sizes = [8, 128], strides = [1, 1]} : vector<8x512xf32> to vector<8x128xf32>
    %237 = arith.negf %236 : vector<8x128xf32>
    %238 = math.exp %237 : vector<8x128xf32>
    %cst_78 = arith.constant 1.000000e+00 : f32
    %239 = vector.broadcast %cst_78 : f32 to vector<8x128xf32>
    %240 = arith.addf %239, %238 : vector<8x128xf32>
    %241 = arith.divf %239, %240 : vector<8x128xf32>
    %242 = vector.extract_strided_slice %235 {offsets = [0, 128], sizes = [8, 128], strides = [1, 1]} : vector<8x512xf32> to vector<8x128xf32>
    %243 = arith.negf %242 : vector<8x128xf32>
    %244 = math.exp %243 : vector<8x128xf32>
    %cst_79 = arith.constant 1.000000e+00 : f32
    %245 = vector.broadcast %cst_79 : f32 to vector<8x128xf32>
    %246 = arith.addf %245, %244 : vector<8x128xf32>
    %247 = arith.divf %245, %246 : vector<8x128xf32>
    %248 = vector.extract_strided_slice %235 {offsets = [0, 256], sizes = [8, 128], strides = [1, 1]} : vector<8x512xf32> to vector<8x128xf32>
    %249 = math.tanh %248 : vector<8x128xf32>
    %250 = vector.extract_strided_slice %235 {offsets = [0, 384], sizes = [8, 128], strides = [1, 1]} : vector<8x512xf32> to vector<8x128xf32>
    %251 = arith.negf %250 : vector<8x128xf32>
    %252 = math.exp %251 : vector<8x128xf32>
    %cst_80 = arith.constant 1.000000e+00 : f32
    %253 = vector.broadcast %cst_80 : f32 to vector<8x128xf32>
    %254 = arith.addf %253, %252 : vector<8x128xf32>
    %255 = arith.divf %253, %254 : vector<8x128xf32>
    %256 = arith.mulf %247, %197 : vector<8x128xf32>
    %257 = arith.mulf %241, %249 : vector<8x128xf32>
    %258 = arith.addf %256, %257 : vector<8x128xf32>
    %259 = math.tanh %258 : vector<8x128xf32>
    %260 = arith.mulf %255, %259 : vector<8x128xf32>
    %cst_81 = arith.constant 0.000000e+00 : f32
    %261 = vector.broadcast %cst_81 : f32 to vector<8x128xf32>
    %262 = arith.maximumf %260, %261 : vector<8x128xf32>
    %c24_82 = arith.constant 24 : index
    %c0_83 = arith.constant 0 : index
    %263 = vector.load %arg14[%c24_82, %c0_83] : memref<64x128xf32, #tpu.memory_space<vmem>>, vector<8x128xf32>
    tpu.vector_store %arg14[%c24_82, %c0_83], %262 {strides = array<i32>} : memref<64x128xf32, #tpu.memory_space<vmem>>, vector<8x128xf32>,
    %c32 = arith.constant 32 : index
    %c0_84 = arith.constant 0 : index
    %264 = vector.load %arg13[%c32, %c0_84] : memref<64x512xf32, #tpu.memory_space<vmem>>, vector<8x512xf32>
    %c0_85 = arith.constant 0 : index
    %c0_86 = arith.constant 0 : index
    %265 = vector.load %arg4[%c0_85, %c0_86] : memref<128x512xf32, #tpu.memory_space<vmem>>, vector<128x512xf32>
    %cst_87 = arith.constant dense<0.000000e+00> : vector<8x512xf32>
    %266 = tpu.matmul %231, %265, %cst_87 {dimension_numbers = #tpu.dot_dimension_numbers<[1], [0], [0], [1], [0, 0, 1, 1], [], []>} : vector<8x128xf32>, vector<128x512xf32>, vector<8x512xf32> -> vector<8x512xf32>
    %267 = arith.addf %264, %266 : vector<8x512xf32>
    %268 = vector.extract_strided_slice %267 {offsets = [0, 0], sizes = [8, 128], strides = [1, 1]} : vector<8x512xf32> to vector<8x128xf32>
    %269 = arith.negf %268 : vector<8x128xf32>
    %270 = math.exp %269 : vector<8x128xf32>
    %cst_88 = arith.constant 1.000000e+00 : f32
    %271 = vector.broadcast %cst_88 : f32 to vector<8x128xf32>
    %272 = arith.addf %271, %270 : vector<8x128xf32>
    %273 = arith.divf %271, %272 : vector<8x128xf32>
    %274 = vector.extract_strided_slice %267 {offsets = [0, 128], sizes = [8, 128], strides = [1, 1]} : vector<8x512xf32> to vector<8x128xf32>
    %275 = arith.negf %274 : vector<8x128xf32>
    %276 = math.exp %275 : vector<8x128xf32>
    %cst_89 = arith.constant 1.000000e+00 : f32
    %277 = vector.broadcast %cst_89 : f32 to vector<8x128xf32>
    %278 = arith.addf %277, %276 : vector<8x128xf32>
    %279 = arith.divf %277, %278 : vector<8x128xf32>
    %280 = vector.extract_strided_slice %267 {offsets = [0, 256], sizes = [8, 128], strides = [1, 1]} : vector<8x512xf32> to vector<8x128xf32>
    %281 = math.tanh %280 : vector<8x128xf32>
    %282 = vector.extract_strided_slice %267 {offsets = [0, 384], sizes = [8, 128], strides = [1, 1]} : vector<8x512xf32> to vector<8x128xf32>
    %283 = arith.negf %282 : vector<8x128xf32>
    %284 = math.exp %283 : vector<8x128xf32>
    %cst_90 = arith.constant 1.000000e+00 : f32
    %285 = vector.broadcast %cst_90 : f32 to vector<8x128xf32>
    %286 = arith.addf %285, %284 : vector<8x128xf32>
    %287 = arith.divf %285, %286 : vector<8x128xf32>
    %288 = arith.mulf %279, %229 : vector<8x128xf32>
    %289 = arith.mulf %273, %281 : vector<8x128xf32>
    %290 = arith.addf %288, %289 : vector<8x128xf32>
    %291 = math.tanh %290 : vector<8x128xf32>
    %292 = arith.mulf %287, %291 : vector<8x128xf32>
    %293 = tpu.concatenate %292, %260 in 1 : vector<8x128xf32>, vector<8x128xf32> -> vector<8x256xf32>
    %c0_91 = arith.constant 0 : index
    %c0_92 = arith.constant 0 : index
    %294 = vector.load %arg6[%c0_91, %c0_92] : memref<256x512xf32, #tpu.memory_space<vmem>>, vector<256x512xf32>
    %cst_93 = arith.constant dense<0.000000e+00> : vector<8x512xf32>
    %295 = tpu.matmul %293, %294, %cst_93 {dimension_numbers = #tpu.dot_dimension_numbers<[1], [0], [0], [1], [0, 0, 1, 1], [], []>} : vector<8x256xf32>, vector<256x512xf32>, vector<8x512xf32> -> vector<8x512xf32>
    %296 = arith.addf %295, %11 : vector<8x512xf32>
    %297 = vector.extract_strided_slice %296 {offsets = [0, 0], sizes = [8, 128], strides = [1, 1]} : vector<8x512xf32> to vector<8x128xf32>
    %298 = arith.negf %297 : vector<8x128xf32>
    %299 = math.exp %298 : vector<8x128xf32>
    %cst_94 = arith.constant 1.000000e+00 : f32
    %300 = vector.broadcast %cst_94 : f32 to vector<8x128xf32>
    %301 = arith.addf %300, %299 : vector<8x128xf32>
    %302 = arith.divf %300, %301 : vector<8x128xf32>
    %303 = vector.extract_strided_slice %296 {offsets = [0, 128], sizes = [8, 128], strides = [1, 1]} : vector<8x512xf32> to vector<8x128xf32>
    %304 = arith.negf %303 : vector<8x128xf32>
    %305 = math.exp %304 : vector<8x128xf32>
    %cst_95 = arith.constant 1.000000e+00 : f32
    %306 = vector.broadcast %cst_95 : f32 to vector<8x128xf32>
    %307 = arith.addf %306, %305 : vector<8x128xf32>
    %308 = arith.divf %306, %307 : vector<8x128xf32>
    %309 = vector.extract_strided_slice %296 {offsets = [0, 256], sizes = [8, 128], strides = [1, 1]} : vector<8x512xf32> to vector<8x128xf32>
    %310 = math.tanh %309 : vector<8x128xf32>
    %311 = vector.extract_strided_slice %296 {offsets = [0, 384], sizes = [8, 128], strides = [1, 1]} : vector<8x512xf32> to vector<8x128xf32>
    %312 = arith.negf %311 : vector<8x128xf32>
    %313 = math.exp %312 : vector<8x128xf32>
    %cst_96 = arith.constant 1.000000e+00 : f32
    %314 = vector.broadcast %cst_96 : f32 to vector<8x128xf32>
    %315 = arith.addf %314, %313 : vector<8x128xf32>
    %316 = arith.divf %314, %315 : vector<8x128xf32>
    %317 = arith.mulf %308, %258 : vector<8x128xf32>
    %318 = arith.mulf %302, %310 : vector<8x128xf32>
    %319 = arith.addf %317, %318 : vector<8x128xf32>
    %320 = math.tanh %319 : vector<8x128xf32>
    %321 = arith.mulf %316, %320 : vector<8x128xf32>
    %cst_97 = arith.constant 0.000000e+00 : f32
    %322 = vector.broadcast %cst_97 : f32 to vector<8x128xf32>
    %323 = arith.maximumf %321, %322 : vector<8x128xf32>
    %c32_98 = arith.constant 32 : index
    %c0_99 = arith.constant 0 : index
    %324 = vector.load %arg14[%c32_98, %c0_99] : memref<64x128xf32, #tpu.memory_space<vmem>>, vector<8x128xf32>
    tpu.vector_store %arg14[%c32_98, %c0_99], %323 {strides = array<i32>} : memref<64x128xf32, #tpu.memory_space<vmem>>, vector<8x128xf32>,
    %c40 = arith.constant 40 : index
    %c0_100 = arith.constant 0 : index
    %325 = vector.load %arg13[%c40, %c0_100] : memref<64x512xf32, #tpu.memory_space<vmem>>, vector<8x512xf32>
    %c0_101 = arith.constant 0 : index
    %c0_102 = arith.constant 0 : index
    %326 = vector.load %arg4[%c0_101, %c0_102] : memref<128x512xf32, #tpu.memory_space<vmem>>, vector<128x512xf32>
    %cst_103 = arith.constant dense<0.000000e+00> : vector<8x512xf32>
    %327 = tpu.matmul %292, %326, %cst_103 {dimension_numbers = #tpu.dot_dimension_numbers<[1], [0], [0], [1], [0, 0, 1, 1], [], []>} : vector<8x128xf32>, vector<128x512xf32>, vector<8x512xf32> -> vector<8x512xf32>
    %328 = arith.addf %325, %327 : vector<8x512xf32>
    %329 = vector.extract_strided_slice %328 {offsets = [0, 0], sizes = [8, 128], strides = [1, 1]} : vector<8x512xf32> to vector<8x128xf32>
    %330 = arith.negf %329 : vector<8x128xf32>
    %331 = math.exp %330 : vector<8x128xf32>
    %cst_104 = arith.constant 1.000000e+00 : f32
    %332 = vector.broadcast %cst_104 : f32 to vector<8x128xf32>
    %333 = arith.addf %332, %331 : vector<8x128xf32>
    %334 = arith.divf %332, %333 : vector<8x128xf32>
    %335 = vector.extract_strided_slice %328 {offsets = [0, 128], sizes = [8, 128], strides = [1, 1]} : vector<8x512xf32> to vector<8x128xf32>
    %336 = arith.negf %335 : vector<8x128xf32>
    %337 = math.exp %336 : vector<8x128xf32>
    %cst_105 = arith.constant 1.000000e+00 : f32
    %338 = vector.broadcast %cst_105 : f32 to vector<8x128xf32>
    %339 = arith.addf %338, %337 : vector<8x128xf32>
    %340 = arith.divf %338, %339 : vector<8x128xf32>
    %341 = vector.extract_strided_slice %328 {offsets = [0, 256], sizes = [8, 128], strides = [1, 1]} : vector<8x512xf32> to vector<8x128xf32>
    %342 = math.tanh %341 : vector<8x128xf32>
    %343 = vector.extract_strided_slice %328 {offsets = [0, 384], sizes = [8, 128], strides = [1, 1]} : vector<8x512xf32> to vector<8x128xf32>
    %344 = arith.negf %343 : vector<8x128xf32>
    %345 = math.exp %344 : vector<8x128xf32>
    %cst_106 = arith.constant 1.000000e+00 : f32
    %346 = vector.broadcast %cst_106 : f32 to vector<8x128xf32>
    %347 = arith.addf %346, %345 : vector<8x128xf32>
    %348 = arith.divf %346, %347 : vector<8x128xf32>
    %349 = arith.mulf %340, %290 : vector<8x128xf32>
    %350 = arith.mulf %334, %342 : vector<8x128xf32>
    %351 = arith.addf %349, %350 : vector<8x128xf32>
    %352 = math.tanh %351 : vector<8x128xf32>
    %353 = arith.mulf %348, %352 : vector<8x128xf32>
    %354 = tpu.concatenate %353, %321 in 1 : vector<8x128xf32>, vector<8x128xf32> -> vector<8x256xf32>
    %c0_107 = arith.constant 0 : index
    %c0_108 = arith.constant 0 : index
    %355 = vector.load %arg6[%c0_107, %c0_108] : memref<256x512xf32, #tpu.memory_space<vmem>>, vector<256x512xf32>
    %cst_109 = arith.constant dense<0.000000e+00> : vector<8x512xf32>
    %356 = tpu.matmul %354, %355, %cst_109 {dimension_numbers = #tpu.dot_dimension_numbers<[1], [0], [0], [1], [0, 0, 1, 1], [], []>} : vector<8x256xf32>, vector<256x512xf32>, vector<8x512xf32> -> vector<8x512xf32>
    %357 = arith.addf %356, %11 : vector<8x512xf32>
    %358 = vector.extract_strided_slice %357 {offsets = [0, 0], sizes = [8, 128], strides = [1, 1]} : vector<8x512xf32> to vector<8x128xf32>
    %359 = arith.negf %358 : vector<8x128xf32>
    %360 = math.exp %359 : vector<8x128xf32>
    %cst_110 = arith.constant 1.000000e+00 : f32
    %361 = vector.broadcast %cst_110 : f32 to vector<8x128xf32>
    %362 = arith.addf %361, %360 : vector<8x128xf32>
    %363 = arith.divf %361, %362 : vector<8x128xf32>
    %364 = vector.extract_strided_slice %357 {offsets = [0, 128], sizes = [8, 128], strides = [1, 1]} : vector<8x512xf32> to vector<8x128xf32>
    %365 = arith.negf %364 : vector<8x128xf32>
    %366 = math.exp %365 : vector<8x128xf32>
    %cst_111 = arith.constant 1.000000e+00 : f32
    %367 = vector.broadcast %cst_111 : f32 to vector<8x128xf32>
    %368 = arith.addf %367, %366 : vector<8x128xf32>
    %369 = arith.divf %367, %368 : vector<8x128xf32>
    %370 = vector.extract_strided_slice %357 {offsets = [0, 256], sizes = [8, 128], strides = [1, 1]} : vector<8x512xf32> to vector<8x128xf32>
    %371 = math.tanh %370 : vector<8x128xf32>
    %372 = vector.extract_strided_slice %357 {offsets = [0, 384], sizes = [8, 128], strides = [1, 1]} : vector<8x512xf32> to vector<8x128xf32>
    %373 = arith.negf %372 : vector<8x128xf32>
    %374 = math.exp %373 : vector<8x128xf32>
    %cst_112 = arith.constant 1.000000e+00 : f32
    %375 = vector.broadcast %cst_112 : f32 to vector<8x128xf32>
    %376 = arith.addf %375, %374 : vector<8x128xf32>
    %377 = arith.divf %375, %376 : vector<8x128xf32>
    %378 = arith.mulf %369, %319 : vector<8x128xf32>
    %379 = arith.mulf %363, %371 : vector<8x128xf32>
    %380 = arith.addf %378, %379 : vector<8x128xf32>
    %381 = math.tanh %380 : vector<8x128xf32>
    %382 = arith.mulf %377, %381 : vector<8x128xf32>
    %cst_113 = arith.constant 0.000000e+00 : f32
    %383 = vector.broadcast %cst_113 : f32 to vector<8x128xf32>
    %384 = arith.maximumf %382, %383 : vector<8x128xf32>
    %c40_114 = arith.constant 40 : index
    %c0_115 = arith.constant 0 : index
    %385 = vector.load %arg14[%c40_114, %c0_115] : memref<64x128xf32, #tpu.memory_space<vmem>>, vector<8x128xf32>
    tpu.vector_store %arg14[%c40_114, %c0_115], %384 {strides = array<i32>} : memref<64x128xf32, #tpu.memory_space<vmem>>, vector<8x128xf32>,
    %c48 = arith.constant 48 : index
    %c0_116 = arith.constant 0 : index
    %386 = vector.load %arg13[%c48, %c0_116] : memref<64x512xf32, #tpu.memory_space<vmem>>, vector<8x512xf32>
    %c0_117 = arith.constant 0 : index
    %c0_118 = arith.constant 0 : index
    %387 = vector.load %arg4[%c0_117, %c0_118] : memref<128x512xf32, #tpu.memory_space<vmem>>, vector<128x512xf32>
    %cst_119 = arith.constant dense<0.000000e+00> : vector<8x512xf32>
    %388 = tpu.matmul %353, %387, %cst_119 {dimension_numbers = #tpu.dot_dimension_numbers<[1], [0], [0], [1], [0, 0, 1, 1], [], []>} : vector<8x128xf32>, vector<128x512xf32>, vector<8x512xf32> -> vector<8x512xf32>
    %389 = arith.addf %386, %388 : vector<8x512xf32>
    %390 = vector.extract_strided_slice %389 {offsets = [0, 0], sizes = [8, 128], strides = [1, 1]} : vector<8x512xf32> to vector<8x128xf32>
    %391 = arith.negf %390 : vector<8x128xf32>
    %392 = math.exp %391 : vector<8x128xf32>
    %cst_120 = arith.constant 1.000000e+00 : f32
    %393 = vector.broadcast %cst_120 : f32 to vector<8x128xf32>
    %394 = arith.addf %393, %392 : vector<8x128xf32>
    %395 = arith.divf %393, %394 : vector<8x128xf32>
    %396 = vector.extract_strided_slice %389 {offsets = [0, 128], sizes = [8, 128], strides = [1, 1]} : vector<8x512xf32> to vector<8x128xf32>
    %397 = arith.negf %396 : vector<8x128xf32>
    %398 = math.exp %397 : vector<8x128xf32>
    %cst_121 = arith.constant 1.000000e+00 : f32
    %399 = vector.broadcast %cst_121 : f32 to vector<8x128xf32>
    %400 = arith.addf %399, %398 : vector<8x128xf32>
    %401 = arith.divf %399, %400 : vector<8x128xf32>
    %402 = vector.extract_strided_slice %389 {offsets = [0, 256], sizes = [8, 128], strides = [1, 1]} : vector<8x512xf32> to vector<8x128xf32>
    %403 = math.tanh %402 : vector<8x128xf32>
    %404 = vector.extract_strided_slice %389 {offsets = [0, 384], sizes = [8, 128], strides = [1, 1]} : vector<8x512xf32> to vector<8x128xf32>
    %405 = arith.negf %404 : vector<8x128xf32>
    %406 = math.exp %405 : vector<8x128xf32>
    %cst_122 = arith.constant 1.000000e+00 : f32
    %407 = vector.broadcast %cst_122 : f32 to vector<8x128xf32>
    %408 = arith.addf %407, %406 : vector<8x128xf32>
    %409 = arith.divf %407, %408 : vector<8x128xf32>
    %410 = arith.mulf %401, %351 : vector<8x128xf32>
    %411 = arith.mulf %395, %403 : vector<8x128xf32>
    %412 = arith.addf %410, %411 : vector<8x128xf32>
    %413 = math.tanh %412 : vector<8x128xf32>
    %414 = arith.mulf %409, %413 : vector<8x128xf32>
    %415 = tpu.concatenate %414, %382 in 1 : vector<8x128xf32>, vector<8x128xf32> -> vector<8x256xf32>
    %c0_123 = arith.constant 0 : index
    %c0_124 = arith.constant 0 : index
    %416 = vector.load %arg6[%c0_123, %c0_124] : memref<256x512xf32, #tpu.memory_space<vmem>>, vector<256x512xf32>
    %cst_125 = arith.constant dense<0.000000e+00> : vector<8x512xf32>
    %417 = tpu.matmul %415, %416, %cst_125 {dimension_numbers = #tpu.dot_dimension_numbers<[1], [0], [0], [1], [0, 0, 1, 1], [], []>} : vector<8x256xf32>, vector<256x512xf32>, vector<8x512xf32> -> vector<8x512xf32>
    %418 = arith.addf %417, %11 : vector<8x512xf32>
    %419 = vector.extract_strided_slice %418 {offsets = [0, 0], sizes = [8, 128], strides = [1, 1]} : vector<8x512xf32> to vector<8x128xf32>
    %420 = arith.negf %419 : vector<8x128xf32>
    %421 = math.exp %420 : vector<8x128xf32>
    %cst_126 = arith.constant 1.000000e+00 : f32
    %422 = vector.broadcast %cst_126 : f32 to vector<8x128xf32>
    %423 = arith.addf %422, %421 : vector<8x128xf32>
    %424 = arith.divf %422, %423 : vector<8x128xf32>
    %425 = vector.extract_strided_slice %418 {offsets = [0, 128], sizes = [8, 128], strides = [1, 1]} : vector<8x512xf32> to vector<8x128xf32>
    %426 = arith.negf %425 : vector<8x128xf32>
    %427 = math.exp %426 : vector<8x128xf32>
    %cst_127 = arith.constant 1.000000e+00 : f32
    %428 = vector.broadcast %cst_127 : f32 to vector<8x128xf32>
    %429 = arith.addf %428, %427 : vector<8x128xf32>
    %430 = arith.divf %428, %429 : vector<8x128xf32>
    %431 = vector.extract_strided_slice %418 {offsets = [0, 256], sizes = [8, 128], strides = [1, 1]} : vector<8x512xf32> to vector<8x128xf32>
    %432 = math.tanh %431 : vector<8x128xf32>
    %433 = vector.extract_strided_slice %418 {offsets = [0, 384], sizes = [8, 128], strides = [1, 1]} : vector<8x512xf32> to vector<8x128xf32>
    %434 = arith.negf %433 : vector<8x128xf32>
    %435 = math.exp %434 : vector<8x128xf32>
    %cst_128 = arith.constant 1.000000e+00 : f32
    %436 = vector.broadcast %cst_128 : f32 to vector<8x128xf32>
    %437 = arith.addf %436, %435 : vector<8x128xf32>
    %438 = arith.divf %436, %437 : vector<8x128xf32>
    %439 = arith.mulf %430, %380 : vector<8x128xf32>
    %440 = arith.mulf %424, %432 : vector<8x128xf32>
    %441 = arith.addf %439, %440 : vector<8x128xf32>
    %442 = math.tanh %441 : vector<8x128xf32>
    %443 = arith.mulf %438, %442 : vector<8x128xf32>
    %cst_129 = arith.constant 0.000000e+00 : f32
    %444 = vector.broadcast %cst_129 : f32 to vector<8x128xf32>
    %445 = arith.maximumf %443, %444 : vector<8x128xf32>
    %c48_130 = arith.constant 48 : index
    %c0_131 = arith.constant 0 : index
    %446 = vector.load %arg14[%c48_130, %c0_131] : memref<64x128xf32, #tpu.memory_space<vmem>>, vector<8x128xf32>
    tpu.vector_store %arg14[%c48_130, %c0_131], %445 {strides = array<i32>} : memref<64x128xf32, #tpu.memory_space<vmem>>, vector<8x128xf32>,
    %c56 = arith.constant 56 : index
    %c0_132 = arith.constant 0 : index
    %447 = vector.load %arg13[%c56, %c0_132] : memref<64x512xf32, #tpu.memory_space<vmem>>, vector<8x512xf32>
    %c0_133 = arith.constant 0 : index
    %c0_134 = arith.constant 0 : index
    %448 = vector.load %arg4[%c0_133, %c0_134] : memref<128x512xf32, #tpu.memory_space<vmem>>, vector<128x512xf32>
    %cst_135 = arith.constant dense<0.000000e+00> : vector<8x512xf32>
    %449 = tpu.matmul %414, %448, %cst_135 {dimension_numbers = #tpu.dot_dimension_numbers<[1], [0], [0], [1], [0, 0, 1, 1], [], []>} : vector<8x128xf32>, vector<128x512xf32>, vector<8x512xf32> -> vector<8x512xf32>
    %450 = arith.addf %447, %449 : vector<8x512xf32>
    %451 = vector.extract_strided_slice %450 {offsets = [0, 0], sizes = [8, 128], strides = [1, 1]} : vector<8x512xf32> to vector<8x128xf32>
    %452 = arith.negf %451 : vector<8x128xf32>
    %453 = math.exp %452 : vector<8x128xf32>
    %cst_136 = arith.constant 1.000000e+00 : f32
    %454 = vector.broadcast %cst_136 : f32 to vector<8x128xf32>
    %455 = arith.addf %454, %453 : vector<8x128xf32>
    %456 = arith.divf %454, %455 : vector<8x128xf32>
    %457 = vector.extract_strided_slice %450 {offsets = [0, 128], sizes = [8, 128], strides = [1, 1]} : vector<8x512xf32> to vector<8x128xf32>
    %458 = arith.negf %457 : vector<8x128xf32>
    %459 = math.exp %458 : vector<8x128xf32>
    %cst_137 = arith.constant 1.000000e+00 : f32
    %460 = vector.broadcast %cst_137 : f32 to vector<8x128xf32>
    %461 = arith.addf %460, %459 : vector<8x128xf32>
    %462 = arith.divf %460, %461 : vector<8x128xf32>
    %463 = vector.extract_strided_slice %450 {offsets = [0, 256], sizes = [8, 128], strides = [1, 1]} : vector<8x512xf32> to vector<8x128xf32>
    %464 = math.tanh %463 : vector<8x128xf32>
    %465 = vector.extract_strided_slice %450 {offsets = [0, 384], sizes = [8, 128], strides = [1, 1]} : vector<8x512xf32> to vector<8x128xf32>
    %466 = arith.negf %465 : vector<8x128xf32>
    %467 = math.exp %466 : vector<8x128xf32>
    %cst_138 = arith.constant 1.000000e+00 : f32
    %468 = vector.broadcast %cst_138 : f32 to vector<8x128xf32>
    %469 = arith.addf %468, %467 : vector<8x128xf32>
    %470 = arith.divf %468, %469 : vector<8x128xf32>
    %471 = arith.mulf %462, %412 : vector<8x128xf32>
    %472 = arith.mulf %456, %464 : vector<8x128xf32>
    %473 = arith.addf %471, %472 : vector<8x128xf32>
    %474 = math.tanh %473 : vector<8x128xf32>
    %475 = arith.mulf %470, %474 : vector<8x128xf32>
    %476 = tpu.concatenate %475, %443 in 1 : vector<8x128xf32>, vector<8x128xf32> -> vector<8x256xf32>
    %c0_139 = arith.constant 0 : index
    %c0_140 = arith.constant 0 : index
    %477 = vector.load %arg6[%c0_139, %c0_140] : memref<256x512xf32, #tpu.memory_space<vmem>>, vector<256x512xf32>
    %cst_141 = arith.constant dense<0.000000e+00> : vector<8x512xf32>
    %478 = tpu.matmul %476, %477, %cst_141 {dimension_numbers = #tpu.dot_dimension_numbers<[1], [0], [0], [1], [0, 0, 1, 1], [], []>} : vector<8x256xf32>, vector<256x512xf32>, vector<8x512xf32> -> vector<8x512xf32>
    %479 = arith.addf %478, %11 : vector<8x512xf32>
    %480 = vector.extract_strided_slice %479 {offsets = [0, 0], sizes = [8, 128], strides = [1, 1]} : vector<8x512xf32> to vector<8x128xf32>
    %481 = arith.negf %480 : vector<8x128xf32>
    %482 = math.exp %481 : vector<8x128xf32>
    %cst_142 = arith.constant 1.000000e+00 : f32
    %483 = vector.broadcast %cst_142 : f32 to vector<8x128xf32>
    %484 = arith.addf %483, %482 : vector<8x128xf32>
    %485 = arith.divf %483, %484 : vector<8x128xf32>
    %486 = vector.extract_strided_slice %479 {offsets = [0, 128], sizes = [8, 128], strides = [1, 1]} : vector<8x512xf32> to vector<8x128xf32>
    %487 = arith.negf %486 : vector<8x128xf32>
    %488 = math.exp %487 : vector<8x128xf32>
    %cst_143 = arith.constant 1.000000e+00 : f32
    %489 = vector.broadcast %cst_143 : f32 to vector<8x128xf32>
    %490 = arith.addf %489, %488 : vector<8x128xf32>
    %491 = arith.divf %489, %490 : vector<8x128xf32>
    %492 = vector.extract_strided_slice %479 {offsets = [0, 256], sizes = [8, 128], strides = [1, 1]} : vector<8x512xf32> to vector<8x128xf32>
    %493 = math.tanh %492 : vector<8x128xf32>
    %494 = vector.extract_strided_slice %479 {offsets = [0, 384], sizes = [8, 128], strides = [1, 1]} : vector<8x512xf32> to vector<8x128xf32>
    %495 = arith.negf %494 : vector<8x128xf32>
    %496 = math.exp %495 : vector<8x128xf32>
    %cst_144 = arith.constant 1.000000e+00 : f32
    %497 = vector.broadcast %cst_144 : f32 to vector<8x128xf32>
    %498 = arith.addf %497, %496 : vector<8x128xf32>
    %499 = arith.divf %497, %498 : vector<8x128xf32>
    %500 = arith.mulf %491, %441 : vector<8x128xf32>
    %501 = arith.mulf %485, %493 : vector<8x128xf32>
    %502 = arith.addf %500, %501 : vector<8x128xf32>
    %503 = math.tanh %502 : vector<8x128xf32>
    %504 = arith.mulf %499, %503 : vector<8x128xf32>
    %cst_145 = arith.constant 0.000000e+00 : f32
    %505 = vector.broadcast %cst_145 : f32 to vector<8x128xf32>
    %506 = arith.maximumf %504, %505 : vector<8x128xf32>
    %c56_146 = arith.constant 56 : index
    %c0_147 = arith.constant 0 : index
    %507 = vector.load %arg14[%c56_146, %c0_147] : memref<64x128xf32, #tpu.memory_space<vmem>>, vector<8x128xf32>
    tpu.vector_store %arg14[%c56_146, %c0_147], %506 {strides = array<i32>} : memref<64x128xf32, #tpu.memory_space<vmem>>, vector<8x128xf32>,
    %c0_148 = arith.constant 0 : index
    %c0_149 = arith.constant 0 : index
    %508 = vector.load %arg14[%c0_148, %c0_149] : memref<64x128xf32, #tpu.memory_space<vmem>>, vector<64x128xf32>
    %c0_150 = arith.constant 0 : index
    %c0_151 = arith.constant 0 : index
    %509 = vector.load %arg8[%c0_150, %c0_151] : memref<128x128xf32, #tpu.memory_space<vmem>>, vector<128x128xf32>
    %cst_152 = arith.constant dense<0.000000e+00> : vector<64x128xf32>
    %510 = tpu.matmul %508, %509, %cst_152 {dimension_numbers = #tpu.dot_dimension_numbers<[1], [0], [0], [1], [0, 0, 1, 1], [], []>} : vector<64x128xf32>, vector<128x128xf32>, vector<64x128xf32> -> vector<64x128xf32>
    %c0_153 = arith.constant 0 : index
    %c0_154 = arith.constant 0 : index
    %511 = vector.load %arg9[%c0_153, %c0_154] : memref<1x128xf32, #tpu.memory_space<vmem>>, vector<1x128xf32>
    %512 = vector.shape_cast %511 : vector<1x128xf32> to vector<1x128xf32>
    %513 = vector.broadcast %512 : vector<1x128xf32> to vector<64x128xf32>
    %514 = arith.addf %510, %513 : vector<64x128xf32>
    %c0_155 = arith.constant 0 : index
    %c0_156 = arith.constant 0 : index
    %515 = vector.load %arg10[%c0_155, %c0_156] : memref<64x128xf32, #tpu.memory_space<vmem>>, vector<64x128xf32>
    tpu.vector_store %arg10[%c0_155, %c0_156], %514 {strides = array<i32>} : memref<64x128xf32, #tpu.memory_space<vmem>>, vector<64x128xf32>,
    %c0_157 = arith.constant 0 : index
    %c0_158 = arith.constant 0 : index
    %c0_159 = arith.constant 0 : index
    %516 = vector.load %arg11[%c0_157, %c0_158, %c0_159] : memref<2x8x128xf32, #tpu.memory_space<vmem>>, vector<1x8x128xf32>
    %517 = vector.shape_cast %516 : vector<1x8x128xf32> to vector<8x128xf32>
    %518 = vector.shape_cast %475 : vector<8x128xf32> to vector<1x8x128xf32>
    tpu.vector_store %arg11[%c0_157, %c0_158, %c0_159], %518 {strides = array<i32>} : memref<2x8x128xf32, #tpu.memory_space<vmem>>, vector<1x8x128xf32>,
    %c1_160 = arith.constant 1 : index
    %c0_161 = arith.constant 0 : index
    %c0_162 = arith.constant 0 : index
    %519 = vector.load %arg11[%c1_160, %c0_161, %c0_162] : memref<2x8x128xf32, #tpu.memory_space<vmem>>, vector<1x8x128xf32>
    %520 = vector.shape_cast %519 : vector<1x8x128xf32> to vector<8x128xf32>
    %521 = vector.shape_cast %504 : vector<8x128xf32> to vector<1x8x128xf32>
    tpu.vector_store %arg11[%c1_160, %c0_161, %c0_162], %521 {strides = array<i32>} : memref<2x8x128xf32, #tpu.memory_space<vmem>>, vector<1x8x128xf32>,
    %c0_163 = arith.constant 0 : index
    %c0_164 = arith.constant 0 : index
    %c0_165 = arith.constant 0 : index
    %522 = vector.load %arg12[%c0_163, %c0_164, %c0_165] : memref<2x8x128xf32, #tpu.memory_space<vmem>>, vector<1x8x128xf32>
    %523 = vector.shape_cast %522 : vector<1x8x128xf32> to vector<8x128xf32>
    %524 = vector.shape_cast %473 : vector<8x128xf32> to vector<1x8x128xf32>
    tpu.vector_store %arg12[%c0_163, %c0_164, %c0_165], %524 {strides = array<i32>} : memref<2x8x128xf32, #tpu.memory_space<vmem>>, vector<1x8x128xf32>,
    %c1_166 = arith.constant 1 : index
    %c0_167 = arith.constant 0 : index
    %c0_168 = arith.constant 0 : index
    %525 = vector.load %arg12[%c1_166, %c0_167, %c0_168] : memref<2x8x128xf32, #tpu.memory_space<vmem>>, vector<1x8x128xf32>
    %526 = vector.shape_cast %525 : vector<1x8x128xf32> to vector<8x128xf32>
    %527 = vector.shape_cast %502 : vector<8x128xf32> to vector<1x8x128xf32>
    tpu.vector_store %arg12[%c1_166, %c0_167, %c0_168], %527 {strides = array<i32>} : memref<2x8x128xf32, #tpu.memory_space<vmem>>, vector<1x8x128xf32>,
    return
  }
}

</mosaic_0001>

<bundles_post_ra>
// kernel: rad_recurrent_forward.1
= control target key start
LH: loop header
LB: loop body
LE: loop exit
PB: predicated region body
PF: predicated region fallthrough
CT: control target
= control target key end

     0   :  { %18 = vsyncpa [#allocation5], 0  ;;  %s8743_s0 = inlined_call_operand.vmem [shape: f32[64,1], index: 0, kind: input, shape index: {}]   ;;  %s8744_s1 = inlined_call_operand.vmem [shape: f32[2,8,128], index: 1, kind: input, shape index: {}, may-alias: {1,11}]   ;;  %s8745_s2 = inlined_call_operand.vmem [shape: f32[2,8,128], index: 2, kind: input, shape index: {}, may-alias: {2,12}]   ;;  %s8746_s3 = inlined_call_operand.vmem [shape: f32[1,512], index: 3, kind: input, shape index: {}]   ;;  %s8747_s4 = inlined_call_operand.hbm [shape: f32[128,512], index: 4, kind: input, shape index: {}]   ;;  %s8748_s5 = inlined_call_operand.vmem [shape: f32[1,512], index: 5, kind: input, shape index: {}]   ;;  %s8749_s6 = inlined_call_operand.hbm [shape: f32[256,512], index: 6, kind: input, shape index: {}]   ;;  %s8750_s7 = inlined_call_operand.vmem [shape: f32[1,512], index: 7, kind: input, shape index: {}]   ;;  %s8751_s8 = inlined_call_operand.vmem [shape: f32[128,128], index: 8, kind: input, shape index: {}]   ;;  %s8752_s9 = inlined_call_operand.vmem [shape: f32[1,128], index: 9, kind: input, shape index: {}]   ;;  %s8753_s10 = inlined_call_operand.vmem [shape: f32[64,128], index: 10, kind: output, shape index: {0}]   ;;  %s8754_s11 = inlined_call_operand.vmem [shape: f32[2,8,128], index: 11, kind: output, shape index: {1}, may-alias: {1,11}]   ;;  %s8755_s12 = inlined_call_operand.vmem [shape: f32[2,8,128], index: 12, kind: output, shape index: {2}, may-alias: {2,12}]  }
   0x1   :  { %19 = vsyncpa [#allocation7], 0  ;;  %s6719_s21 = smov [#allocation4]   ;;  %s6671_s25 = scalar_lea.hbm %s8747_s4, 8192 }
   0x2   :  { %s33_s22 = sshll.u32 %s6719_s21, 4  ;;  %p6672_p0 = scmp.ne.s32.totalorder %s8747_s4, %s6671_s25  ;;  %s34_s22 = int_to_ptr.vmem [resolvable:$true] %s33_s22 }
   0x3   :  { %p6675_p1 = scmp.lt.u32.totalorder %s6671_s25, %s8747_s4 }
   0x5   :  { %p6677_p2 = pnand %p6675_p1, %p6672_p0 }
   0x7   :  { %6680 = shalt.err (!%p6677_p2)
}
   0x8   :  { %s6681_s30 = scalar_lea.vmem %s34_s22, 8192  ;;  %p6686_p4 = scmp.lt.s32.totalorder %s34_s22, %s34_s22 }
   0x9   :  { %p6682_p3 = scmp.ne.s32.totalorder %s34_s22, %s6681_s30  ;;  %p6687_p5 = scmp.lt.s32.totalorder %s6681_s30, %s6681_s30 }
   0xb   :  { %p6688_p6 = por %p6687_p5, %p6686_p4 }
   0xd   :  { %p6689_p7 = pnand %p6688_p6, %p6682_p3 }
   0xf   :  { %6692 = shalt.err (!%p6689_p7)
}
  0x10   :  { %s6720_s13 = smov 512   ;;  %s6721_s14 = smov 32  }
  0x11   :  { %39 = dma.hbm_to_vmem [thread:$0]  %s8747_s4, 8192, %s34_s22, [#allocation5], %s6720_s13, %s6720_s13, %s6721_s14  }
  0x12   :  { %s6722_s17 = smov [#allocation6]   ;;  %s6693_s21 = scalar_lea.hbm %s8749_s6, 16384 }
  0x13   :  { %s47_s18 = sshll.u32 %s6722_s17, 4  ;;  %p6694_p8 = scmp.ne.s32.totalorder %s8749_s6, %s6693_s21  ;;  %s48_s18 = int_to_ptr.vmem [resolvable:$true] %s47_s18 }
  0x14   :  { %p6697_p9 = scmp.lt.u32.totalorder %s6693_s21, %s8749_s6 }
  0x16   :  { %p6699_p10 = pnand %p6697_p9, %p6694_p8 }
  0x18   :  { %6702 = shalt.err (!%p6699_p10)
}
  0x19   :  { %s6703_s27 = scalar_lea.vmem %s48_s18, 16384  ;;  %p6708_p12 = scmp.lt.s32.totalorder %s48_s18, %s48_s18 }
  0x1a   :  { %p6704_p11 = scmp.ne.s32.totalorder %s48_s18, %s6703_s27  ;;  %p6709_p13 = scmp.lt.s32.totalorder %s6703_s27, %s6703_s27 }
  0x1c   :  { %p6710_p0 = por %p6709_p13, %p6708_p12 }
  0x1e   :  { %p6711_p1 = pnand %p6710_p0, %p6704_p11 }
  0x20   :  { %6714 = shalt.err (!%p6711_p1)
}
  0x21   :  { %53 = dma.hbm_to_vmem [thread:$0]  %s8749_s6, 16384, %s48_s18, [#allocation7], %s6720_s13, %s6720_s13, %s6721_s14  }
  0x22   :  { %6715 = dma.done.wait [#allocation5], 8192  }
  0x23   :  { %6716 = vsyncadd [#allocation5], 4294959104 }
  0x24   :  { %6717 = dma.done.wait [#allocation7], 16384  }
  0x25   :  { %6718 = vsyncadd [#allocation7], 4294950912  ;;  %v8756_v0 = vmov 0.0   ;;  %v6724_v1 = vmov 0   ;;  %v287_v2 = vld [vmem:[#allocation4 + $0x8] sm:$0xff]  ;;  %v286_v4 = vld [vmem:[#allocation4] sm:$0xff] }
  0x26   :  { %414 = vmatprep.mubr.f32.mxu1 %v8756_v0  ;;  %6413 = vset.pattern.permute.xlu0 %v6724_v1  ;;  %v291_v3 = vld [vmem:[#allocation4 + $0x28] sm:$0xff]  ;;  %v290_v6 = vld [vmem:[#allocation4 + $0x20] sm:$0xff]  ;;  %v289_v54 = vld [vmem:[#allocation4 + $0x18] sm:$0xff] }
  0x27   :  { %6414 = vset.pattern.permute.xlu1 %v6724_v1  ;;  %v6815_v5 = vpack.c.bf16 %v291_v3, %v287_v2  ;;  %v295_v7 = vld [vmem:[#allocation4 + $0x48] sm:$0xff]  ;;  %v6817_v9 = vpack.c.bf16 %v290_v6, %v286_v4  ;;  %v294_v11 = vld [vmem:[#allocation4 + $0x40] sm:$0xff]  ;;  %v293_v55 = vld [vmem:[#allocation4 + $0x38] sm:$0xff] }
  0x28   :  { %v299_v8 = vld [vmem:[#allocation4 + $0x68] sm:$0xff]  ;;  %v298_v12 = vld [vmem:[#allocation4 + $0x60] sm:$0xff]  ;;  %v6866_v58 = vpack.c.bf16 %v293_v55, %v289_v54  ;;  %v288_v59 = vld [vmem:[#allocation4 + $0x10] sm:$0xff] }
  0x29   :  { %v6819_v10 = vpack.c.bf16 %v299_v8, %v295_v7  ;;  %v303_v13 = vld [vmem:[#allocation4 + $0x88] sm:$0xff]  ;;  %4840 = vmatprep.subr.bf16.mxu1 %v6815_v5  ;;  %v6823_v15 = vpack.c.bf16 %v298_v12, %v294_v11  ;;  %v302_v17 = vld [vmem:[#allocation4 + $0x80] sm:$0xff]  ;;  %v292_v60 = vld [vmem:[#allocation4 + $0x30] sm:$0xff] }
  0x2a   :  { %v307_v14 = vld [vmem:[#allocation4 + $0xa8] sm:$0xff]  ;;  %4842 = vmatpush1.bf16.msra.mxu1 %v6817_v9  ;;  %v306_v18 = vld [vmem:[#allocation4 + $0xa0] sm:$0xff]  ;;  %v297_v61 = vld [vmem:[#allocation4 + $0x58] sm:$0xff]  ;;  %v6876_v2 = vpack.c.bf16 %v292_v60, %v288_v59 }
  0x2b   :  { %4844 = vmatprep.subr.bf16.mxu1 %v6819_v10  ;;  %v6826_v16 = vpack.c.bf16 %v307_v14, %v303_v13  ;;  %v311_v19 = vld [vmem:[#allocation4 + $0xc8] sm:$0xff]  ;;  %v6829_v21 = vpack.c.bf16 %v306_v18, %v302_v17  ;;  %v310_v23 = vld [vmem:[#allocation4 + $0xc0] sm:$0xff]  ;;  %v301_v62 = vld [vmem:[#allocation4 + $0x78] sm:$0xff] }
  0x2c   :  { %v315_v20 = vld [vmem:[#allocation4 + $0xe8] sm:$0xff]  ;;  %v314_v24 = vld [vmem:[#allocation4 + $0xe0] sm:$0xff]  ;;  %v72_v63 = vld [vmem:[%s8743_s0 + $0x30] sm:$0xff]  ;;  %v6879_v3 = vpack.c.bf16 %v301_v62, %v297_v61 }
  0x2d   :  { %v6832_v22 = vpack.c.bf16 %v315_v20, %v311_v19  ;;  %v319_v25 = vld [vmem:[#allocation4 + $0x108] sm:$0xff]  ;;  %v6835_v27 = vpack.c.bf16 %v314_v24, %v310_v23  ;;  %v318_v29 = vld [vmem:[#allocation4 + $0x100] sm:$0xff]  ;;  %v296_v4 = vld [vmem:[#allocation4 + $0x50] sm:$0xff] }
  0x2e   :  { %4846 = vmatpush1.bf16.msra.mxu1 %v6823_v15  ;;  %v323_v26 = vld [vmem:[#allocation4 + $0x128] sm:$0xff]  ;;  %v322_v30 = vld [vmem:[#allocation4 + $0x120] sm:$0xff]  ;;  %v300_v6 = vld [vmem:[#allocation4 + $0x70] sm:$0xff] }
  0x2f   :  { %4848 = vmatprep.subr.bf16.mxu1 %v6826_v16  ;;  %v6838_v28 = vpack.c.bf16 %v323_v26, %v319_v25  ;;  %v327_v31 = vld [vmem:[#allocation4 + $0x148] sm:$0xff]  ;;  %v6841_v33 = vpack.c.bf16 %v322_v30, %v318_v29  ;;  %v326_v35 = vld [vmem:[#allocation4 + $0x140] sm:$0xff]  ;;  %v305_v7 = vld [vmem:[#allocation4 + $0x98] sm:$0xff]  ;;  %v6883_v11 = vpack.c.bf16 %v300_v6, %v296_v4 }
  0x30   :  { %v331_v32 = vld [vmem:[#allocation4 + $0x168] sm:$0xff]  ;;  %v330_v36 = vld [vmem:[#allocation4 + $0x160] sm:$0xff]  ;;  %v309_v8 = vld [vmem:[#allocation4 + $0xb8] sm:$0xff] }
  0x31   :  { %v6844_v34 = vpack.c.bf16 %v331_v32, %v327_v31  ;;  %v335_v37 = vld [vmem:[#allocation4 + $0x188] sm:$0xff]  ;;  %v6847_v39 = vpack.c.bf16 %v330_v36, %v326_v35  ;;  %v334_v41 = vld [vmem:[#allocation4 + $0x180] sm:$0xff]  ;;  %v6887_v12 = vpack.c.bf16 %v309_v8, %v305_v7  ;;  %v304_v13 = vld [vmem:[#allocation4 + $0x90] sm:$0xff] }
  0x32   :  { %4850 = vmatpush1.bf16.msra.mxu1 %v6829_v21  ;;  %v339_v38 = vld [vmem:[#allocation4 + $0x1a8] sm:$0xff]  ;;  %v338_v42 = vld [vmem:[#allocation4 + $0x1a0] sm:$0xff]  ;;  %v308_v14 = vld [vmem:[#allocation4 + $0xb0] sm:$0xff] }
  0x33   :  { %4852 = vmatprep.subr.bf16.mxu1 %v6832_v22  ;;  %v6850_v40 = vpack.c.bf16 %v339_v38, %v335_v37  ;;  %v66_v43 = vld [vmem:[%s8743_s0] sm:$0xff]  ;;  %v343_v44 = vld [vmem:[#allocation4 + $0x1c8] sm:$0xff]  ;;  %v4865_v49 = vpack.c.bf16 %v338_v42, %v334_v41  ;;  %v313_v17 = vld [vmem:[#allocation4 + $0xd8] sm:$0xff]  ;;  %v6890_v19 = vpack.c.bf16 %v308_v14, %v304_v13 }
  0x34   :  { %v347_v45 = vld [vmem:[#allocation4 + $0x1e8] sm:$0xff]  ;;  %77 = vperm.xlu0 %6413, %v66_v43   ;;  %v342_v52 = vld [vmem:[#allocation4 + $0x1c0] sm:$0xff]  ;;  %v317_v18 = vld [vmem:[#allocation4 + $0xf8] sm:$0xff] }
  0x35   :  { %v67_v46 = vld [vmem:[%s8743_s0 + $0x8] sm:$0xff]  ;;  %v4867_v51 = vpack.c.bf16 %v347_v45, %v343_v44  ;;  %v346_v53 = vld [vmem:[#allocation4 + $0x1e0] sm:$0xff]  ;;  %v6893_v20 = vpack.c.bf16 %v317_v18, %v313_v17  ;;  %v312_v23 = vld [vmem:[#allocation4 + $0xd0] sm:$0xff] }
  0x36   :  { %4854 = vmatpush1.bf16.msra.mxu1 %v6835_v27  ;;  %v521_v47 = vld [vmem:[#allocation6 + $0x8] sm:$0xff]  ;;  %v70_v56 = vld [vmem:[%s8743_s0 + $0x20] sm:$0xff]  ;;  %v4869_v57 = vpack.c.bf16 %v346_v53, %v342_v52  ;;  %v316_v24 = vld [vmem:[#allocation4 + $0xf0] sm:$0xff] }
  0x37   :  { %4856 = vmatprep.subr.bf16.mxu1 %v6838_v28  ;;  %v525_v48 = vld [vmem:[#allocation6 + $0x28] sm:$0xff]  ;;  %v6874_v1 = vld [vmem:[%s8744_s1] sm:$0xff]  ;;  %v321_v25 = vld [vmem:[#allocation4 + $0x118] sm:$0xff]  ;;  %v6896_v29 = vpack.c.bf16 %v316_v24, %v312_v23 }
  0x38   :  { %v6859_v50 = vpack.c.bf16 %v525_v48, %v521_v47  ;;  %82 = vperm.xlu0 %6413, %v67_v46   ;;  %v325_v26 = vld [vmem:[#allocation4 + $0x138] sm:$0xff]  ;;  %v320_v31 = vld [vmem:[#allocation4 + $0x110] sm:$0xff]  ;;  %v520_v61 = vld [vmem:[#allocation6] sm:$0xff] }
  0x39   :  { %v6899_v30 = vpack.c.bf16 %v325_v26, %v321_v25  ;;  %v324_v32 = vld [vmem:[#allocation4 + $0x130] sm:$0xff]  ;;  %v329_v35 = vld [vmem:[#allocation4 + $0x158] sm:$0xff]  ;;  %v524_v62 = vld [vmem:[#allocation6 + $0x20] sm:$0xff] }
  0x3a   :  { %4858 = vmatpush1.bf16.msra.mxu1 %v6841_v33  ;;  %4904 = vmatprep.subr.bf16.mxu0 %v6859_v50  ;;  %v333_v36 = vld [vmem:[#allocation4 + $0x178] sm:$0xff]  ;;  %v6902_v37 = vpack.c.bf16 %v324_v32, %v320_v31  ;;  %v328_v41 = vld [vmem:[#allocation4 + $0x150] sm:$0xff]  ;;  %v6928_v4 = vpack.c.bf16 %v524_v62, %v520_v61  ;;  %v529_v8 = vld [vmem:[#allocation6 + $0x48] sm:$0xff] }
  0x3b   :  { %4860 = vmatprep.subr.bf16.mxu1 %v6844_v34  ;;  %v6905_v38 = vpack.c.bf16 %v333_v36, %v329_v35  ;;  %v332_v42 = vld [vmem:[#allocation4 + $0x170] sm:$0xff]  ;;  %v337_v43 = vld [vmem:[#allocation4 + $0x198] sm:$0xff]  ;;  %v533_v13 = vld [vmem:[#allocation6 + $0x68] sm:$0xff] }
  0x3c   :  { %97 = vperm.xlu0 %6413, %v70_v56   ;;  %v341_v44 = vld [vmem:[#allocation4 + $0x1b8] sm:$0xff]  ;;  %v6908_v45 = vpack.c.bf16 %v332_v42, %v328_v41  ;;  %v336_v47 = vld [vmem:[#allocation4 + $0x190] sm:$0xff]  ;;  %4906 = vmatpush1.bf16.msra.mxu0 %v6928_v4  ;;  %v6934_v17 = vpack.c.bf16 %v533_v13, %v529_v8  ;;  %v528_v23 = vld [vmem:[#allocation6 + $0x40] sm:$0xff] }
  0x3d   :  { %v6911_v46 = vpack.c.bf16 %v341_v44, %v337_v43  ;;  %v340_v48 = vld [vmem:[#allocation4 + $0x1b0] sm:$0xff]  ;;  %v523_v56 = vld [vmem:[#allocation6 + $0x18] sm:$0xff]  ;;  %v537_v35 = vld [vmem:[#allocation6 + $0x88] sm:$0xff] }
  0x3e   :  { %4862 = vmatpush1.bf16.msra.mxu1 %v6847_v39  ;;  %v6914_v52 = vpack.c.bf16 %v340_v48, %v336_v47  ;;  %v344_v54 = vld [vmem:[#allocation4 + $0x1d0] sm:$0xff]  ;;  %v531_v14 = vld [vmem:[#allocation6 + $0x58] sm:$0xff]  ;;  %4908 = vmatprep.subr.bf16.mxu0 %v6934_v17  ;;  %v541_v36 = vld [vmem:[#allocation6 + $0xa8] sm:$0xff] }
  0x3f   :  { %4864 = vmatprep.subr.bf16.mxu1 %v6850_v40  ;;  %v348_v55 = vld [vmem:[#allocation4 + $0x1f0] sm:$0xff]  ;;  %v535_v18 = vld [vmem:[#allocation6 + $0x78] sm:$0xff]  ;;  %v6946_v42 = vpack.c.bf16 %v541_v36, %v537_v35  ;;  %v536_v44 = vld [vmem:[#allocation6 + $0x80] sm:$0xff] }
  0x40   :  { %107 = vperm.xlu0 %6413, %v72_v63   ;;  %v6920_v59 = vpack.c.bf16 %v348_v55, %v344_v54  ;;  %v522_v63 = vld [vmem:[#allocation6 + $0x10] sm:$0xff]  ;;  %v6936_v24 = vpack.c.bf16 %v535_v18, %v531_v14  ;;  %v539_v41 = vld [vmem:[#allocation6 + $0x98] sm:$0xff]  ;;  %v540_v47 = vld [vmem:[#allocation6 + $0xa0] sm:$0xff] }
  0x41   :  { %v526_v6 = vld [vmem:[#allocation6 + $0x30] sm:$0xff]  ;;  %v543_v43 = vld [vmem:[#allocation6 + $0xb8] sm:$0xff]  ;;  %v548_v8 = vld [vmem:[#allocation6 + $0xe0] sm:$0xff] }
  0x42   :  { %4866 = vmatpush1.bf16.msra.mxu1 %v4865_v49  ;;  %v345_v49 = vld [vmem:[#allocation4 + $0x1d8] sm:$0xff]  ;;  %v6930_v7 = vpack.c.bf16 %v526_v6, %v522_v63  ;;  %v530_v26 = vld [vmem:[#allocation6 + $0x50] sm:$0xff]  ;;  %v6948_v48 = vpack.c.bf16 %v543_v43, %v539_v41  ;;  %v544_v6 = vld [vmem:[#allocation6 + $0xc0] sm:$0xff] }
  0x43   :  { %4868 = vmatprep.subr.bf16.mxu1 %v4867_v51  ;;  %v349_v51 = vld [vmem:[#allocation4 + $0x1f8] sm:$0xff]  ;;  %v534_v31 = vld [vmem:[#allocation6 + $0x70] sm:$0xff]  ;;  %v6962_v14 = vpack.c.bf16 %v548_v8, %v544_v6  ;;  %v552_v43 = vld [vmem:[#allocation6 + $0x100] sm:$0xff] }
  0x44   :  { %v6917_v53 = vpack.c.bf16 %v349_v51, %v345_v49  ;;  %v6941_v32 = vpack.c.bf16 %v534_v31, %v530_v26  ;;  %v6950_v49 = vpack.c.bf16 %v540_v47, %v536_v44  ;;  %v538_v51 = vld [vmem:[#allocation6 + $0x90] sm:$0xff]  ;;  %v547_v61 = vld [vmem:[#allocation6 + $0xd8] sm:$0xff]  ;;  %v553_v26 = vld [vmem:[#allocation6 + $0x108] sm:$0xff] }
  0x45   :  { %v542_v54 = vld [vmem:[#allocation6 + $0xb0] sm:$0xff]  ;;  %v551_v63 = vld [vmem:[#allocation6 + $0xf8] sm:$0xff]  ;;  %v557_v31 = vld [vmem:[#allocation6 + $0x128] sm:$0xff] }
  0x46   :  { %4870 = vmatpush1.bf16.msra.mxu1 %v4869_v57  ;;  %v527_v57 = vld [vmem:[#allocation6 + $0x38] sm:$0xff]  ;;  %v6953_v55 = vpack.c.bf16 %v542_v54, %v538_v51  ;;  %v6960_v13 = vpack.c.bf16 %v551_v63, %v547_v61  ;;  %v546_v18 = vld [vmem:[#allocation6 + $0xd0] sm:$0xff]  ;;  %v6970_v36 = vpack.c.bf16 %v557_v31, %v553_v26  ;;  %v556_v44 = vld [vmem:[#allocation6 + $0x120] sm:$0xff] }
  0x47   :  { %4872 = vmatprep.subr.bf16.mxu1 %v6866_v58  ;;  %v6923_v60 = vpack.c.bf16 %v527_v57, %v523_v56  ;;  %v545_v56 = vld [vmem:[#allocation6 + $0xc8] sm:$0xff]  ;;  %v555_v35 = vld [vmem:[#allocation6 + $0x118] sm:$0xff]  ;;  %v6974_v51 = vpack.c.bf16 %v556_v44, %v552_v43  ;;  %v554_v54 = vld [vmem:[#allocation6 + $0x110] sm:$0xff] }
  0x48   :  { %v549_v57 = vld [vmem:[#allocation6 + $0xe8] sm:$0xff]  ;;  %9017 = vst [vmem:[#allocation10_spill] sm:$0xff] %v6970_v36  ;;  %v559_v41 = vld [vmem:[#allocation6 + $0x138] sm:$0xff]  ;;  %v564_v26 = vld [vmem:[#allocation6 + $0x160] sm:$0xff] }
  0x49   :  { %415 = vmatmul.mubr.f32.vlgmr.msra.gmra.mrb[0].mxu1 %v6874_v1  ;;  %v6958_v62 = vpack.c.bf16 %v549_v57, %v545_v56  ;;  %v6972_v47 = vpack.c.bf16 %v559_v41, %v555_v35  ;;  %9019 = vst [vmem:[#allocation12_spill] sm:$0xff] %v6974_v51  ;;  %v558_v56 = vld [vmem:[#allocation6 + $0x130] sm:$0xff]  ;;  %v561_v61 = vld [vmem:[#allocation6 + $0x148] sm:$0xff]  ;;  %v563_v6 = vld [vmem:[#allocation6 + $0x158] sm:$0xff] }
  0x4a   :  { %4874 = vmatpush1.bf16.msra.mxu1 %v6876_v2  ;;  %485 = vmatprep.mubr.f32.mxu1 %v8756_v0  ;;  %v6977_v57 = vpack.c.bf16 %v558_v56, %v554_v54  ;;  %v565_v63 = vld [vmem:[#allocation6 + $0x168] sm:$0xff]  ;;  %v562_v41 = vld [vmem:[#allocation6 + $0x150] sm:$0xff] }
  0x4b   :  { %4876 = vmatprep.subr.bf16.mxu1 %v6879_v3  ;;  %9018 = vst [vmem:[#allocation11_spill] sm:$0xff] %v6972_v47  ;;  %v6982_v8 = vpack.c.bf16 %v565_v63, %v561_v61  ;;  %v566_v43 = vld [vmem:[#allocation6 + $0x170] sm:$0xff]  ;;  %v569_v54 = vld [vmem:[#allocation6 + $0x188] sm:$0xff]  ;;  %v571_v61 = vld [vmem:[#allocation6 + $0x198] sm:$0xff] }
  0x4c   :  { %9020 = vst [vmem:[#allocation13_spill] sm:$0xff] %v6977_v57  ;;  %v6989_v44 = vpack.c.bf16 %v566_v43, %v562_v41  ;;  %v573_v56 = vld [vmem:[#allocation6 + $0x1a8] sm:$0xff]  ;;  %v570_v41 = vld [vmem:[#allocation6 + $0x190] sm:$0xff] }
  0x4d   :  { %9021 = vst [vmem:[#allocation14_spill] sm:$0xff] %v6982_v8  ;;  %v6994_v63 = vpack.c.bf16 %v573_v56, %v569_v54  ;;  %v574_v43 = vld [vmem:[#allocation6 + $0x1b0] sm:$0xff]  ;;  %v581_v54 = vld [vmem:[#allocation6 + $0x1e8] sm:$0xff]  ;;  %v579_v56 = vld [vmem:[#allocation6 + $0x1d8] sm:$0xff] }
  0x4e   :  { %4878 = vmatpush1.bf16.msra.mxu1 %v6883_v11  ;;  %9024 = vst [vmem:[#allocation17_spill] sm:$0xff] %v6989_v44 }
  0x4f   :  { %4880 = vmatprep.subr.bf16.mxu1 %v6887_v12  ;;  %9025 = vst [vmem:[#allocation18_spill] sm:$0xff] %v6994_v63 }
  0x52   :  { %4882 = vmatpush1.bf16.msra.mxu1 %v6890_v19 }
  0x53   :  { %4884 = vmatprep.subr.bf16.mxu1 %v6893_v20 }
  0x56   :  { %4886 = vmatpush1.bf16.msra.mxu1 %v6896_v29 }
  0x57   :  { %4888 = vmatprep.subr.bf16.mxu1 %v6899_v30 }
  0x5a   :  { %4890 = vmatpush1.bf16.msra.mxu1 %v6902_v37 }
  0x5b   :  { %4892 = vmatprep.subr.bf16.mxu1 %v6905_v38 }
  0x5e   :  { %4894 = vmatpush1.bf16.msra.mxu1 %v6908_v45 }
  0x5f   :  { %4896 = vmatprep.subr.bf16.mxu1 %v6911_v46 }
  0x62   :  { %4898 = vmatpush1.bf16.msra.mxu1 %v6914_v52 }
  0x63   :  { %4900 = vmatprep.subr.bf16.mxu1 %v6917_v53 }
  0x66   :  { %4902 = vmatpush1.bf16.msra.mxu1 %v6920_v59 }
  0x67   :  { %4968 = vmatprep.subr.bf16.mxu1 %v6923_v60 }
  0x69   :  { %486 = vmatmul.mubr.f32.vlgmr.msra.gmra.mrb[2].mxu1 %v6874_v1  ;;  %v532_v1 = vld [vmem:[#allocation6 + $0x60] sm:$0xff] }
  0x6a   :  { %4970 = vmatpush1.bf16.msra.mxu1 %v6930_v7  ;;  %v6938_v25 = vpack.c.bf16 %v532_v1, %v528_v23  ;;  %v550_v23 = vld [vmem:[#allocation6 + $0xf0] sm:$0xff] }
  0x6b   :  { %4972 = vmatprep.subr.bf16.mxu1 %v6936_v24  ;;  %v6965_v1 = vpack.c.bf16 %v550_v23, %v546_v18  ;;  %v567_v18 = vld [vmem:[#allocation6 + $0x178] sm:$0xff]  ;;  %v560_v23 = vld [vmem:[#allocation6 + $0x140] sm:$0xff] }
  0x6c   :  { %4910 = vmatpush1.bf16.msra.mxu0 %v6938_v25  ;;  %v6984_v31 = vpack.c.bf16 %v567_v18, %v563_v6  ;;  %v6986_v35 = vpack.c.bf16 %v564_v26, %v560_v23  ;;  %v575_v6 = vld [vmem:[#allocation6 + $0x1b8] sm:$0xff]  ;;  %v568_v18 = vld [vmem:[#allocation6 + $0x180] sm:$0xff] }
  0x6d   :  { %4912 = vmatprep.subr.bf16.mxu0 %v6946_v42  ;;  %v572_v23 = vld [vmem:[#allocation6 + $0x1a0] sm:$0xff]  ;;  %v6996_v26 = vpack.c.bf16 %v575_v6, %v571_v61  ;;  %v583_v61 = vld [vmem:[#allocation6 + $0x1f8] sm:$0xff] }
  0x6e   :  { %4974 = vmatpush1.bf16.msra.mxu1 %v6941_v32  ;;  %9022 = vst [vmem:[#allocation15_spill] sm:$0xff] %v6984_v31  ;;  %9023 = vst [vmem:[#allocation16_spill] sm:$0xff] %v6986_v35  ;;  %v6998_v0 = vpack.c.bf16 %v572_v23, %v568_v18  ;;  %v576_v6 = vld [vmem:[#allocation6 + $0x1c0] sm:$0xff]  ;;  %v7008_v23 = vpack.c.bf16 %v583_v61, %v579_v56  ;;  %v591_v56 = vld [vmem:[#allocation6 + $0x238] sm:$0xff] }
  0x6f   :  { %4976 = vmatprep.subr.bf16.mxu1 %v6948_v48  ;;  %9026 = vst [vmem:[#allocation19_spill] sm:$0xff] %v6996_v26  ;;  %v580_v18 = vld [vmem:[#allocation6 + $0x1e0] sm:$0xff] }
  0x70   :  { %4914 = vmatpush1.bf16.msra.mxu0 %v6950_v49  ;;  %9027 = vst [vmem:[#allocation20_spill] sm:$0xff] %v6998_v0  ;;  %9030 = vst [vmem:[#allocation23_spill] sm:$0xff] %v7008_v23  ;;  %v584_v61 = vld [vmem:[#allocation6 + $0x200] sm:$0xff] }
  0x71   :  { %4916 = vmatprep.subr.bf16.mxu0 %v6958_v62 }
  0x72   :  { %4978 = vmatpush1.bf16.msra.mxu1 %v6953_v55 }
  0x73   :  { %4980 = vmatprep.subr.bf16.mxu1 %v6960_v13 }
  0x74   :  { %4918 = vmatpush1.bf16.msra.mxu0 %v6962_v14 }
  0x75   :  { %4920 = vmatprep.subr.bf16.mxu0 %v6970_v36 }
  0x76   :  { %4982 = vmatpush1.bf16.msra.mxu1 %v6965_v1 }
  0x77   :  { %4984 = vmatprep.subr.bf16.mxu1 %v6972_v47 }
  0x78   :  { %4922 = vmatpush1.bf16.msra.mxu0 %v6974_v51  ;;  %v636_v51 = vld [vmem:[#allocation6 + $0x3a0] sm:$0xff] }
  0x79   :  { %4924 = vmatprep.subr.bf16.mxu0 %v6982_v8  ;;  %v7010_v8 = vpack.c.bf16 %v580_v18, %v576_v6  ;;  %v588_v6 = vld [vmem:[#allocation6 + $0x220] sm:$0xff] }
  0x7a   :  { %4986 = vmatpush1.bf16.msra.mxu1 %v6977_v57 }
  0x7b   :  { %4988 = vmatprep.subr.bf16.mxu1 %v6984_v31  ;;  %v7001_v31 = vpack.c.bf16 %v574_v43, %v570_v41  ;;  %9031 = vst [vmem:[#allocation24_spill] sm:$0xff] %v7010_v8  ;;  %v578_v41 = vld [vmem:[#allocation6 + $0x1d0] sm:$0xff] }
  0x7c   :  { %4926 = vmatpush1.bf16.msra.mxu0 %v6986_v35  ;;  %v582_v43 = vld [vmem:[#allocation6 + $0x1f0] sm:$0xff] }
  0x7d   :  { %4928 = vmatprep.subr.bf16.mxu0 %v6994_v63  ;;  %9028 = vst [vmem:[#allocation21_spill] sm:$0xff] %v7001_v31  ;;  %v7022_v63 = vpack.c.bf16 %v588_v6, %v584_v61  ;;  %v596_v61 = vld [vmem:[#allocation6 + $0x260] sm:$0xff] }
  0x7e   :  { %4990 = vmatpush1.bf16.msra.mxu1 %v6989_v44  ;;  %v577_v44 = vld [vmem:[#allocation6 + $0x1c8] sm:$0xff] }
  0x7f   :  { %4992 = vmatprep.subr.bf16.mxu1 %v6996_v26  ;;  %v7006_v35 = vpack.c.bf16 %v581_v54, %v577_v44  ;;  %v7013_v26 = vpack.c.bf16 %v582_v43, %v578_v41  ;;  %v589_v44 = vld [vmem:[#allocation6 + $0x228] sm:$0xff]  ;;  %v587_v54 = vld [vmem:[#allocation6 + $0x218] sm:$0xff]  ;;  %9035 = vst [vmem:[#allocation28_spill] sm:$0xff] %v7022_v63  ;;  %v586_v41 = vld [vmem:[#allocation6 + $0x210] sm:$0xff] }
  0x80   :  { %4930 = vmatpush1.bf16.msra.mxu0 %v6998_v0  ;;  %v7020_v18 = vpack.c.bf16 %v591_v56, %v587_v54  ;;  %v590_v43 = vld [vmem:[#allocation6 + $0x230] sm:$0xff]  ;;  %v599_v54 = vld [vmem:[#allocation6 + $0x278] sm:$0xff]  ;;  %v592_v56 = vld [vmem:[#allocation6 + $0x240] sm:$0xff] }
  0x81   :  { %9029 = vst [vmem:[#allocation22_spill] sm:$0xff] %v7006_v35  ;;  %4932 = vmatprep.subr.bf16.mxu0 %v7006_v35  ;;  %9032 = vst [vmem:[#allocation25_spill] sm:$0xff] %v7013_v26  ;;  %v594_v35 = vld [vmem:[#allocation6 + $0x250] sm:$0xff] }
  0x82   :  { %4994 = vmatpush1.bf16.msra.mxu1 %v7001_v31  ;;  %v585_v31 = vld [vmem:[#allocation6 + $0x208] sm:$0xff]  ;;  %9034 = vst [vmem:[#allocation27_spill] sm:$0xff] %v7020_v18 }
  0x83   :  { %4996 = vmatprep.subr.bf16.mxu1 %v7008_v23  ;;  %v7018_v0 = vpack.c.bf16 %v589_v44, %v585_v31  ;;  %v7025_v23 = vpack.c.bf16 %v590_v43, %v586_v41  ;;  %v597_v31 = vld [vmem:[#allocation6 + $0x268] sm:$0xff]  ;;  %v595_v44 = vld [vmem:[#allocation6 + $0x258] sm:$0xff]  ;;  %v7035_v41 = vpack.c.bf16 %v596_v61, %v592_v56 }
  0x84   :  { %4934 = vmatpush1.bf16.msra.mxu0 %v7010_v8  ;;  %v7032_v6 = vpack.c.bf16 %v599_v54, %v595_v44  ;;  %v600_v44 = vld [vmem:[#allocation6 + $0x280] sm:$0xff] }
  0x85   :  { %9033 = vst [vmem:[#allocation26_spill] sm:$0xff] %v7018_v0  ;;  %4936 = vmatprep.subr.bf16.mxu0 %v7018_v0  ;;  %9036 = vst [vmem:[#allocation29_spill] sm:$0xff] %v7025_v23  ;;  %v598_v0 = vld [vmem:[#allocation6 + $0x270] sm:$0xff]  ;;  %v604_v54 = vld [vmem:[#allocation6 + $0x2a0] sm:$0xff] }
  0x86   :  { %4998 = vmatpush1.bf16.msra.mxu1 %v7013_v26  ;;  %v593_v26 = vld [vmem:[#allocation6 + $0x248] sm:$0xff]  ;;  %9038 = vst [vmem:[#allocation31_spill] sm:$0xff] %v7032_v6  ;;  %9039 = vst [vmem:[#allocation32_spill] sm:$0xff] %v7035_v41  ;;  %v7037_v43 = vpack.c.bf16 %v598_v0, %v594_v35  ;;  %v7046_v56 = vpack.c.bf16 %v604_v54, %v600_v44  ;;  %v602_v0 = vld [vmem:[#allocation6 + $0x290] sm:$0xff] }
  0x87   :  { %5000 = vmatprep.subr.bf16.mxu1 %v7020_v18  ;;  %v7030_v8 = vpack.c.bf16 %v597_v31, %v593_v26  ;;  %v605_v18 = vld [vmem:[#allocation6 + $0x2a8] sm:$0xff]  ;;  %v607_v31 = vld [vmem:[#allocation6 + $0x2b8] sm:$0xff]  ;;  %v606_v35 = vld [vmem:[#allocation6 + $0x2b0] sm:$0xff] }
  0x88   :  { %4938 = vmatpush1.bf16.msra.mxu0 %v7022_v63  ;;  %9040 = vst [vmem:[#allocation33_spill] sm:$0xff] %v7037_v43  ;;  %v601_v63 = vld [vmem:[#allocation6 + $0x288] sm:$0xff]  ;;  %9043 = vst [vmem:[#allocation36_spill] sm:$0xff] %v7046_v56  ;;  %v7049_v61 = vpack.c.bf16 %v606_v35, %v602_v0  ;;  %v610_v0 = vld [vmem:[#allocation6 + $0x2d0] sm:$0xff] }
  0x89   :  { %9037 = vst [vmem:[#allocation30_spill] sm:$0xff] %v7030_v8  ;;  %4940 = vmatprep.subr.bf16.mxu0 %v7030_v8  ;;  %v7042_v26 = vpack.c.bf16 %v605_v18, %v601_v63  ;;  %v608_v18 = vld [vmem:[#allocation6 + $0x2c0] sm:$0xff]  ;;  %v614_v35 = vld [vmem:[#allocation6 + $0x2f0] sm:$0xff]  ;;  %v637_v8 = vld [vmem:[#allocation6 + $0x3a8] sm:$0xff] }
  0x8a   :  { %5002 = vmatpush1.bf16.msra.mxu1 %v7025_v23  ;;  %v603_v23 = vld [vmem:[#allocation6 + $0x298] sm:$0xff]  ;;  %9044 = vst [vmem:[#allocation37_spill] sm:$0xff] %v7049_v61 }
  0x8b   :  { %5004 = vmatprep.subr.bf16.mxu1 %v7032_v6  ;;  %9041 = vst [vmem:[#allocation34_spill] sm:$0xff] %v7042_v26  ;;  %v7044_v57 = vpack.c.bf16 %v607_v31, %v603_v23  ;;  %v613_v6 = vld [vmem:[#allocation6 + $0x2e8] sm:$0xff]  ;;  %v615_v23 = vld [vmem:[#allocation6 + $0x2f8] sm:$0xff]  ;;  %v612_v31 = vld [vmem:[#allocation6 + $0x2e0] sm:$0xff] }
  0x8c   :  { %4942 = vmatpush1.bf16.msra.mxu0 %v7035_v41  ;;  %v609_v41 = vld [vmem:[#allocation6 + $0x2c8] sm:$0xff]  ;;  %v7058_v54 = vpack.c.bf16 %v612_v31, %v608_v18 }
  0x8d   :  { %9042 = vst [vmem:[#allocation35_spill] sm:$0xff] %v7044_v57  ;;  %4944 = vmatprep.subr.bf16.mxu0 %v7042_v26  ;;  %v7054_v63 = vpack.c.bf16 %v613_v6, %v609_v41  ;;  %v621_v26 = vld [vmem:[#allocation6 + $0x328] sm:$0xff]  ;;  %v623_v41 = vld [vmem:[#allocation6 + $0x338] sm:$0xff] }
  0x8e   :  { %5006 = vmatpush1.bf16.msra.mxu1 %v7037_v43  ;;  %v611_v43 = vld [vmem:[#allocation6 + $0x2d8] sm:$0xff]  ;;  %9047 = vst [vmem:[#allocation40_spill] sm:$0xff] %v7058_v54 }
  0x8f   :  { %5008 = vmatprep.subr.bf16.mxu1 %v7044_v57  ;;  %9045 = vst [vmem:[#allocation38_spill] sm:$0xff] %v7054_v63  ;;  %v7056_v44 = vpack.c.bf16 %v615_v23, %v611_v43  ;;  %v7061_v57 = vpack.c.bf16 %v614_v35, %v610_v0  ;;  %v616_v43 = vld [vmem:[#allocation6 + $0x300] sm:$0xff]  ;;  %v618_v0 = vld [vmem:[#allocation6 + $0x310] sm:$0xff] }
  0x90   :  { %4946 = vmatpush1.bf16.msra.mxu0 %v7046_v56  ;;  %v617_v56 = vld [vmem:[#allocation6 + $0x308] sm:$0xff]  ;;  %v620_v23 = vld [vmem:[#allocation6 + $0x320] sm:$0xff]  ;;  %v622_v35 = vld [vmem:[#allocation6 + $0x330] sm:$0xff] }
  0x91   :  { %9046 = vst [vmem:[#allocation39_spill] sm:$0xff] %v7056_v44  ;;  %4948 = vmatprep.subr.bf16.mxu0 %v7054_v63  ;;  %9048 = vst [vmem:[#allocation41_spill] sm:$0xff] %v7061_v57  ;;  %v7066_v6 = vpack.c.bf16 %v621_v26, %v617_v56  ;;  %v7070_v31 = vpack.c.bf16 %v620_v23, %v616_v43  ;;  %v629_v63 = vld [vmem:[#allocation6 + $0x368] sm:$0xff]  ;;  %v631_v56 = vld [vmem:[#allocation6 + $0x378] sm:$0xff] }
  0x92   :  { %5010 = vmatpush1.bf16.msra.mxu1 %v7049_v61  ;;  %v619_v61 = vld [vmem:[#allocation6 + $0x318] sm:$0xff] }
  0x93   :  { %5012 = vmatprep.subr.bf16.mxu1 %v7056_v44  ;;  %9049 = vst [vmem:[#allocation42_spill] sm:$0xff] %v7066_v6  ;;  %v7068_v18 = vpack.c.bf16 %v623_v41, %v619_v61  ;;  %9051 = vst [vmem:[#allocation44_spill] sm:$0xff] %v7070_v31  ;;  %v7073_v44 = vpack.c.bf16 %v622_v35, %v618_v0  ;;  %v624_v61 = vld [vmem:[#allocation6 + $0x340] sm:$0xff]  ;;  %v626_v0 = vld [vmem:[#allocation6 + $0x350] sm:$0xff] }
  0x94   :  { %4950 = vmatpush1.bf16.msra.mxu0 %v7058_v54  ;;  %v625_v54 = vld [vmem:[#allocation6 + $0x348] sm:$0xff]  ;;  %v628_v41 = vld [vmem:[#allocation6 + $0x360] sm:$0xff]  ;;  %v630_v35 = vld [vmem:[#allocation6 + $0x370] sm:$0xff] }
  0x95   :  { %9050 = vst [vmem:[#allocation43_spill] sm:$0xff] %v7068_v18  ;;  %4952 = vmatprep.subr.bf16.mxu0 %v7066_v6  ;;  %9052 = vst [vmem:[#allocation45_spill] sm:$0xff] %v7073_v44  ;;  %v7078_v26 = vpack.c.bf16 %v629_v63, %v625_v54  ;;  %v7082_v23 = vpack.c.bf16 %v628_v41, %v624_v61  ;;  %v633_v6 = vld [vmem:[#allocation6 + $0x388] sm:$0xff]  ;;  %v639_v54 = vld [vmem:[#allocation6 + $0x3b8] sm:$0xff] }
  0x96   :  { %5014 = vmatpush1.bf16.msra.mxu1 %v7061_v57  ;;  %v627_v57 = vld [vmem:[#allocation6 + $0x358] sm:$0xff]  ;;  %v7088_v63 = vpack.c.bf16 %v637_v8, %v633_v6  ;;  %v634_v61 = vld [vmem:[#allocation6 + $0x390] sm:$0xff]  ;;  %v645_v8 = vld [vmem:[#allocation6 + $0x3e8] sm:$0xff] }
  0x97   :  { %5016 = vmatprep.subr.bf16.mxu1 %v7068_v18  ;;  %9053 = vst [vmem:[#allocation46_spill] sm:$0xff] %v7078_v26  ;;  %v7080_v43 = vpack.c.bf16 %v631_v56, %v627_v57  ;;  %9055 = vst [vmem:[#allocation48_spill] sm:$0xff] %v7082_v23  ;;  %v7085_v18 = vpack.c.bf16 %v630_v35, %v626_v0  ;;  %v638_v41 = vld [vmem:[#allocation6 + $0x3b0] sm:$0xff]  ;;  %v641_v0 = vld [vmem:[#allocation6 + $0x3c8] sm:$0xff] }
  0x98   :  { %4954 = vmatpush1.bf16.msra.mxu0 %v7070_v31  ;;  %v635_v31 = vld [vmem:[#allocation6 + $0x398] sm:$0xff]  ;;  %9057 = vst [vmem:[#allocation50_spill] sm:$0xff] %v7088_v63  ;;  %v7097_v35 = vpack.c.bf16 %v638_v41, %v634_v61 }
  0x99   :  { %9054 = vst [vmem:[#allocation47_spill] sm:$0xff] %v7080_v43  ;;  %4956 = vmatprep.subr.bf16.mxu0 %v7078_v26  ;;  %9056 = vst [vmem:[#allocation49_spill] sm:$0xff] %v7085_v18  ;;  %v7092_v57 = vpack.c.bf16 %v639_v54, %v635_v31  ;;  %v643_v6 = vld [vmem:[#allocation6 + $0x3d8] sm:$0xff]  ;;  %v7100_v26 = vpack.c.bf16 %v645_v8, %v641_v0  ;;  %v640_v31 = vld [vmem:[#allocation6 + $0x3c0] sm:$0xff] }
  0x9a   :  { %5018 = vmatpush1.bf16.msra.mxu1 %v7073_v44  ;;  %v632_v44 = vld [vmem:[#allocation6 + $0x380] sm:$0xff]  ;;  %9060 = vst [vmem:[#allocation53_spill] sm:$0xff] %v7097_v35 }
  0x9b   :  { %5020 = vmatprep.subr.bf16.mxu1 %v7080_v43  ;;  %9058 = vst [vmem:[#allocation51_spill] sm:$0xff] %v7092_v57  ;;  %v7094_v56 = vpack.c.bf16 %v636_v51, %v632_v44  ;;  %v647_v43 = vld [vmem:[#allocation6 + $0x3f8] sm:$0xff]  ;;  %9061 = vst [vmem:[#allocation54_spill] sm:$0xff] %v7100_v26  ;;  %v644_v54 = vld [vmem:[#allocation6 + $0x3e0] sm:$0xff] }
  0x9c   :  { %4958 = vmatpush1.bf16.msra.mxu0 %v7082_v23  ;;  %v7102_v23 = vpack.c.bf16 %v647_v43, %v643_v6  ;;  %v642_v51 = vld [vmem:[#allocation6 + $0x3d0] sm:$0xff]  ;;  %v7109_v61 = vpack.c.bf16 %v644_v54, %v640_v31  ;;  %v116_v43 = vlaneseq  ;;  %v74_v6 = vld [vmem:[%s8746_s3] sm:$0xf] }
  0x9d   :  { %9059 = vst [vmem:[#allocation52_spill] sm:$0xff] %v7094_v56  ;;  %4960 = vmatprep.subr.bf16.mxu0 %v7088_v63  ;;  %v646_v44 = vld [vmem:[#allocation6 + $0x3f0] sm:$0xff] }
  0x9e   :  { %5022 = vmatpush1.bf16.msra.mxu1 %v7085_v18  ;;  %9062 = vst [vmem:[#allocation55_spill] sm:$0xff] %v7102_v23  ;;  %v4718_v18 = vld [vmem:[%s8744_s1 + $0x8] sm:$0xff]  ;;  %9063 = vst [vmem:[#allocation56_spill] sm:$0xff] %v7109_v61  ;;  %v7111_v41 = vpack.c.bf16 %v646_v44, %v642_v51  ;;  %v117_v0 = vshrl.u32 %v116_v43, 7 }
  0x9f   :  { %5024 = vmatprep.subr.bf16.mxu1 %v7092_v57  ;;  %712 = vmatprep.mubr.f32.mxu0 %v4718_v18 }
  0xa0   :  { %4962 = vmatpush1.bf16.msra.mxu0 %v7094_v56  ;;  %9064 = vst [vmem:[#allocation57_spill] sm:$0xff] %v7111_v41  ;;  %783 = vmatprep.mubr.f32.mxu1 %v4718_v18  ;;  %v7119_v8 = vsub.s32 1, %v117_v0  ;;  %v7124_v31 = vsub.s32 0, %v117_v0 }
  0xa1   :  { %4964 = vmatprep.subr.bf16.mxu0 %v7100_v26 }
  0xa2   :  { %5026 = vmatpush1.bf16.msra.mxu1 %v7097_v35  ;;  %9065 = vst [vmem:[#allocation58_spill] sm:$0xff] %v7119_v8  ;;  %9066 = vst [vmem:[#allocation59_spill] sm:$0xff] %v7124_v31  ;;  %v7127_v18 = vrot.slane %v74_v6, %v7119_v8  ;;  %v7130_v51 = vrot.slane %v74_v6, %v7124_v31 }
  0xa3   :  { %5028 = vmatprep.subr.bf16.mxu1 %v7102_v23 }
  0xa4   :  { %4966 = vmatpush1.bf16.msra.mxu0 %v7109_v61  ;;  %9067 = vst [vmem:[#allocation60_spill] sm:$0xff] %v7127_v18  ;;  %9068 = vst [vmem:[#allocation61_spill] sm:$0xff] %v7130_v51 }
  0xa5   :  { %5032 = vmatprep.subr.bf16.mxu0 %v6815_v5  ;;  %v168_v5 = vld [vmem:[%s8748_s5] sm:$0xf] }
  0xa6   :  { %5030 = vmatpush1.bf16.msra.mxu1 %v7111_v41  ;;  %v7137_v43 = vrot.slane %v168_v5, %v7119_v8  ;;  %v7141_v61 = vrot.slane %v168_v5, %v7124_v31  ;;  %v7147_v8 = vsub.s32 3, %v117_v0 }
  0xa7   :  { %5064 = vmatprep.subr.bf16.mxu1 %v6866_v58 }
  0xa8   :  { %9069 = vst [vmem:[#allocation62_spill] sm:$0xff] %v7137_v43  ;;  %9070 = vst [vmem:[#allocation63_spill] sm:$0xff] %v7141_v61  ;;  %v7153_v31 = vrot.slane %v74_v6, %v7147_v8 }
  0xaa   :  { %9072 = vst [vmem:[#allocation65_spill] sm:$0xff] %v7153_v31 }
  0xb3   :  { %v78_v54 = vpop.permute.xlu0 %77 }
  0xb4   :  { %v137_v44 = vmul.f32 %v7127_v18, %v78_v54  ;;  %v136_v41 = vmul.f32 %v7130_v51, %v78_v54  ;;  %v7145_v18 = vsub.s32 2, %v117_v0 }
  0xb6   :  { %v191_v26 = vadd.f32 %v7137_v43, %v137_v44  ;;  %v190_v35 = vadd.f32 %v7141_v61, %v136_v41  ;;  %v7150_v51 = vrot.slane %v74_v6, %v7145_v18 }
  0xb8   :  { %9071 = vst [vmem:[#allocation64_spill] sm:$0xff] %v7150_v51  ;;  %v138_v41 = vmul.f32 %v7150_v51, %v78_v54 }
 0x11c   :  { %v416_v58 = vpop.f32.mrb[0].mxu1 }
 0x11d   :  { %v418_v23 = vpop.f32.mrb[1].mxu1  ;;  %v492_v57 = vadd.f32 %v416_v58, %v190_v35 }
 0x11e   :  { %v493_v56 = vadd.f32 %v418_v23, %v191_v26  ;;  %v7157_v26 = vrot.slane %v168_v5, %v7145_v18  ;;  %v139_v23 = vmul.f32 %v7153_v31, %v78_v54  ;;  %v277_v54 = vld [vmem:[%s8745_s2] sm:$0xff] }
 0x11f   :  { %v4720_v47 = vmul.f32 -1.442695, %v492_v57 }
 0x120   :  { %v4721_v63 = vmul.f32 -1.442695, %v493_v56  ;;  %9073 = vst [vmem:[#allocation66_spill] sm:$0xff] %v7157_v26  ;;  %v192_v56 = vadd.f32 %v7157_v26, %v138_v41 }
 0x122   :  { %6415 = vpow2.f32 %v4721_v63 }
 0x123   :  { %6417 = vpow2.f32 %v4720_v47  ;;  %v7161_v47 = vrot.slane %v168_v5, %v7147_v8 }
 0x125   :  { %v193_v0 = vadd.f32 %v7161_v47, %v139_v23 }
 0x12c   :  { %v6416_v36 = vpop.eup %6415 }
 0x12d   :  { %v6418_v44 = vpop.eup %6417  ;;  %v505_v63 = vadd.f32 1.0, %v6416_v36 }
 0x12e   :  { %v499_v57 = vadd.f32 1.0, %v6418_v44 }
 0x12f   :  { %6419 = vrcp.f32 %v505_v63 }
 0x130   :  { %6421 = vrcp.f32 %v499_v57 }
 0x139   :  { %v6420_v61 = vpop.eup %6419 }
 0x13a   :  { %v6422_v36 = vpop.eup %6421  ;;  %v515_v44 = vmul.f32 %v6420_v61, %v277_v54  ;;  %v9074_v61 = vmov 0.0   ;;  %v9116_v54 = vld [vmem:[#allocation51_spill] sm:$0xff] }
 0x13c   :  { %v487_v35 = vpop.f32.mrb[2].mxu1 }
 0x13d   :  { %v494_v6 = vadd.f32 %v487_v35, %v192_v56  ;;  %v489_v58 = vpop.f32.mrb[3].mxu1  ;;  %v9111_v56 = vld [vmem:[#allocation46_spill] sm:$0xff]  ;;  %v9112_v35 = vld [vmem:[#allocation47_spill] sm:$0xff] }
 0x13e   :  { %v495_v51 = vadd.f32 %v489_v58, %v193_v0  ;;  %v9113_v0 = vld [vmem:[#allocation48_spill] sm:$0xff]  ;;  %v9115_v58 = vld [vmem:[#allocation50_spill] sm:$0xff] }
 0x13f   :  { %6423 = vtanh.f32 %v494_v6  ;;  %v9114_v6 = vld [vmem:[#allocation49_spill] sm:$0xff] }
 0x140   :  { %v4722_v43 = vmul.f32 -1.442695, %v495_v51 }
 0x142   :  { %6425 = vpow2.f32 %v4722_v43  ;;  %v9109_v43 = vld [vmem:[#allocation44_spill] sm:$0xff] }
 0x149   :  { %v6424_v5 = vpop.eup %6423 }
 0x14a   :  { %v516_v41 = vmul.f32 %v6424_v5, %v6422_v36  ;;  %v9117_v36 = vld [vmem:[#allocation52_spill] sm:$0xff]  ;;  %v9118_v5 = vld [vmem:[#allocation53_spill] sm:$0xff] }
 0x14c   :  { %v6426_v26 = vpop.eup %6425  ;;  %v7168_v31 = vadd.f32 %v516_v41, %v515_v44  ;;  %v9119_v44 = vld [vmem:[#allocation54_spill] sm:$0xff]  ;;  %v9120_v41 = vld [vmem:[#allocation55_spill] sm:$0xff] }
 0x14d   :  { %v512_v23 = vadd.f32 1.0, %v6426_v26  ;;  %v9110_v26 = vld [vmem:[#allocation45_spill] sm:$0xff] }
 0x14e   :  { %6427 = vtanh.f32 %v7168_v31 }
 0x14f   :  { %6429 = vrcp.f32 %v512_v23  ;;  %v9121_v23 = vld [vmem:[#allocation56_spill] sm:$0xff] }
 0x158   :  { %v6428_v63 = vpop.eup %6427 }
 0x159   :  { %v6430_v57 = vpop.eup %6429 }
 0x15a   :  { %v519_v51 = vmul.f32 %v6430_v57, %v6428_v63  ;;  %v9122_v63 = vld [vmem:[#allocation57_spill] sm:$0xff]  ;;  %v1355_v57 = vld [vmem:[#allocation4 + $0x8] sm:$0xff] }
 0x15c   :  { %713 = vmatmul.mubr.f32.vlgmr.msra.gmra.mrb[0].mxu0 %v519_v51  ;;  %784 = vmatmul.mubr.f32.vlgmr.msra.gmra.mrb[4].mxu1 %v519_v51 }
 0x15d   :  { %5034 = vmatpush1.bf16.msra.mxu0 %v6817_v9  ;;  %5066 = vmatpush1.bf16.msra.mxu1 %v6876_v2  ;;  %v868_v9 = vld [vmem:[#allocation4 + $0x180] sm:$0xff] }
 0x15e   :  { %5036 = vmatprep.subr.bf16.mxu0 %v6819_v10  ;;  %5068 = vmatprep.subr.bf16.mxu1 %v6879_v3  ;;  %v872_v10 = vld [vmem:[#allocation4 + $0x1a0] sm:$0xff]  ;;  %v9080_v3 = vld [vmem:[#allocation15_spill] sm:$0xff] }
 0x15f   :  { %948 = vmatprep.mubr.f32.mxu0 %v9074_v61  ;;  %1019 = vmatprep.mubr.f32.mxu1 %v9074_v61  ;;  %v9079_v2 = vld [vmem:[#allocation14_spill] sm:$0xff] }
 0x161   :  { %5038 = vmatpush1.bf16.msra.mxu0 %v6823_v15  ;;  %5070 = vmatpush1.bf16.msra.mxu1 %v6883_v11  ;;  %v877_v15 = vld [vmem:[#allocation4 + $0x1c8] sm:$0xff]  ;;  %v9081_v11 = vld [vmem:[#allocation16_spill] sm:$0xff] }
 0x162   :  { %5040 = vmatprep.subr.bf16.mxu0 %v6826_v16  ;;  %5072 = vmatprep.subr.bf16.mxu1 %v6887_v12  ;;  %v881_v16 = vld [vmem:[#allocation4 + $0x1e8] sm:$0xff]  ;;  %v9082_v12 = vld [vmem:[#allocation17_spill] sm:$0xff] }
 0x165   :  { %5042 = vmatpush1.bf16.msra.mxu0 %v6829_v21  ;;  %5074 = vmatpush1.bf16.msra.mxu1 %v6890_v19  ;;  %v7195_v21 = vpack.c.bf16 %v872_v10, %v868_v9  ;;  %v9083_v19 = vld [vmem:[#allocation18_spill] sm:$0xff]  ;;  %v1357_v9 = vld [vmem:[#allocation4 + $0x18] sm:$0xff] }
 0x166   :  { %5044 = vmatprep.subr.bf16.mxu0 %v6832_v22  ;;  %5076 = vmatprep.subr.bf16.mxu1 %v6893_v20  ;;  %v7199_v22 = vpack.c.bf16 %v881_v16, %v877_v15  ;;  %v9084_v20 = vld [vmem:[#allocation19_spill] sm:$0xff]  ;;  %v1361_v15 = vld [vmem:[#allocation4 + $0x38] sm:$0xff] }
 0x167   :  { %v7275_v16 = vpack.c.bf16 %v1361_v15, %v1357_v9  ;;  %v9134_v15 = vld [vmem:[#allocation64_spill] sm:$0xff] }
 0x169   :  { %5046 = vmatpush1.bf16.msra.mxu0 %v6835_v27  ;;  %5078 = vmatpush1.bf16.msra.mxu1 %v6896_v29  ;;  %v876_v27 = vld [vmem:[#allocation4 + $0x1c0] sm:$0xff]  ;;  %v9085_v29 = vld [vmem:[#allocation20_spill] sm:$0xff] }
 0x16a   :  { %5048 = vmatprep.subr.bf16.mxu0 %v6838_v28  ;;  %5080 = vmatprep.subr.bf16.mxu1 %v6899_v30  ;;  %v880_v28 = vld [vmem:[#allocation4 + $0x1e0] sm:$0xff]  ;;  %v9086_v30 = vld [vmem:[#allocation21_spill] sm:$0xff] }
 0x16d   :  { %5050 = vmatpush1.bf16.msra.mxu0 %v6841_v33  ;;  %5082 = vmatpush1.bf16.msra.mxu1 %v6902_v37  ;;  %v7203_v33 = vpack.c.bf16 %v880_v28, %v876_v27  ;;  %v9087_v37 = vld [vmem:[#allocation22_spill] sm:$0xff]  ;;  %v68_v27 = vld [vmem:[%s8743_s0 + $0x10] sm:$0xff]  ;;  %v69_v28 = vld [vmem:[%s8743_s0 + $0x18] sm:$0xff] }
 0x16e   :  { %5052 = vmatprep.subr.bf16.mxu0 %v6844_v34  ;;  %5084 = vmatprep.subr.bf16.mxu1 %v6905_v38  ;;  %v9075_v34 = vld [vmem:[#allocation10_spill] sm:$0xff]  ;;  %v9088_v38 = vld [vmem:[#allocation23_spill] sm:$0xff] }
 0x16f   :  { %87 = vperm.xlu1 %6414, %v68_v27  }
 0x171   :  { %5054 = vmatpush1.bf16.msra.mxu0 %v6847_v39  ;;  %5086 = vmatpush1.bf16.msra.mxu1 %v6908_v45  ;;  %v9076_v39 = vld [vmem:[#allocation11_spill] sm:$0xff]  ;;  %v9089_v45 = vld [vmem:[#allocation24_spill] sm:$0xff] }
 0x172   :  { %5056 = vmatprep.subr.bf16.mxu0 %v6850_v40  ;;  %5088 = vmatprep.subr.bf16.mxu1 %v6911_v46  ;;  %v9077_v40 = vld [vmem:[#allocation12_spill] sm:$0xff]  ;;  %v9090_v46 = vld [vmem:[#allocation25_spill] sm:$0xff] }
 0x173   :  { %92 = vperm.xlu1 %6414, %v69_v28  }
 0x175   :  { %5058 = vmatpush1.bf16.msra.mxu0 %v7195_v21  ;;  %5090 = vmatpush1.bf16.msra.mxu1 %v6914_v52  ;;  %v9091_v52 = vld [vmem:[#allocation26_spill] sm:$0xff] }
 0x176   :  { %5060 = vmatprep.subr.bf16.mxu0 %v7199_v22  ;;  %5092 = vmatprep.subr.bf16.mxu1 %v6917_v53  ;;  %v9092_v53 = vld [vmem:[#allocation27_spill] sm:$0xff] }
 0x179   :  { %5062 = vmatpush1.bf16.msra.mxu0 %v7203_v33  ;;  %5094 = vmatpush1.bf16.msra.mxu1 %v6920_v59  ;;  %v9093_v59 = vld [vmem:[#allocation28_spill] sm:$0xff] }
 0x17a   :  { %5096 = vmatprep.subr.bf16.mxu0 %v6859_v50  ;;  %5160 = vmatprep.subr.bf16.mxu1 %v6923_v60  ;;  %v9078_v50 = vld [vmem:[#allocation13_spill] sm:$0xff] }
 0x17b   :  { %v9094_v60 = vld [vmem:[#allocation29_spill] sm:$0xff] }
 0x17c   :  { %949 = vmatmul.mubr.f32.vlgmr.msra.gmra.mrb[2].mxu0 %v519_v51  ;;  %1020 = vmatmul.mubr.f32.vlgmr.msra.gmra.mrb[6].mxu1 %v519_v51  ;;  %v1359_v51 = vld [vmem:[#allocation4 + $0x28] sm:$0xff] }
 0x17d   :  { %5098 = vmatpush1.bf16.msra.mxu0 %v6928_v4  ;;  %5162 = vmatpush1.bf16.msra.mxu1 %v6930_v7  ;;  %v9095_v4 = vld [vmem:[#allocation30_spill] sm:$0xff]  ;;  %v9096_v7 = vld [vmem:[#allocation31_spill] sm:$0xff]  ;;  %v7273_v10 = vpack.c.bf16 %v1359_v51, %v1355_v57 }
 0x17e   :  { %5100 = vmatprep.subr.bf16.mxu0 %v6934_v17  ;;  %5164 = vmatprep.subr.bf16.mxu1 %v6936_v24  ;;  %v9097_v17 = vld [vmem:[#allocation32_spill] sm:$0xff]  ;;  %v9098_v24 = vld [vmem:[#allocation33_spill] sm:$0xff] }
 0x181   :  { %5102 = vmatpush1.bf16.msra.mxu0 %v6938_v25  ;;  %5166 = vmatpush1.bf16.msra.mxu1 %v6941_v32  ;;  %v9099_v25 = vld [vmem:[#allocation34_spill] sm:$0xff]  ;;  %v9100_v32 = vld [vmem:[#allocation35_spill] sm:$0xff] }
 0x182   :  { %5104 = vmatprep.subr.bf16.mxu0 %v6946_v42  ;;  %5168 = vmatprep.subr.bf16.mxu1 %v6948_v48  ;;  %v9101_v42 = vld [vmem:[#allocation36_spill] sm:$0xff]  ;;  %v9102_v48 = vld [vmem:[#allocation37_spill] sm:$0xff] }
 0x185   :  { %5106 = vmatpush1.bf16.msra.mxu0 %v6950_v49  ;;  %5170 = vmatpush1.bf16.msra.mxu1 %v6953_v55  ;;  %v9103_v49 = vld [vmem:[#allocation38_spill] sm:$0xff]  ;;  %v9104_v55 = vld [vmem:[#allocation39_spill] sm:$0xff] }
 0x186   :  { %5108 = vmatprep.subr.bf16.mxu0 %v6958_v62  ;;  %5172 = vmatprep.subr.bf16.mxu1 %v6960_v13  ;;  %v9105_v62 = vld [vmem:[#allocation40_spill] sm:$0xff]  ;;  %v9106_v13 = vld [vmem:[#allocation41_spill] sm:$0xff] }
 0x189   :  { %5110 = vmatpush1.bf16.msra.mxu0 %v6962_v14  ;;  %5174 = vmatpush1.bf16.msra.mxu1 %v6965_v1  ;;  %v9107_v14 = vld [vmem:[#allocation42_spill] sm:$0xff]  ;;  %v9108_v1 = vld [vmem:[#allocation43_spill] sm:$0xff] }
 0x18a   :  { %5112 = vmatprep.subr.bf16.mxu0 %v9075_v34  ;;  %5176 = vmatprep.subr.bf16.mxu1 %v9076_v39  ;;  %v71_v34 = vld [vmem:[%s8743_s0 + $0x28] sm:$0xff]  ;;  %v73_v39 = vld [vmem:[%s8743_s0 + $0x38] sm:$0xff] }
 0x18b   :  { %102 = vperm.xlu1 %6414, %v71_v34  }
 0x18d   :  { %5114 = vmatpush1.bf16.msra.mxu0 %v9077_v40  ;;  %5178 = vmatpush1.bf16.msra.mxu1 %v9078_v50  ;;  %v254_v40 = vld [vmem:[%s8750_s7] sm:$0xf]  ;;  %v9123_v50 = vld [vmem:[#allocation59_spill] sm:$0xff] }
 0x18e   :  { %5116 = vmatprep.subr.bf16.mxu0 %v9079_v2  ;;  %5180 = vmatprep.subr.bf16.mxu1 %v9080_v3  ;;  %v7295_v2 = vrot.slane %v254_v40, %v9123_v50  ;;  %v9125_v3 = vld [vmem:[#allocation58_spill] sm:$0xff] }
 0x18f   :  { %112 = vperm.xlu1 %6414, %v73_v39   ;;  %v9135_v39 = vld [vmem:[#allocation66_spill] sm:$0xff] }
 0x190   :  { %9124 = vst [vmem:[#allocation10_spill] sm:$0xff] %v7295_v2 }
 0x191   :  { %5118 = vmatpush1.bf16.msra.mxu0 %v9081_v11  ;;  %5182 = vmatpush1.bf16.msra.mxu1 %v9082_v12  ;;  %v7298_v11 = vrot.slane %v254_v40, %v9125_v3 }
 0x192   :  { %5120 = vmatprep.subr.bf16.mxu0 %v9083_v19  ;;  %5184 = vmatprep.subr.bf16.mxu1 %v9084_v20 }
 0x193   :  { %9126 = vst [vmem:[#allocation11_spill] sm:$0xff] %v7298_v11 }
 0x195   :  { %5122 = vmatpush1.bf16.msra.mxu0 %v9085_v29  ;;  %5186 = vmatpush1.bf16.msra.mxu1 %v9086_v30 }
 0x196   :  { %5124 = vmatprep.subr.bf16.mxu0 %v9087_v37  ;;  %5188 = vmatprep.subr.bf16.mxu1 %v9088_v38 }
 0x199   :  { %5126 = vmatpush1.bf16.msra.mxu0 %v9089_v45  ;;  %5190 = vmatpush1.bf16.msra.mxu1 %v9090_v46  ;;  %v7303_v46 = vrot.slane %v254_v40, %v7147_v8 }
 0x19a   :  { %5128 = vmatprep.subr.bf16.mxu0 %v9091_v52  ;;  %5192 = vmatprep.subr.bf16.mxu1 %v9092_v53  ;;  %v7307_v53 = vrot.slane %v254_v40, %v7145_v18  ;;  %v9129_v18 = vld [vmem:[#allocation61_spill] sm:$0xff] }
 0x19b   :  { %9127 = vst [vmem:[#allocation12_spill] sm:$0xff] %v7303_v46 }
 0x19c   :  { %9128 = vst [vmem:[#allocation13_spill] sm:$0xff] %v7307_v53 }
 0x19d   :  { %5130 = vmatpush1.bf16.msra.mxu0 %v9093_v59  ;;  %5194 = vmatpush1.bf16.msra.mxu1 %v9094_v60 }
 0x19e   :  { %5132 = vmatprep.subr.bf16.mxu0 %v9095_v4  ;;  %5196 = vmatprep.subr.bf16.mxu1 %v9096_v7 }
 0x1a1   :  { %5134 = vmatpush1.bf16.msra.mxu0 %v9097_v17  ;;  %5198 = vmatpush1.bf16.msra.mxu1 %v9098_v24 }
 0x1a2   :  { %5136 = vmatprep.subr.bf16.mxu0 %v9099_v25  ;;  %5200 = vmatprep.subr.bf16.mxu1 %v9100_v32  ;;  %v83_v25 = vpop.permute.xlu0 %82 }
 0x1a3   :  { %v142_v27 = vmul.f32 %v9134_v15, %v83_v25 }
 0x1a5   :  { %5138 = vmatpush1.bf16.msra.mxu0 %v9101_v42  ;;  %5202 = vmatpush1.bf16.msra.mxu1 %v9102_v48  ;;  %v4719_v42 = vld [vmem:[%s8745_s2 + $0x8] sm:$0xff]  ;;  %v140_v48 = vmul.f32 %v9129_v18, %v83_v25  ;;  %v196_v40 = vadd.f32 %v9135_v39, %v142_v27  ;;  %v1370_v27 = vld [vmem:[#allocation4 + $0x80] sm:$0xff] }
 0x1a6   :  { %5140 = vmatprep.subr.bf16.mxu0 %v9103_v49  ;;  %5204 = vmatprep.subr.bf16.mxu1 %v9104_v55  ;;  %v9130_v55 = vld [vmem:[#allocation60_spill] sm:$0xff] }
 0x1a9   :  { %5142 = vmatpush1.bf16.msra.mxu0 %v9105_v62  ;;  %5206 = vmatpush1.bf16.msra.mxu1 %v9106_v13  ;;  %v141_v62 = vmul.f32 %v9130_v55, %v83_v25 }
 0x1aa   :  { %5144 = vmatprep.subr.bf16.mxu0 %v9107_v14  ;;  %5208 = vmatprep.subr.bf16.mxu1 %v9108_v1 }
 0x1ad   :  { %5146 = vmatpush1.bf16.msra.mxu0 %v9109_v43  ;;  %5210 = vmatpush1.bf16.msra.mxu1 %v9110_v26  ;;  %v9131_v26 = vld [vmem:[#allocation63_spill] sm:$0xff] }
 0x1ae   :  { %5148 = vmatprep.subr.bf16.mxu0 %v9111_v56  ;;  %5212 = vmatprep.subr.bf16.mxu1 %v9112_v35  ;;  %v194_v56 = vadd.f32 %v9131_v26, %v140_v48  ;;  %v1367_v48 = vld [vmem:[#allocation4 + $0x68] sm:$0xff] }
 0x1b1   :  { %5150 = vmatpush1.bf16.msra.mxu0 %v9113_v0  ;;  %5214 = vmatpush1.bf16.msra.mxu1 %v9114_v6  ;;  %v9132_v6 = vld [vmem:[#allocation62_spill] sm:$0xff] }
 0x1b2   :  { %5152 = vmatprep.subr.bf16.mxu0 %v9115_v58  ;;  %5216 = vmatprep.subr.bf16.mxu1 %v9116_v54  ;;  %v195_v58 = vadd.f32 %v9132_v6, %v141_v62  ;;  %v1369_v62 = vld [vmem:[#allocation4 + $0x78] sm:$0xff] }
 0x1b5   :  { %5154 = vmatpush1.bf16.msra.mxu0 %v9117_v36  ;;  %5218 = vmatpush1.bf16.msra.mxu1 %v9118_v5 }
 0x1b6   :  { %5156 = vmatprep.subr.bf16.mxu0 %v9119_v44  ;;  %5220 = vmatprep.subr.bf16.mxu1 %v9120_v41 }
 0x1b9   :  { %5158 = vmatpush1.bf16.msra.mxu0 %v9121_v23  ;;  %5222 = vmatpush1.bf16.msra.mxu1 %v9122_v63  ;;  %v9133_v23 = vld [vmem:[#allocation65_spill] sm:$0xff] }
 0x1ba   :  { %5224 = vmatprep.subr.bf16.mxu0 %v7273_v10  ;;  %5256 = vmatprep.subr.bf16.mxu1 %v7275_v16  ;;  %v143_v63 = vmul.f32 %v9133_v23, %v83_v25  ;;  %v1356_v25 = vld [vmem:[#allocation4 + $0x10] sm:$0xff] }
 0x1bc   :  { %v197_v9 = vadd.f32 %v7161_v47, %v143_v63  ;;  %v1373_v63 = vld [vmem:[#allocation4 + $0x98] sm:$0xff] }
 0x22f   :  { %v714_v12 = vpop.f32.mrb[0].mxu0  ;;  %v785_v19 = vpop.f32.mrb[4].mxu1 }
 0x230   :  { %v715_v20 = vadd.f32 %v714_v12, %v7295_v2  ;;  %v716_v29 = vpop.f32.mrb[1].mxu0  ;;  %v787_v30 = vpop.f32.mrb[5].mxu1  ;;  %v786_v60 = vadd.f32 %v785_v19, %v7307_v53 }
 0x231   :  { %v717_v37 = vadd.f32 %v716_v29, %v7298_v11  ;;  %v788_v52 = vadd.f32 %v787_v30, %v7303_v46 }
 0x232   :  { %v4723_v38 = vmul.f32 -1.442695, %v715_v20 }
 0x233   :  { %v4724_v45 = vmul.f32 -1.442695, %v717_v37  ;;  %v4725_v59 = vmul.f32 -1.442695, %v788_v52 }
 0x234   :  { %6431 = vpow2.f32 %v4723_v38 }
 0x235   :  { %6433 = vpow2.f32 %v4724_v45 }
 0x236   :  { %6435 = vpow2.f32 %v4725_v59 }
 0x237   :  { %6437 = vtanh.f32 %v786_v60 }
 0x23e   :  { %v6432_v4 = vpop.eup %6431 }
 0x23f   :  { %v6434_v7 = vpop.eup %6433  ;;  %v793_v17 = vadd.f32 1.0, %v6432_v4 }
 0x240   :  { %v799_v24 = vadd.f32 1.0, %v6434_v7  ;;  %v6436_v8 = vpop.eup %6435 }
 0x241   :  { %6439 = vrcp.f32 %v793_v17  ;;  %v6438_v32 = vpop.eup %6437  ;;  %v806_v1 = vadd.f32 1.0, %v6436_v8  ;;  %v1358_v8 = vld [vmem:[#allocation4 + $0x20] sm:$0xff] }
 0x242   :  { %6441 = vrcp.f32 %v799_v24  ;;  %v1354_v24 = vld [vmem:[#allocation4] sm:$0xff] }
 0x243   :  { %6443 = vrcp.f32 %v806_v1  ;;  %v7332_v1 = vpack.c.bf16 %v1358_v8, %v1354_v24  ;;  %v1387_v24 = vld [vmem:[#allocation4 + $0x108] sm:$0xff] }
 0x244   :  { %v1391_v8 = vld [vmem:[#allocation4 + $0x128] sm:$0xff] }
 0x24b   :  { %v6440_v49 = vpop.eup %6439 }
 0x24c   :  { %v6442_v13 = vpop.eup %6441  ;;  %v810_v14 = vmul.f32 %v6440_v49, %v6438_v32  ;;  %v1360_v32 = vld [vmem:[#allocation4 + $0x30] sm:$0xff]  ;;  %v1365_v49 = vld [vmem:[#allocation4 + $0x58] sm:$0xff] }
 0x24d   :  { %v809_v43 = vmul.f32 %v6442_v13, %v4719_v42  ;;  %v6444_v34 = vpop.eup %6443  ;;  %v1363_v42 = vld [vmem:[#allocation4 + $0x48] sm:$0xff] }
 0x24f   :  { %v950_v35 = vpop.f32.mrb[2].mxu0  ;;  %v1021_v0 = vpop.f32.mrb[6].mxu1  ;;  %v7317_v54 = vadd.f32 %v810_v14, %v809_v43  ;;  %v7334_v43 = vpack.c.bf16 %v1360_v32, %v1356_v25  ;;  %v1389_v25 = vld [vmem:[#allocation4 + $0x118] sm:$0xff] }
 0x250   :  { %v1026_v36 = vadd.f32 %v950_v35, %v194_v56  ;;  %v952_v5 = vpop.f32.mrb[3].mxu0  ;;  %v1023_v44 = vpop.f32.mrb[7].mxu1  ;;  %v1028_v12 = vadd.f32 %v1021_v0, %v196_v40  ;;  %v1366_v56 = vld [vmem:[#allocation4 + $0x60] sm:$0xff]  ;;  %v7338_v0 = vpack.c.bf16 %v1367_v48, %v1363_v42  ;;  %v1393_v32 = vld [vmem:[#allocation4 + $0x138] sm:$0xff] }
 0x251   :  { %v1027_v41 = vadd.f32 %v952_v5, %v195_v58  ;;  %6445 = vtanh.f32 %v7317_v54  ;;  %v1029_v28 = vadd.f32 %v1023_v44, %v197_v9  ;;  %v7340_v58 = vpack.c.bf16 %v1369_v62, %v1365_v49  ;;  %v1368_v5 = vld [vmem:[#allocation4 + $0x70] sm:$0xff]  ;;  %v1371_v44 = vld [vmem:[#allocation4 + $0x88] sm:$0xff]  ;;  %v1386_v49 = vld [vmem:[#allocation4 + $0x100] sm:$0xff] }
 0x252   :  { %v4726_v57 = vmul.f32 -1.442695, %v1026_v36  ;;  %v1364_v36 = vld [vmem:[#allocation4 + $0x50] sm:$0xff]  ;;  %v1390_v62 = vld [vmem:[#allocation4 + $0x120] sm:$0xff] }
 0x253   :  { %v4727_v51 = vmul.f32 -1.442695, %v1027_v41  ;;  %v4728_v3 = vmul.f32 -1.442695, %v1029_v28  ;;  %v1375_v41 = vld [vmem:[#allocation4 + $0xa8] sm:$0xff]  ;;  %v7348_v9 = vpack.c.bf16 %v1368_v5, %v1364_v36  ;;  %v1374_v28 = vld [vmem:[#allocation4 + $0xa0] sm:$0xff] }
 0x254   :  { %6447 = vpow2.f32 %v4726_v57  ;;  %v1377_v57 = vld [vmem:[#allocation4 + $0xb8] sm:$0xff]  ;;  %v1395_v36 = vld [vmem:[#allocation4 + $0x148] sm:$0xff] }
 0x255   :  { %6449 = vpow2.f32 %v4727_v51  ;;  %v7354_v40 = vpack.c.bf16 %v1377_v57, %v1373_v63  ;;  %v1399_v5 = vld [vmem:[#allocation4 + $0x168] sm:$0xff]  ;;  %v7384_v63 = vpack.c.bf16 %v1390_v62, %v1386_v49  ;;  %v1413_v49 = vld [vmem:[#allocation4 + $0x1d8] sm:$0xff] }
 0x256   :  { %6451 = vpow2.f32 %v4728_v3  ;;  %v1376_v3 = vld [vmem:[#allocation4 + $0xb0] sm:$0xff]  ;;  %v1417_v62 = vld [vmem:[#allocation4 + $0x1f8] sm:$0xff] }
 0x257   :  { %6453 = vtanh.f32 %v1028_v12  ;;  %v1379_v12 = vld [vmem:[#allocation4 + $0xc8] sm:$0xff] }
 0x25b   :  { %v6446_v50 = vpop.eup %6445 }
 0x25c   :  { %v7324_v19 = vmul.f32 %v6446_v50, %v6444_v34  ;;  %v7352_v34 = vpack.c.bf16 %v1375_v41, %v1371_v44  ;;  %v1372_v50 = vld [vmem:[#allocation4 + $0x90] sm:$0xff]  ;;  %v1397_v44 = vld [vmem:[#allocation4 + $0x158] sm:$0xff] }
 0x25d   :  { %v1401_v41 = vld [vmem:[#allocation4 + $0x178] sm:$0xff] }
 0x25e   :  { %9136 = vst [vmem:[#allocation14_spill] sm:$0xff] %v7324_v19  ;;  %v6448_v20 = vpop.eup %6447  ;;  %1246 = vmatprep.mubr.f32.mxu0 %v7324_v19  ;;  %1317 = vmatprep.mubr.f32.mxu1 %v7324_v19 }
 0x25f   :  { %v6450_v29 = vpop.eup %6449  ;;  %v1033_v30 = vadd.f32 1.0, %v6448_v20  ;;  %v1383_v20 = vld [vmem:[#allocation4 + $0xe8] sm:$0xff] }
 0x260   :  { %v1039_v37 = vadd.f32 1.0, %v6450_v29  ;;  %v6452_v38 = vpop.eup %6451  ;;  %v1381_v29 = vld [vmem:[#allocation4 + $0xd8] sm:$0xff] }
 0x261   :  { %6455 = vrcp.f32 %v1033_v30  ;;  %v6454_v45 = vpop.eup %6453  ;;  %v1046_v4 = vadd.f32 1.0, %v6452_v38  ;;  %v1385_v30 = vld [vmem:[#allocation4 + $0xf8] sm:$0xff]  ;;  %v7362_v38 = vpack.c.bf16 %v1376_v3, %v1372_v50  ;;  %v7390_v50 = vpack.c.bf16 %v1399_v5, %v1395_v36  ;;  %v1412_v36 = vld [vmem:[#allocation4 + $0x1d0] sm:$0xff] }
 0x262   :  { %6457 = vrcp.f32 %v1039_v37  ;;  %v7360_v37 = vpack.c.bf16 %v1374_v28, %v1370_v27  ;;  %v1394_v27 = vld [vmem:[#allocation4 + $0x140] sm:$0xff]  ;;  %v7392_v3 = vpack.c.bf16 %v1401_v41, %v1397_v44  ;;  %v1416_v5 = vld [vmem:[#allocation4 + $0x1f0] sm:$0xff]  ;;  %v1589_v41 = vld [vmem:[#allocation6 + $0x8] sm:$0xff] }
 0x263   :  { %6459 = vrcp.f32 %v1046_v4  ;;  %v1380_v4 = vld [vmem:[#allocation4 + $0xd0] sm:$0xff]  ;;  %v1398_v28 = vld [vmem:[#allocation4 + $0x160] sm:$0xff]  ;;  %v7416_v44 = vpack.c.bf16 %v1416_v5, %v1412_v36 }
 0x264   :  { %v1596_v36 = vld [vmem:[#allocation6 + $0x40] sm:$0xff] }
 0x265   :  { %v1600_v5 = vld [vmem:[#allocation6 + $0x60] sm:$0xff] }
 0x26b   :  { %v6456_v52 = vpop.eup %6455 }
 0x26c   :  { %v6458_v59 = vpop.eup %6457  ;;  %v1050_v60 = vmul.f32 %v6456_v52, %v6454_v45  ;;  %v1378_v45 = vld [vmem:[#allocation4 + $0xc0] sm:$0xff] }
 0x26d   :  { %v1049_v7 = vmul.f32 %v6458_v59, %v7168_v31  ;;  %v6460_v13 = vpop.eup %6459  ;;  %v1362_v31 = vld [vmem:[#allocation4 + $0x40] sm:$0xff]  ;;  %v7366_v59 = vpack.c.bf16 %v1383_v20, %v1379_v12  ;;  %v1396_v12 = vld [vmem:[#allocation4 + $0x150] sm:$0xff] }
 0x26e   :  { %v7346_v51 = vpack.c.bf16 %v1366_v56, %v1362_v31  ;;  %v1382_v52 = vld [vmem:[#allocation4 + $0xe0] sm:$0xff]  ;;  %v1388_v31 = vld [vmem:[#allocation4 + $0x110] sm:$0xff] }
 0x26f   :  { %v7329_v17 = vadd.f32 %v1050_v60, %v1049_v7  ;;  %v7368_v60 = vpack.c.bf16 %v1385_v30, %v1381_v29  ;;  %v1384_v7 = vld [vmem:[#allocation4 + $0xf0] sm:$0xff]  ;;  %v7372_v42 = vpack.c.bf16 %v1382_v52, %v1378_v45  ;;  %v1403_v29 = vld [vmem:[#allocation4 + $0x188] sm:$0xff]  ;;  %v1405_v45 = vld [vmem:[#allocation4 + $0x198] sm:$0xff] }
 0x270   :  { %v7374_v48 = vpack.c.bf16 %v1384_v7, %v1380_v4  ;;  %v1392_v56 = vld [vmem:[#allocation4 + $0x130] sm:$0xff]  ;;  %v1407_v30 = vld [vmem:[#allocation4 + $0x1a8] sm:$0xff]  ;;  %v1409_v52 = vld [vmem:[#allocation4 + $0x1b8] sm:$0xff]  ;;  %v7396_v4 = vpack.c.bf16 %v1398_v28, %v1394_v27 }
 0x271   :  { %6461 = vtanh.f32 %v7329_v17  ;;  %v7386_v57 = vpack.c.bf16 %v1392_v56, %v1388_v31  ;;  %v1400_v20 = vld [vmem:[#allocation4 + $0x170] sm:$0xff]  ;;  %v7412_v56 = vpack.c.bf16 %v1417_v62, %v1413_v49  ;;  %v1593_v27 = vld [vmem:[#allocation6 + $0x28] sm:$0xff]  ;;  %v1591_v28 = vld [vmem:[#allocation6 + $0x18] sm:$0xff] }
 0x272   :  { %v7398_v7 = vpack.c.bf16 %v1400_v20, %v1396_v12  ;;  %v1595_v12 = vld [vmem:[#allocation6 + $0x38] sm:$0xff]  ;;  %v1588_v20 = vld [vmem:[#allocation6] sm:$0xff] }
 0x273   :  { %v1603_v62 = vld [vmem:[#allocation6 + $0x78] sm:$0xff] }
 0x27b   :  { %v6462_v14 = vpop.eup %6461 }
 0x27c   :  { %v7336_v35 = vmul.f32 %v6462_v14, %v6460_v13  ;;  %v7378_v13 = vpack.c.bf16 %v1391_v8, %v1387_v24  ;;  %v7380_v14 = vpack.c.bf16 %v1393_v32, %v1389_v25  ;;  %v7402_v24 = vpack.c.bf16 %v1407_v30, %v1403_v29  ;;  %v1404_v25 = vld [vmem:[#allocation4 + $0x190] sm:$0xff]  ;;  %v1592_v29 = vld [vmem:[#allocation6 + $0x20] sm:$0xff] }
 0x27d   :  { %v7404_v8 = vpack.c.bf16 %v1409_v52, %v1405_v45  ;;  %v1408_v32 = vld [vmem:[#allocation4 + $0x1b0] sm:$0xff]  ;;  %v7426_v30 = vpack.c.bf16 %v1595_v12, %v1591_v28 }
 0x27e   :  { %1247 = vmatmul.mubr.f32.vlgmr.msra.gmra.mrb[4].mxu0 %v7336_v35  ;;  %1318 = vmatmul.mubr.f32.vlgmr.msra.gmra.mrb[8].mxu1 %v7336_v35  ;;  %v7408_v31 = vpack.c.bf16 %v1408_v32, %v1404_v25  ;;  %v1590_v45 = vld [vmem:[#allocation6 + $0x10] sm:$0xff]  ;;  %v1601_v25 = vld [vmem:[#allocation6 + $0x68] sm:$0xff]  ;;  %v1599_v32 = vld [vmem:[#allocation6 + $0x58] sm:$0xff] }
 0x27f   :  { %5226 = vmatpush1.bf16.msra.mxu0 %v7332_v1  ;;  %5258 = vmatpush1.bf16.msra.mxu1 %v7334_v43  ;;  %v1598_v28 = vld [vmem:[#allocation6 + $0x50] sm:$0xff] }
 0x280   :  { %5228 = vmatprep.subr.bf16.mxu0 %v7338_v0  ;;  %5260 = vmatprep.subr.bf16.mxu1 %v7340_v58  ;;  %v1602_v12 = vld [vmem:[#allocation6 + $0x70] sm:$0xff] }
 0x281   :  { %1482 = vmatprep.mubr.f32.mxu0 %v9074_v61  ;;  %1553 = vmatprep.mubr.f32.mxu1 %v9074_v61 }
 0x283   :  { %5230 = vmatpush1.bf16.msra.mxu0 %v7346_v51  ;;  %5262 = vmatpush1.bf16.msra.mxu1 %v7348_v9 }
 0x284   :  { %5232 = vmatprep.subr.bf16.mxu0 %v7352_v34  ;;  %5264 = vmatprep.subr.bf16.mxu1 %v7354_v40 }
 0x287   :  { %5234 = vmatpush1.bf16.msra.mxu0 %v7360_v37  ;;  %5266 = vmatpush1.bf16.msra.mxu1 %v7362_v38 }
 0x288   :  { %5236 = vmatprep.subr.bf16.mxu0 %v7366_v59  ;;  %5268 = vmatprep.subr.bf16.mxu1 %v7368_v60 }
 0x28b   :  { %5238 = vmatpush1.bf16.msra.mxu0 %v7372_v42  ;;  %5270 = vmatpush1.bf16.msra.mxu1 %v7374_v48 }
 0x28c   :  { %5240 = vmatprep.subr.bf16.mxu0 %v7378_v13  ;;  %5272 = vmatprep.subr.bf16.mxu1 %v7380_v14 }
 0x28f   :  { %5242 = vmatpush1.bf16.msra.mxu0 %v7384_v63  ;;  %5274 = vmatpush1.bf16.msra.mxu1 %v7386_v57 }
 0x290   :  { %5244 = vmatprep.subr.bf16.mxu0 %v7390_v50  ;;  %5276 = vmatprep.subr.bf16.mxu1 %v7392_v3 }
 0x293   :  { %5246 = vmatpush1.bf16.msra.mxu0 %v7396_v4  ;;  %5278 = vmatpush1.bf16.msra.mxu1 %v7398_v7 }
 0x294   :  { %5248 = vmatprep.subr.bf16.mxu0 %v7402_v24  ;;  %5280 = vmatprep.subr.bf16.mxu1 %v7404_v8 }
 0x297   :  { %5250 = vmatpush1.bf16.msra.mxu0 %v7195_v21  ;;  %5282 = vmatpush1.bf16.msra.mxu1 %v7408_v31  ;;  %v7424_v21 = vpack.c.bf16 %v1593_v27, %v1589_v41  ;;  %v7438_v41 = vpack.c.bf16 %v1603_v62, %v1599_v32  ;;  %v7440_v27 = vpack.c.bf16 %v1600_v5, %v1596_v36  ;;  %v1604_v32 = vld [vmem:[#allocation6 + $0x80] sm:$0xff] }
 0x298   :  { %5252 = vmatprep.subr.bf16.mxu0 %v7199_v22  ;;  %5284 = vmatprep.subr.bf16.mxu1 %v7412_v56  ;;  %v7428_v22 = vpack.c.bf16 %v1592_v29, %v1588_v20  ;;  %v7443_v20 = vpack.c.bf16 %v1602_v12, %v1598_v28  ;;  %v1605_v29 = vld [vmem:[#allocation6 + $0x88] sm:$0xff]  ;;  %v1608_v62 = vld [vmem:[#allocation6 + $0xa0] sm:$0xff]  ;;  %v1606_v28 = vld [vmem:[#allocation6 + $0x90] sm:$0xff] }
 0x299   :  { %9139 = vst [vmem:[#allocation17_spill] sm:$0xff] %v7438_v41  ;;  %9140 = vst [vmem:[#allocation18_spill] sm:$0xff] %v7440_v27  ;;  %v7452_v5 = vpack.c.bf16 %v1608_v62, %v1604_v32  ;;  %v1610_v12 = vld [vmem:[#allocation6 + $0xb0] sm:$0xff]  ;;  %v1616_v32 = vld [vmem:[#allocation6 + $0xe0] sm:$0xff] }
 0x29a   :  { %9141 = vst [vmem:[#allocation19_spill] sm:$0xff] %v7443_v20  ;;  %v7455_v19 = vpack.c.bf16 %v1610_v12, %v1606_v28  ;;  %v1614_v28 = vld [vmem:[#allocation6 + $0xd0] sm:$0xff] }
 0x29b   :  { %5254 = vmatpush1.bf16.msra.mxu0 %v7203_v33  ;;  %5286 = vmatpush1.bf16.msra.mxu1 %v7416_v44  ;;  %v1594_v33 = vld [vmem:[#allocation6 + $0x30] sm:$0xff]  ;;  %9144 = vst [vmem:[#allocation22_spill] sm:$0xff] %v7452_v5 }
 0x29c   :  { %5288 = vmatprep.subr.bf16.mxu0 %v7424_v21  ;;  %v7431_v52 = vpack.c.bf16 %v1594_v33, %v1590_v45  ;;  %5352 = vmatprep.subr.bf16.mxu1 %v7426_v30  ;;  %v1609_v45 = vld [vmem:[#allocation6 + $0xa8] sm:$0xff]  ;;  %v1607_v33 = vld [vmem:[#allocation6 + $0x98] sm:$0xff]  ;;  %9145 = vst [vmem:[#allocation23_spill] sm:$0xff] %v7455_v19  ;;  %v1618_v12 = vld [vmem:[#allocation6 + $0xf0] sm:$0xff] }
 0x29e   :  { %1483 = vmatmul.mubr.f32.vlgmr.msra.gmra.mrb[6].mxu0 %v7336_v35  ;;  %1554 = vmatmul.mubr.f32.vlgmr.msra.gmra.mrb[10].mxu1 %v7336_v35  ;;  %9137 = vst [vmem:[#allocation15_spill] sm:$0xff] %v7431_v52  ;;  %v1597_v35 = vld [vmem:[#allocation6 + $0x48] sm:$0xff] }
 0x29f   :  { %5290 = vmatpush1.bf16.msra.mxu0 %v7428_v22  ;;  %5354 = vmatpush1.bf16.msra.mxu1 %v7431_v52  ;;  %v7436_v49 = vpack.c.bf16 %v1601_v25, %v1597_v35  ;;  %v7448_v35 = vpack.c.bf16 %v1609_v45, %v1605_v29  ;;  %v1611_v25 = vld [vmem:[#allocation6 + $0xb8] sm:$0xff]  ;;  %v1617_v29 = vld [vmem:[#allocation6 + $0xe8] sm:$0xff] }
 0x2a0   :  { %5356 = vmatprep.subr.bf16.mxu1 %v7438_v41  ;;  %v7450_v36 = vpack.c.bf16 %v1611_v25, %v1607_v33  ;;  %v1615_v45 = vld [vmem:[#allocation6 + $0xd8] sm:$0xff]  ;;  %v1612_v25 = vld [vmem:[#allocation6 + $0xc0] sm:$0xff] }
 0x2a1   :  { %9138 = vst [vmem:[#allocation16_spill] sm:$0xff] %v7436_v49  ;;  %5292 = vmatprep.subr.bf16.mxu0 %v7436_v49  ;;  %9142 = vst [vmem:[#allocation20_spill] sm:$0xff] %v7448_v35  ;;  %v1619_v33 = vld [vmem:[#allocation6 + $0xf8] sm:$0xff]  ;;  %v7464_v41 = vpack.c.bf16 %v1616_v32, %v1612_v25  ;;  %v1624_v25 = vld [vmem:[#allocation6 + $0x120] sm:$0xff] }
 0x2a2   :  { %9143 = vst [vmem:[#allocation21_spill] sm:$0xff] %v7450_v36  ;;  %v7462_v62 = vpack.c.bf16 %v1619_v33, %v1615_v45  ;;  %v1627_v45 = vld [vmem:[#allocation6 + $0x138] sm:$0xff]  ;;  %v1620_v33 = vld [vmem:[#allocation6 + $0x100] sm:$0xff] }
 0x2a3   :  { %5294 = vmatpush1.bf16.msra.mxu0 %v7440_v27  ;;  %5358 = vmatpush1.bf16.msra.mxu1 %v7443_v20  ;;  %v1613_v20 = vld [vmem:[#allocation6 + $0xc8] sm:$0xff]  ;;  %9148 = vst [vmem:[#allocation26_spill] sm:$0xff] %v7464_v41  ;;  %v1703_v49 = vld [vmem:[#allocation6 + $0x398] sm:$0xff] }
 0x2a4   :  { %5296 = vmatprep.subr.bf16.mxu0 %v7448_v35  ;;  %5360 = vmatprep.subr.bf16.mxu1 %v7450_v36  ;;  %v7460_v27 = vpack.c.bf16 %v1617_v29, %v1613_v20  ;;  %9147 = vst [vmem:[#allocation25_spill] sm:$0xff] %v7462_v62  ;;  %v7467_v36 = vpack.c.bf16 %v1618_v12, %v1614_v28  ;;  %v1625_v20 = vld [vmem:[#allocation6 + $0x128] sm:$0xff]  ;;  %v1623_v29 = vld [vmem:[#allocation6 + $0x118] sm:$0xff]  ;;  %v1622_v28 = vld [vmem:[#allocation6 + $0x110] sm:$0xff] }
 0x2a5   :  { %v7474_v32 = vpack.c.bf16 %v1627_v45, %v1623_v29  ;;  %v7476_v35 = vpack.c.bf16 %v1624_v25, %v1620_v33  ;;  %v1626_v12 = vld [vmem:[#allocation6 + $0x130] sm:$0xff]  ;;  %v1635_v29 = vld [vmem:[#allocation6 + $0x178] sm:$0xff]  ;;  %v1628_v45 = vld [vmem:[#allocation6 + $0x140] sm:$0xff] }
 0x2a6   :  { %9146 = vst [vmem:[#allocation24_spill] sm:$0xff] %v7460_v27  ;;  %9149 = vst [vmem:[#allocation27_spill] sm:$0xff] %v7467_v36  ;;  %v1632_v33 = vld [vmem:[#allocation6 + $0x160] sm:$0xff]  ;;  %v1707_v52 = vld [vmem:[#allocation6 + $0x3b8] sm:$0xff] }
 0x2a7   :  { %5298 = vmatpush1.bf16.msra.mxu0 %v7452_v5  ;;  %5362 = vmatpush1.bf16.msra.mxu1 %v7455_v19  ;;  %v1621_v19 = vld [vmem:[#allocation6 + $0x108] sm:$0xff]  ;;  %9151 = vst [vmem:[#allocation29_spill] sm:$0xff] %v7474_v32  ;;  %9152 = vst [vmem:[#allocation30_spill] sm:$0xff] %v7476_v35 }
 0x2a8   :  { %5300 = vmatprep.subr.bf16.mxu0 %v7460_v27  ;;  %5364 = vmatprep.subr.bf16.mxu1 %v7462_v62  ;;  %v7472_v5 = vpack.c.bf16 %v1625_v20, %v1621_v19  ;;  %v1633_v19 = vld [vmem:[#allocation6 + $0x168] sm:$0xff]  ;;  %v1631_v20 = vld [vmem:[#allocation6 + $0x158] sm:$0xff]  ;;  %v7488_v27 = vpack.c.bf16 %v1632_v33, %v1628_v45  ;;  %v1640_v45 = vld [vmem:[#allocation6 + $0x1a0] sm:$0xff] }
 0x2a9   :  { %v7486_v25 = vpack.c.bf16 %v1635_v29, %v1631_v20  ;;  %v1643_v20 = vld [vmem:[#allocation6 + $0x1b8] sm:$0xff]  ;;  %v1636_v29 = vld [vmem:[#allocation6 + $0x180] sm:$0xff] }
 0x2aa   :  { %9150 = vst [vmem:[#allocation28_spill] sm:$0xff] %v7472_v5  ;;  %9156 = vst [vmem:[#allocation34_spill] sm:$0xff] %v7488_v27 }
 0x2ab   :  { %5302 = vmatpush1.bf16.msra.mxu0 %v7464_v41  ;;  %5366 = vmatpush1.bf16.msra.mxu1 %v7467_v36  ;;  %v7481_v41 = vpack.c.bf16 %v1626_v12, %v1622_v28  ;;  %v1629_v36 = vld [vmem:[#allocation6 + $0x148] sm:$0xff]  ;;  %9155 = vst [vmem:[#allocation33_spill] sm:$0xff] %v7486_v25 }
 0x2ac   :  { %5304 = vmatprep.subr.bf16.mxu0 %v7472_v5  ;;  %5368 = vmatprep.subr.bf16.mxu1 %v7474_v32  ;;  %v7484_v62 = vpack.c.bf16 %v1633_v19, %v1629_v36  ;;  %v1630_v5 = vld [vmem:[#allocation6 + $0x150] sm:$0xff]  ;;  %v1637_v12 = vld [vmem:[#allocation6 + $0x188] sm:$0xff]  ;;  %v1639_v19 = vld [vmem:[#allocation6 + $0x198] sm:$0xff] }
 0x2ad   :  { %9153 = vst [vmem:[#allocation31_spill] sm:$0xff] %v7481_v41  ;;  %v1634_v32 = vld [vmem:[#allocation6 + $0x170] sm:$0xff]  ;;  %v1641_v36 = vld [vmem:[#allocation6 + $0x1a8] sm:$0xff]  ;;  %v7498_v33 = vpack.c.bf16 %v1643_v20, %v1639_v19  ;;  %v1651_v19 = vld [vmem:[#allocation6 + $0x1f8] sm:$0xff] }
 0x2ae   :  { %9154 = vst [vmem:[#allocation32_spill] sm:$0xff] %v7484_v62  ;;  %v7491_v28 = vpack.c.bf16 %v1634_v32, %v1630_v5  ;;  %v1638_v5 = vld [vmem:[#allocation6 + $0x190] sm:$0xff]  ;;  %v1644_v20 = vld [vmem:[#allocation6 + $0x1c0] sm:$0xff] }
 0x2af   :  { %5306 = vmatpush1.bf16.msra.mxu0 %v7476_v35  ;;  %5370 = vmatpush1.bf16.msra.mxu1 %v7481_v41  ;;  %v7496_v41 = vpack.c.bf16 %v1641_v36, %v1637_v12  ;;  %9159 = vst [vmem:[#allocation37_spill] sm:$0xff] %v7498_v33  ;;  %v7500_v35 = vpack.c.bf16 %v1640_v45, %v1636_v29  ;;  %v1642_v32 = vld [vmem:[#allocation6 + $0x1b0] sm:$0xff]  ;;  %v1649_v12 = vld [vmem:[#allocation6 + $0x1e8] sm:$0xff]  ;;  %v1647_v36 = vld [vmem:[#allocation6 + $0x1d8] sm:$0xff] }
 0x2b0   :  { %5308 = vmatprep.subr.bf16.mxu0 %v7484_v62  ;;  %9157 = vst [vmem:[#allocation35_spill] sm:$0xff] %v7491_v28  ;;  %5372 = vmatprep.subr.bf16.mxu1 %v7486_v25  ;;  %v7503_v25 = vpack.c.bf16 %v1642_v32, %v1638_v5  ;;  %v1648_v29 = vld [vmem:[#allocation6 + $0x1e0] sm:$0xff]  ;;  %v7510_v45 = vpack.c.bf16 %v1651_v19, %v1647_v36  ;;  %v1646_v5 = vld [vmem:[#allocation6 + $0x1d0] sm:$0xff]  ;;  %v1659_v36 = vld [vmem:[#allocation6 + $0x238] sm:$0xff] }
 0x2b1   :  { %9158 = vst [vmem:[#allocation36_spill] sm:$0xff] %v7496_v41  ;;  %9160 = vst [vmem:[#allocation38_spill] sm:$0xff] %v7500_v35  ;;  %v7512_v62 = vpack.c.bf16 %v1648_v29, %v1644_v20  ;;  %v1650_v32 = vld [vmem:[#allocation6 + $0x1f0] sm:$0xff]  ;;  %v1652_v19 = vld [vmem:[#allocation6 + $0x200] sm:$0xff] }
 0x2b2   :  { %9161 = vst [vmem:[#allocation39_spill] sm:$0xff] %v7503_v25  ;;  %9163 = vst [vmem:[#allocation41_spill] sm:$0xff] %v7510_v45  ;;  %v1656_v20 = vld [vmem:[#allocation6 + $0x220] sm:$0xff] }
 0x2b3   :  { %5310 = vmatpush1.bf16.msra.mxu0 %v7488_v27  ;;  %5374 = vmatpush1.bf16.msra.mxu1 %v7491_v28  ;;  %v1645_v28 = vld [vmem:[#allocation6 + $0x1c8] sm:$0xff]  ;;  %9164 = vst [vmem:[#allocation42_spill] sm:$0xff] %v7512_v62 }
 0x2b4   :  { %5312 = vmatprep.subr.bf16.mxu0 %v7496_v41  ;;  %5376 = vmatprep.subr.bf16.mxu1 %v7498_v33  ;;  %v7508_v27 = vpack.c.bf16 %v1649_v12, %v1645_v28  ;;  %v7515_v33 = vpack.c.bf16 %v1650_v32, %v1646_v5  ;;  %v1657_v28 = vld [vmem:[#allocation6 + $0x228] sm:$0xff]  ;;  %v1655_v12 = vld [vmem:[#allocation6 + $0x218] sm:$0xff]  ;;  %v7524_v41 = vpack.c.bf16 %v1656_v20, %v1652_v19  ;;  %v1654_v5 = vld [vmem:[#allocation6 + $0x210] sm:$0xff] }
 0x2b5   :  { %v7522_v29 = vpack.c.bf16 %v1659_v36, %v1655_v12  ;;  %v1658_v32 = vld [vmem:[#allocation6 + $0x230] sm:$0xff]  ;;  %v1667_v12 = vld [vmem:[#allocation6 + $0x278] sm:$0xff]  ;;  %v1660_v36 = vld [vmem:[#allocation6 + $0x240] sm:$0xff] }
 0x2b6   :  { %9162 = vst [vmem:[#allocation40_spill] sm:$0xff] %v7508_v27  ;;  %9165 = vst [vmem:[#allocation43_spill] sm:$0xff] %v7515_v33  ;;  %v1664_v19 = vld [vmem:[#allocation6 + $0x260] sm:$0xff] }
 0x2b7   :  { %5314 = vmatpush1.bf16.msra.mxu0 %v7500_v35  ;;  %5378 = vmatpush1.bf16.msra.mxu1 %v7503_v25  ;;  %v1653_v25 = vld [vmem:[#allocation6 + $0x208] sm:$0xff]  ;;  %9167 = vst [vmem:[#allocation45_spill] sm:$0xff] %v7522_v29  ;;  %9168 = vst [vmem:[#allocation46_spill] sm:$0xff] %v7524_v41 }
 0x2b8   :  { %5316 = vmatprep.subr.bf16.mxu0 %v7508_v27  ;;  %5380 = vmatprep.subr.bf16.mxu1 %v7510_v45  ;;  %v7520_v35 = vpack.c.bf16 %v1657_v28, %v1653_v25  ;;  %v7527_v45 = vpack.c.bf16 %v1658_v32, %v1654_v5  ;;  %v1665_v25 = vld [vmem:[#allocation6 + $0x268] sm:$0xff]  ;;  %v1663_v28 = vld [vmem:[#allocation6 + $0x258] sm:$0xff]  ;;  %v7536_v27 = vpack.c.bf16 %v1664_v19, %v1660_v36  ;;  %v1662_v5 = vld [vmem:[#allocation6 + $0x250] sm:$0xff] }
 0x2b9   :  { %v7534_v20 = vpack.c.bf16 %v1667_v12, %v1663_v28  ;;  %v1666_v32 = vld [vmem:[#allocation6 + $0x270] sm:$0xff]  ;;  %v1675_v28 = vld [vmem:[#allocation6 + $0x2b8] sm:$0xff]  ;;  %v1668_v12 = vld [vmem:[#allocation6 + $0x280] sm:$0xff] }
 0x2ba   :  { %9166 = vst [vmem:[#allocation44_spill] sm:$0xff] %v7520_v35  ;;  %9169 = vst [vmem:[#allocation47_spill] sm:$0xff] %v7527_v45  ;;  %v1672_v36 = vld [vmem:[#allocation6 + $0x2a0] sm:$0xff] }
 0x2bb   :  { %5318 = vmatpush1.bf16.msra.mxu0 %v7512_v62  ;;  %5382 = vmatpush1.bf16.msra.mxu1 %v7515_v33  ;;  %v1661_v33 = vld [vmem:[#allocation6 + $0x248] sm:$0xff]  ;;  %9171 = vst [vmem:[#allocation49_spill] sm:$0xff] %v7534_v20  ;;  %9172 = vst [vmem:[#allocation50_spill] sm:$0xff] %v7536_v27 }
 0x2bc   :  { %5320 = vmatprep.subr.bf16.mxu0 %v7520_v35  ;;  %5384 = vmatprep.subr.bf16.mxu1 %v7522_v29  ;;  %v7532_v62 = vpack.c.bf16 %v1665_v25, %v1661_v33  ;;  %v7539_v29 = vpack.c.bf16 %v1666_v32, %v1662_v5  ;;  %v1673_v33 = vld [vmem:[#allocation6 + $0x2a8] sm:$0xff]  ;;  %v1671_v25 = vld [vmem:[#allocation6 + $0x298] sm:$0xff]  ;;  %v7548_v35 = vpack.c.bf16 %v1672_v36, %v1668_v12  ;;  %v1670_v5 = vld [vmem:[#allocation6 + $0x290] sm:$0xff] }
 0x2bd   :  { %v7546_v19 = vpack.c.bf16 %v1675_v28, %v1671_v25  ;;  %v1674_v32 = vld [vmem:[#allocation6 + $0x2b0] sm:$0xff]  ;;  %v1683_v25 = vld [vmem:[#allocation6 + $0x2f8] sm:$0xff]  ;;  %v1676_v28 = vld [vmem:[#allocation6 + $0x2c0] sm:$0xff] }
 0x2be   :  { %9170 = vst [vmem:[#allocation48_spill] sm:$0xff] %v7532_v62  ;;  %9173 = vst [vmem:[#allocation51_spill] sm:$0xff] %v7539_v29  ;;  %v1680_v12 = vld [vmem:[#allocation6 + $0x2e0] sm:$0xff] }
 0x2bf   :  { %5322 = vmatpush1.bf16.msra.mxu0 %v7524_v41  ;;  %5386 = vmatpush1.bf16.msra.mxu1 %v7527_v45  ;;  %v1669_v45 = vld [vmem:[#allocation6 + $0x288] sm:$0xff]  ;;  %9175 = vst [vmem:[#allocation53_spill] sm:$0xff] %v7546_v19  ;;  %9176 = vst [vmem:[#allocation54_spill] sm:$0xff] %v7548_v35 }
 0x2c0   :  { %5324 = vmatprep.subr.bf16.mxu0 %v7532_v62  ;;  %5388 = vmatprep.subr.bf16.mxu1 %v7534_v20  ;;  %v7544_v41 = vpack.c.bf16 %v1673_v33, %v1669_v45  ;;  %v7551_v20 = vpack.c.bf16 %v1674_v32, %v1670_v5  ;;  %v1681_v45 = vld [vmem:[#allocation6 + $0x2e8] sm:$0xff]  ;;  %v1679_v33 = vld [vmem:[#allocation6 + $0x2d8] sm:$0xff]  ;;  %v7560_v62 = vpack.c.bf16 %v1680_v12, %v1676_v28  ;;  %v1678_v5 = vld [vmem:[#allocation6 + $0x2d0] sm:$0xff] }
 0x2c1   :  { %v7558_v36 = vpack.c.bf16 %v1683_v25, %v1679_v33  ;;  %v1682_v32 = vld [vmem:[#allocation6 + $0x2f0] sm:$0xff]  ;;  %v1691_v33 = vld [vmem:[#allocation6 + $0x338] sm:$0xff]  ;;  %v1684_v25 = vld [vmem:[#allocation6 + $0x300] sm:$0xff] }
 0x2c2   :  { %9174 = vst [vmem:[#allocation52_spill] sm:$0xff] %v7544_v41  ;;  %9177 = vst [vmem:[#allocation55_spill] sm:$0xff] %v7551_v20  ;;  %v1688_v28 = vld [vmem:[#allocation6 + $0x320] sm:$0xff] }
 0x2c3   :  { %5326 = vmatpush1.bf16.msra.mxu0 %v7536_v27  ;;  %5390 = vmatpush1.bf16.msra.mxu1 %v7539_v29  ;;  %v1677_v29 = vld [vmem:[#allocation6 + $0x2c8] sm:$0xff]  ;;  %9179 = vst [vmem:[#allocation57_spill] sm:$0xff] %v7558_v36  ;;  %9180 = vst [vmem:[#allocation59_spill] sm:$0xff] %v7560_v62 }
 0x2c4   :  { %5328 = vmatprep.subr.bf16.mxu0 %v7544_v41  ;;  %5392 = vmatprep.subr.bf16.mxu1 %v7546_v19  ;;  %v7556_v27 = vpack.c.bf16 %v1681_v45, %v1677_v29  ;;  %v7563_v19 = vpack.c.bf16 %v1682_v32, %v1678_v5  ;;  %v1689_v29 = vld [vmem:[#allocation6 + $0x328] sm:$0xff]  ;;  %v1687_v45 = vld [vmem:[#allocation6 + $0x318] sm:$0xff]  ;;  %v7572_v41 = vpack.c.bf16 %v1688_v28, %v1684_v25  ;;  %v1686_v5 = vld [vmem:[#allocation6 + $0x310] sm:$0xff] }
 0x2c5   :  { %v7570_v12 = vpack.c.bf16 %v1691_v33, %v1687_v45  ;;  %v1690_v32 = vld [vmem:[#allocation6 + $0x330] sm:$0xff]  ;;  %v1699_v45 = vld [vmem:[#allocation6 + $0x378] sm:$0xff]  ;;  %v1692_v33 = vld [vmem:[#allocation6 + $0x340] sm:$0xff] }
 0x2c6   :  { %9178 = vst [vmem:[#allocation56_spill] sm:$0xff] %v7556_v27  ;;  %9181 = vst [vmem:[#allocation58_spill] sm:$0xff] %v7563_v19  ;;  %v1696_v25 = vld [vmem:[#allocation6 + $0x360] sm:$0xff] }
 0x2c7   :  { %5330 = vmatpush1.bf16.msra.mxu0 %v7548_v35  ;;  %5394 = vmatpush1.bf16.msra.mxu1 %v7551_v20  ;;  %v1685_v20 = vld [vmem:[#allocation6 + $0x308] sm:$0xff]  ;;  %9183 = vst [vmem:[#allocation62_spill] sm:$0xff] %v7570_v12  ;;  %9184 = vst [vmem:[#allocation65_spill] sm:$0xff] %v7572_v41 }
 0x2c8   :  { %5332 = vmatprep.subr.bf16.mxu0 %v7556_v27  ;;  %5396 = vmatprep.subr.bf16.mxu1 %v7558_v36  ;;  %v7568_v35 = vpack.c.bf16 %v1689_v29, %v1685_v20  ;;  %v7575_v36 = vpack.c.bf16 %v1690_v32, %v1686_v5  ;;  %v1697_v20 = vld [vmem:[#allocation6 + $0x368] sm:$0xff]  ;;  %v1695_v29 = vld [vmem:[#allocation6 + $0x358] sm:$0xff]  ;;  %v7584_v27 = vpack.c.bf16 %v1696_v25, %v1692_v33  ;;  %v1694_v5 = vld [vmem:[#allocation6 + $0x350] sm:$0xff] }
 0x2c9   :  { %v7582_v28 = vpack.c.bf16 %v1699_v45, %v1695_v29  ;;  %v1698_v32 = vld [vmem:[#allocation6 + $0x370] sm:$0xff]  ;;  %v1700_v29 = vld [vmem:[#allocation6 + $0x380] sm:$0xff] }
 0x2ca   :  { %9182 = vst [vmem:[#allocation63_spill] sm:$0xff] %v7568_v35  ;;  %9185 = vst [vmem:[#allocation64_spill] sm:$0xff] %v7575_v36  ;;  %v1704_v45 = vld [vmem:[#allocation6 + $0x3a0] sm:$0xff]  ;;  %v1702_v33 = vld [vmem:[#allocation6 + $0x390] sm:$0xff] }
 0x2cb   :  { %5334 = vmatpush1.bf16.msra.mxu0 %v7560_v62  ;;  %5398 = vmatpush1.bf16.msra.mxu1 %v7563_v19  ;;  %v1693_v19 = vld [vmem:[#allocation6 + $0x348] sm:$0xff]  ;;  %9187 = vst [vmem:[#allocation67_spill] sm:$0xff] %v7582_v28  ;;  %9188 = vst [vmem:[#allocation68_spill] sm:$0xff] %v7584_v27  ;;  %v7596_v25 = vpack.c.bf16 %v1704_v45, %v1700_v29  ;;  %v1714_v29 = vld [vmem:[#allocation6 + $0x3f0] sm:$0xff] }
 0x2cc   :  { %5336 = vmatprep.subr.bf16.mxu0 %v7568_v35  ;;  %5400 = vmatprep.subr.bf16.mxu1 %v7570_v12  ;;  %v7580_v62 = vpack.c.bf16 %v1697_v20, %v1693_v19  ;;  %v1701_v35 = vld [vmem:[#allocation6 + $0x388] sm:$0xff]  ;;  %v7593_v20 = vpack.c.bf16 %v1707_v52, %v1703_v49  ;;  %v1711_v52 = vld [vmem:[#allocation6 + $0x3d8] sm:$0xff] }
 0x2cd   :  { %v1705_v12 = vld [vmem:[#allocation6 + $0x3a8] sm:$0xff]  ;;  %v1715_v49 = vld [vmem:[#allocation6 + $0x3f8] sm:$0xff] }
 0x2ce   :  { %9186 = vst [vmem:[#allocation66_spill] sm:$0xff] %v7580_v62  ;;  %v7591_v19 = vpack.c.bf16 %v1705_v12, %v1701_v35  ;;  %v1708_v12 = vld [vmem:[#allocation6 + $0x3c0] sm:$0xff] }
 0x2cf   :  { %5338 = vmatpush1.bf16.msra.mxu0 %v7572_v41  ;;  %5402 = vmatpush1.bf16.msra.mxu1 %v7575_v36  ;;  %v7587_v41 = vpack.c.bf16 %v1698_v32, %v1694_v5  ;;  %v1706_v5 = vld [vmem:[#allocation6 + $0x3b0] sm:$0xff]  ;;  %v1709_v32 = vld [vmem:[#allocation6 + $0x3c8] sm:$0xff]  ;;  %v1712_v36 = vld [vmem:[#allocation6 + $0x3e0] sm:$0xff] }
 0x2d0   :  { %5340 = vmatprep.subr.bf16.mxu0 %v7580_v62  ;;  %5404 = vmatprep.subr.bf16.mxu1 %v7582_v28  ;;  %v1713_v62 = vld [vmem:[#allocation6 + $0x3e8] sm:$0xff]  ;;  %v7600_v28 = vpack.c.bf16 %v1706_v5, %v1702_v33  ;;  %v7607_v45 = vpack.c.bf16 %v1712_v36, %v1708_v12 }
 0x2d1   :  { %9189 = vst [vmem:[#allocation69_spill] sm:$0xff] %v7587_v41  ;;  %v7602_v35 = vpack.c.bf16 %v1713_v62, %v1709_v32 }
 0x2d2   :  { %9192 = vst [vmem:[#allocation72_spill] sm:$0xff] %v7607_v45 }
 0x2d3   :  { %5342 = vmatpush1.bf16.msra.mxu0 %v7584_v27  ;;  %5406 = vmatpush1.bf16.msra.mxu1 %v7587_v41  ;;  %9190 = vst [vmem:[#allocation70_spill] sm:$0xff] %v7602_v35  ;;  %v7604_v27 = vpack.c.bf16 %v1715_v49, %v1711_v52  ;;  %v1710_v41 = vld [vmem:[#allocation6 + $0x3d0] sm:$0xff] }
 0x2d4   :  { %5344 = vmatprep.subr.bf16.mxu0 %v7591_v19  ;;  %5408 = vmatprep.subr.bf16.mxu1 %v7593_v20  ;;  %v7611_v33 = vpack.c.bf16 %v1714_v29, %v1710_v41 }
 0x2d5   :  { %9191 = vst [vmem:[#allocation71_spill] sm:$0xff] %v7604_v27 }
 0x2d6   :  { %9193 = vst [vmem:[#allocation73_spill] sm:$0xff] %v7611_v33 }
 0x2d7   :  { %5346 = vmatpush1.bf16.msra.mxu0 %v7596_v25  ;;  %5410 = vmatpush1.bf16.msra.mxu1 %v7600_v28 }
 0x2d8   :  { %5348 = vmatprep.subr.bf16.mxu0 %v7602_v35  ;;  %5412 = vmatprep.subr.bf16.mxu1 %v7604_v27 }
 0x2db   :  { %5350 = vmatpush1.bf16.msra.mxu0 %v7607_v45  ;;  %5414 = vmatpush1.bf16.msra.mxu1 %v7611_v33 }
 0x2dc   :  { %5416 = vmatprep.subr.bf16.mxu0 %v7273_v10  ;;  %5448 = vmatprep.subr.bf16.mxu1 %v7275_v16 }
 0x351   :  { %v1248_v62 = vpop.f32.mrb[4].mxu0  ;;  %v1319_v5 = vpop.f32.mrb[8].mxu1 }
 0x352   :  { %v1249_v36 = vadd.f32 %v1248_v62, %v7295_v2  ;;  %v1250_v32 = vpop.f32.mrb[5].mxu0  ;;  %v1321_v52 = vpop.f32.mrb[9].mxu1  ;;  %v1320_v33 = vadd.f32 %v1319_v5, %v7307_v53 }
 0x353   :  { %v1251_v49 = vadd.f32 %v1250_v32, %v7298_v11  ;;  %v1322_v29 = vadd.f32 %v1321_v52, %v7303_v46  ;;  %v88_v62 = vpop.permute.xlu1 %87 }
 0x354   :  { %v4729_v41 = vmul.f32 -1.442695, %v1249_v36  ;;  %v144_v32 = vmul.f32 %v9129_v18, %v88_v62 }
 0x355   :  { %v4730_v12 = vmul.f32 -1.442695, %v1251_v49  ;;  %v4731_v45 = vmul.f32 -1.442695, %v1322_v29  ;;  %v145_v49 = vmul.f32 %v9130_v55, %v88_v62 }
 0x356   :  { %6463 = vpow2.f32 %v4729_v41  ;;  %v198_v5 = vadd.f32 %v9131_v26, %v144_v32 }
 0x357   :  { %6465 = vpow2.f32 %v4730_v12 }
 0x358   :  { %6467 = vpow2.f32 %v4731_v45  ;;  %v199_v45 = vadd.f32 %v9132_v6, %v145_v49 }
 0x359   :  { %6469 = vtanh.f32 %v1320_v33 }
 0x360   :  { %v6464_v10 = vpop.eup %6463 }
 0x361   :  { %v6466_v27 = vpop.eup %6465  ;;  %v1327_v16 = vadd.f32 1.0, %v6464_v10 }
 0x362   :  { %v1333_v35 = vadd.f32 1.0, %v6466_v27  ;;  %v6468_v36 = vpop.eup %6467 }
 0x363   :  { %6471 = vrcp.f32 %v1327_v16  ;;  %v6470_v41 = vpop.eup %6469  ;;  %v1340_v46 = vadd.f32 1.0, %v6468_v36 }
 0x364   :  { %6473 = vrcp.f32 %v1333_v35  ;;  %v147_v35 = vmul.f32 %v9133_v23, %v88_v62 }
 0x365   :  { %6475 = vrcp.f32 %v1340_v46 }
 0x366   :  { %v201_v32 = vadd.f32 %v7161_v47, %v147_v35 }
 0x36d   :  { %v6472_v12 = vpop.eup %6471 }
 0x36e   :  { %v6474_v52 = vpop.eup %6473  ;;  %v1344_v29 = vmul.f32 %v6472_v12, %v6470_v41 }
 0x36f   :  { %v1343_v10 = vmul.f32 %v6474_v52, %v7317_v54  ;;  %v146_v54 = vmul.f32 %v9134_v15, %v88_v62  ;;  %v6476_v52 = vpop.eup %6475 }
 0x371   :  { %v1484_v27 = vpop.f32.mrb[6].mxu0  ;;  %v1555_v33 = vpop.f32.mrb[10].mxu1  ;;  %v7628_v16 = vadd.f32 %v1344_v29, %v1343_v10  ;;  %v200_v12 = vadd.f32 %v9135_v39, %v146_v54 }
 0x372   :  { %v1560_v18 = vadd.f32 %v1484_v27, %v198_v5  ;;  %v1486_v55 = vpop.f32.mrb[7].mxu0  ;;  %v1557_v53 = vpop.f32.mrb[11].mxu1 }
 0x373   :  { %v1561_v11 = vadd.f32 %v1486_v55, %v199_v45  ;;  %6477 = vtanh.f32 %v7628_v16  ;;  %v1563_v49 = vadd.f32 %v1557_v53, %v201_v32  ;;  %v1562_v5 = vadd.f32 %v1555_v33, %v200_v12 }
 0x374   :  { %v4732_v36 = vmul.f32 -1.442695, %v1560_v18 }
 0x375   :  { %v4733_v41 = vmul.f32 -1.442695, %v1561_v11  ;;  %v4734_v46 = vmul.f32 -1.442695, %v1563_v49 }
 0x376   :  { %6479 = vpow2.f32 %v4732_v36 }
 0x377   :  { %6481 = vpow2.f32 %v4733_v41 }
 0x378   :  { %6483 = vpow2.f32 %v4734_v46  ;;  %v9219_v46 = vld [vmem:[#allocation39_spill] sm:$0xff] }
 0x379   :  { %6485 = vtanh.f32 %v1562_v5  ;;  %v9220_v5 = vld [vmem:[#allocation40_spill] sm:$0xff] }
 0x37d   :  { %v6478_v29 = vpop.eup %6477 }
 0x37e   :  { %v7634_v10 = vmul.f32 %v6478_v29, %v6476_v52  ;;  %v9217_v52 = vld [vmem:[#allocation37_spill] sm:$0xff]  ;;  %v9218_v29 = vld [vmem:[#allocation38_spill] sm:$0xff] }
 0x380   :  { %9194 = vst [vmem:[#allocation74_spill] sm:$0xff] %v7634_v10  ;;  %v6480_v55 = vpop.eup %6479  ;;  %1780 = vmatprep.mubr.f32.mxu0 %v7634_v10  ;;  %1851 = vmatprep.mubr.f32.mxu1 %v7634_v10 }
 0x381   :  { %v6482_v11 = vpop.eup %6481  ;;  %v1567_v18 = vadd.f32 1.0, %v6480_v55  ;;  %v9221_v55 = vld [vmem:[#allocation41_spill] sm:$0xff] }
 0x382   :  { %v1573_v62 = vadd.f32 1.0, %v6482_v11  ;;  %v6484_v53 = vpop.eup %6483  ;;  %v9222_v11 = vld [vmem:[#allocation42_spill] sm:$0xff] }
 0x383   :  { %6487 = vrcp.f32 %v1567_v18  ;;  %v6486_v45 = vpop.eup %6485  ;;  %v1580_v33 = vadd.f32 1.0, %v6484_v53  ;;  %v9223_v18 = vld [vmem:[#allocation43_spill] sm:$0xff]  ;;  %v9225_v53 = vld [vmem:[#allocation45_spill] sm:$0xff] }
 0x384   :  { %6489 = vrcp.f32 %v1573_v62  ;;  %v9224_v62 = vld [vmem:[#allocation44_spill] sm:$0xff] }
 0x385   :  { %6491 = vrcp.f32 %v1580_v33  ;;  %v9230_v33 = vld [vmem:[#allocation50_spill] sm:$0xff] }
 0x38d   :  { %v6488_v27 = vpop.eup %6487 }
 0x38e   :  { %v6490_v35 = vpop.eup %6489  ;;  %v1584_v36 = vmul.f32 %v6488_v27, %v6486_v45  ;;  %v9226_v45 = vld [vmem:[#allocation46_spill] sm:$0xff]  ;;  %v9227_v27 = vld [vmem:[#allocation47_spill] sm:$0xff] }
 0x38f   :  { %v1583_v41 = vmul.f32 %v6490_v35, %v7329_v17  ;;  %v6492_v54 = vpop.eup %6491  ;;  %v1936_v17 = vld [vmem:[#allocation4 + $0x180] sm:$0xff]  ;;  %v9228_v35 = vld [vmem:[#allocation48_spill] sm:$0xff] }
 0x391   :  { %v7639_v32 = vadd.f32 %v1584_v36, %v1583_v41  ;;  %v9229_v36 = vld [vmem:[#allocation49_spill] sm:$0xff]  ;;  %v9231_v41 = vld [vmem:[#allocation51_spill] sm:$0xff] }
 0x393   :  { %6493 = vtanh.f32 %v7639_v32 }
 0x39d   :  { %v6494_v49 = vpop.eup %6493 }
 0x39e   :  { %v1587_v12 = vmul.f32 %v6494_v49, %v6492_v54  ;;  %v9232_v54 = vld [vmem:[#allocation52_spill] sm:$0xff]  ;;  %v9233_v49 = vld [vmem:[#allocation53_spill] sm:$0xff] }
 0x3a0   :  { %1781 = vmatmul.mubr.f32.vlgmr.msra.gmra.mrb[8].mxu0 %v1587_v12  ;;  %1852 = vmatmul.mubr.f32.vlgmr.msra.gmra.mrb[12].mxu1 %v1587_v12 }
 0x3a1   :  { %5418 = vmatpush1.bf16.msra.mxu0 %v7332_v1  ;;  %5450 = vmatpush1.bf16.msra.mxu1 %v7334_v43  ;;  %v1940_v1 = vld [vmem:[#allocation4 + $0x1a0] sm:$0xff]  ;;  %v1945_v43 = vld [vmem:[#allocation4 + $0x1c8] sm:$0xff] }
 0x3a2   :  { %5420 = vmatprep.subr.bf16.mxu0 %v7338_v0  ;;  %5452 = vmatprep.subr.bf16.mxu1 %v7340_v58  ;;  %v1949_v0 = vld [vmem:[#allocation4 + $0x1e8] sm:$0xff]  ;;  %v7666_v58 = vpack.c.bf16 %v1940_v1, %v1936_v17  ;;  %v9236_v1 = vld [vmem:[#allocation56_spill] sm:$0xff] }
 0x3a3   :  { %2016 = vmatprep.mubr.f32.mxu0 %v9074_v61  ;;  %2087 = vmatprep.mubr.f32.mxu1 %v9074_v61  ;;  %v9235_v17 = vld [vmem:[#allocation55_spill] sm:$0xff] }
 0x3a5   :  { %5422 = vmatpush1.bf16.msra.mxu0 %v7346_v51  ;;  %5454 = vmatpush1.bf16.msra.mxu1 %v7348_v9  ;;  %v7670_v51 = vpack.c.bf16 %v1949_v0, %v1945_v43  ;;  %v1944_v9 = vld [vmem:[#allocation4 + $0x1c0] sm:$0xff]  ;;  %v9237_v43 = vld [vmem:[#allocation57_spill] sm:$0xff]  ;;  %v9238_v0 = vld [vmem:[#allocation59_spill] sm:$0xff] }
 0x3a6   :  { %5424 = vmatprep.subr.bf16.mxu0 %v7352_v34  ;;  %5456 = vmatprep.subr.bf16.mxu1 %v7354_v40  ;;  %v1948_v34 = vld [vmem:[#allocation4 + $0x1e0] sm:$0xff] }
 0x3a7   :  { %v7674_v40 = vpack.c.bf16 %v1948_v34, %v1944_v9  ;;  %v9239_v9 = vld [vmem:[#allocation58_spill] sm:$0xff]  ;;  %v9240_v34 = vld [vmem:[#allocation63_spill] sm:$0xff] }
 0x3a9   :  { %5426 = vmatpush1.bf16.msra.mxu0 %v7360_v37  ;;  %5458 = vmatpush1.bf16.msra.mxu1 %v7362_v38  ;;  %v9195_v37 = vld [vmem:[#allocation15_spill] sm:$0xff]  ;;  %v9196_v38 = vld [vmem:[#allocation16_spill] sm:$0xff] }
 0x3aa   :  { %5428 = vmatprep.subr.bf16.mxu0 %v7366_v59  ;;  %5460 = vmatprep.subr.bf16.mxu1 %v7368_v60  ;;  %v9197_v59 = vld [vmem:[#allocation17_spill] sm:$0xff]  ;;  %v9198_v60 = vld [vmem:[#allocation18_spill] sm:$0xff] }
 0x3ad   :  { %5430 = vmatpush1.bf16.msra.mxu0 %v7372_v42  ;;  %5462 = vmatpush1.bf16.msra.mxu1 %v7374_v48  ;;  %v9199_v42 = vld [vmem:[#allocation19_spill] sm:$0xff]  ;;  %v9200_v48 = vld [vmem:[#allocation20_spill] sm:$0xff] }
 0x3ae   :  { %5432 = vmatprep.subr.bf16.mxu0 %v7378_v13  ;;  %5464 = vmatprep.subr.bf16.mxu1 %v7380_v14  ;;  %v9201_v13 = vld [vmem:[#allocation21_spill] sm:$0xff]  ;;  %v9202_v14 = vld [vmem:[#allocation22_spill] sm:$0xff] }
 0x3b1   :  { %5434 = vmatpush1.bf16.msra.mxu0 %v7384_v63  ;;  %5466 = vmatpush1.bf16.msra.mxu1 %v7386_v57  ;;  %v9203_v63 = vld [vmem:[#allocation23_spill] sm:$0xff]  ;;  %v9204_v57 = vld [vmem:[#allocation24_spill] sm:$0xff] }
 0x3b2   :  { %5436 = vmatprep.subr.bf16.mxu0 %v7390_v50  ;;  %5468 = vmatprep.subr.bf16.mxu1 %v7392_v3  ;;  %v9205_v50 = vld [vmem:[#allocation25_spill] sm:$0xff]  ;;  %v9206_v3 = vld [vmem:[#allocation26_spill] sm:$0xff] }
 0x3b5   :  { %5438 = vmatpush1.bf16.msra.mxu0 %v7396_v4  ;;  %5470 = vmatpush1.bf16.msra.mxu1 %v7398_v7  ;;  %v9207_v4 = vld [vmem:[#allocation27_spill] sm:$0xff]  ;;  %v9208_v7 = vld [vmem:[#allocation28_spill] sm:$0xff] }
 0x3b6   :  { %5440 = vmatprep.subr.bf16.mxu0 %v7402_v24  ;;  %5472 = vmatprep.subr.bf16.mxu1 %v7404_v8  ;;  %v9209_v24 = vld [vmem:[#allocation29_spill] sm:$0xff]  ;;  %v9210_v8 = vld [vmem:[#allocation30_spill] sm:$0xff] }
 0x3b9   :  { %5442 = vmatpush1.bf16.msra.mxu0 %v7666_v58  ;;  %5474 = vmatpush1.bf16.msra.mxu1 %v7408_v31  ;;  %v9211_v31 = vld [vmem:[#allocation31_spill] sm:$0xff] }
 0x3ba   :  { %5444 = vmatprep.subr.bf16.mxu0 %v7670_v51  ;;  %5476 = vmatprep.subr.bf16.mxu1 %v7412_v56  ;;  %v9212_v56 = vld [vmem:[#allocation32_spill] sm:$0xff] }
 0x3bd   :  { %5446 = vmatpush1.bf16.msra.mxu0 %v7674_v40  ;;  %5478 = vmatpush1.bf16.msra.mxu1 %v7416_v44  ;;  %v9213_v44 = vld [vmem:[#allocation33_spill] sm:$0xff] }
 0x3be   :  { %5480 = vmatprep.subr.bf16.mxu0 %v7424_v21  ;;  %5544 = vmatprep.subr.bf16.mxu1 %v7426_v30  ;;  %v9214_v21 = vld [vmem:[#allocation34_spill] sm:$0xff]  ;;  %v9215_v30 = vld [vmem:[#allocation35_spill] sm:$0xff] }
 0x3c0   :  { %2017 = vmatmul.mubr.f32.vlgmr.msra.gmra.mrb[10].mxu0 %v1587_v12  ;;  %2088 = vmatmul.mubr.f32.vlgmr.msra.gmra.mrb[14].mxu1 %v1587_v12  ;;  %v9234_v12 = vld [vmem:[#allocation54_spill] sm:$0xff] }
 0x3c1   :  { %5482 = vmatpush1.bf16.msra.mxu0 %v7428_v22  ;;  %5546 = vmatpush1.bf16.msra.mxu1 %v9195_v37  ;;  %v9216_v22 = vld [vmem:[#allocation36_spill] sm:$0xff]  ;;  %v9241_v37 = vld [vmem:[#allocation62_spill] sm:$0xff] }
 0x3c2   :  { %5484 = vmatprep.subr.bf16.mxu0 %v9196_v38  ;;  %5548 = vmatprep.subr.bf16.mxu1 %v9197_v59  ;;  %v9242_v38 = vld [vmem:[#allocation65_spill] sm:$0xff]  ;;  %v9243_v59 = vld [vmem:[#allocation64_spill] sm:$0xff] }
 0x3c5   :  { %5486 = vmatpush1.bf16.msra.mxu0 %v9198_v60  ;;  %5550 = vmatpush1.bf16.msra.mxu1 %v9199_v42  ;;  %v9244_v60 = vld [vmem:[#allocation66_spill] sm:$0xff]  ;;  %v9245_v42 = vld [vmem:[#allocation67_spill] sm:$0xff] }
 0x3c6   :  { %5488 = vmatprep.subr.bf16.mxu0 %v9200_v48  ;;  %5552 = vmatprep.subr.bf16.mxu1 %v9201_v13  ;;  %v9246_v48 = vld [vmem:[#allocation68_spill] sm:$0xff]  ;;  %v9247_v13 = vld [vmem:[#allocation69_spill] sm:$0xff] }
 0x3c9   :  { %5490 = vmatpush1.bf16.msra.mxu0 %v9202_v14  ;;  %5554 = vmatpush1.bf16.msra.mxu1 %v9203_v63  ;;  %v9248_v14 = vld [vmem:[#allocation70_spill] sm:$0xff]  ;;  %v9249_v63 = vld [vmem:[#allocation71_spill] sm:$0xff] }
 0x3ca   :  { %5492 = vmatprep.subr.bf16.mxu0 %v9204_v57  ;;  %5556 = vmatprep.subr.bf16.mxu1 %v9205_v50  ;;  %v9250_v57 = vld [vmem:[#allocation72_spill] sm:$0xff]  ;;  %v9251_v50 = vld [vmem:[#allocation73_spill] sm:$0xff] }
 0x3cd   :  { %5494 = vmatpush1.bf16.msra.mxu0 %v9206_v3  ;;  %5558 = vmatpush1.bf16.msra.mxu1 %v9207_v4  ;;  %v2423_v3 = vld [vmem:[#allocation4 + $0x8] sm:$0xff] }
 0x3ce   :  { %5496 = vmatprep.subr.bf16.mxu0 %v9208_v7  ;;  %5560 = vmatprep.subr.bf16.mxu1 %v9209_v24  ;;  %v2427_v4 = vld [vmem:[#allocation4 + $0x28] sm:$0xff]  ;;  %v2425_v7 = vld [vmem:[#allocation4 + $0x18] sm:$0xff] }
 0x3cf   :  { %v7744_v24 = vpack.c.bf16 %v2427_v4, %v2423_v3 }
 0x3d1   :  { %5498 = vmatpush1.bf16.msra.mxu0 %v9210_v8  ;;  %5562 = vmatpush1.bf16.msra.mxu1 %v9211_v31 }
 0x3d2   :  { %5500 = vmatprep.subr.bf16.mxu0 %v9212_v56  ;;  %5564 = vmatprep.subr.bf16.mxu1 %v9213_v44  ;;  %v9252_v44 = vld [vmem:[#allocation11_spill] sm:$0xff] }
 0x3d5   :  { %5502 = vmatpush1.bf16.msra.mxu0 %v9214_v21  ;;  %5566 = vmatpush1.bf16.msra.mxu1 %v9215_v30 }
 0x3d6   :  { %5504 = vmatprep.subr.bf16.mxu0 %v9216_v22  ;;  %5568 = vmatprep.subr.bf16.mxu1 %v9217_v52  ;;  %v9253_v52 = vld [vmem:[#allocation12_spill] sm:$0xff] }
 0x3d9   :  { %5506 = vmatpush1.bf16.msra.mxu0 %v9218_v29  ;;  %5570 = vmatpush1.bf16.msra.mxu1 %v9219_v46 }
 0x3da   :  { %5508 = vmatprep.subr.bf16.mxu0 %v9220_v5  ;;  %5572 = vmatprep.subr.bf16.mxu1 %v9221_v55  ;;  %v9254_v5 = vld [vmem:[#allocation13_spill] sm:$0xff] }
 0x3dd   :  { %5510 = vmatpush1.bf16.msra.mxu0 %v9222_v11  ;;  %5574 = vmatpush1.bf16.msra.mxu1 %v9223_v18 }
 0x3de   :  { %5512 = vmatprep.subr.bf16.mxu0 %v9224_v62  ;;  %5576 = vmatprep.subr.bf16.mxu1 %v9225_v53 }
 0x3e1   :  { %5514 = vmatpush1.bf16.msra.mxu0 %v9226_v45  ;;  %5578 = vmatpush1.bf16.msra.mxu1 %v9227_v27  ;;  %v93_v27 = vpop.permute.xlu1 %92 }
 0x3e2   :  { %5516 = vmatprep.subr.bf16.mxu0 %v9228_v35  ;;  %5580 = vmatprep.subr.bf16.mxu1 %v9229_v36  ;;  %v9255_v36 = vld [vmem:[#allocation61_spill] sm:$0xff] }
 0x3e5   :  { %5518 = vmatpush1.bf16.msra.mxu0 %v9230_v33  ;;  %5582 = vmatpush1.bf16.msra.mxu1 %v9231_v41  ;;  %v148_v33 = vmul.f32 %v9255_v36, %v93_v27 }
 0x3e6   :  { %5520 = vmatprep.subr.bf16.mxu0 %v9232_v54  ;;  %5584 = vmatprep.subr.bf16.mxu1 %v9233_v49  ;;  %v9256_v54 = vld [vmem:[#allocation60_spill] sm:$0xff] }
 0x3e7   :  { %v149_v49 = vmul.f32 %v9256_v54, %v93_v27 }
 0x3e9   :  { %5522 = vmatpush1.bf16.msra.mxu0 %v9234_v12  ;;  %5586 = vmatpush1.bf16.msra.mxu1 %v9235_v17 }
 0x3ea   :  { %5524 = vmatprep.subr.bf16.mxu0 %v9236_v1  ;;  %5588 = vmatprep.subr.bf16.mxu1 %v9237_v43 }
 0x3ed   :  { %5526 = vmatpush1.bf16.msra.mxu0 %v9238_v0  ;;  %5590 = vmatpush1.bf16.msra.mxu1 %v9239_v9  ;;  %v202_v0 = vadd.f32 %v9131_v26, %v148_v33  ;;  %v2431_v33 = vld [vmem:[#allocation4 + $0x48] sm:$0xff] }
 0x3ee   :  { %5528 = vmatprep.subr.bf16.mxu0 %v9240_v34  ;;  %5592 = vmatprep.subr.bf16.mxu1 %v9241_v37  ;;  %v203_v37 = vadd.f32 %v9132_v6, %v149_v49  ;;  %v2433_v49 = vld [vmem:[#allocation4 + $0x58] sm:$0xff] }
 0x3f1   :  { %5530 = vmatpush1.bf16.msra.mxu0 %v9242_v38  ;;  %5594 = vmatpush1.bf16.msra.mxu1 %v9243_v59 }
 0x3f2   :  { %5532 = vmatprep.subr.bf16.mxu0 %v9244_v60  ;;  %5596 = vmatprep.subr.bf16.mxu1 %v9245_v42 }
 0x3f5   :  { %5534 = vmatpush1.bf16.msra.mxu0 %v9246_v48  ;;  %5598 = vmatpush1.bf16.msra.mxu1 %v9247_v13  ;;  %v151_v13 = vmul.f32 %v9133_v23, %v93_v27 }
 0x3f6   :  { %5536 = vmatprep.subr.bf16.mxu0 %v7591_v19  ;;  %5600 = vmatprep.subr.bf16.mxu1 %v7593_v20  ;;  %v2429_v19 = vld [vmem:[#allocation4 + $0x38] sm:$0xff] }
 0x3f7   :  { %v7746_v8 = vpack.c.bf16 %v2429_v19, %v2425_v7 }
 0x3f9   :  { %5538 = vmatpush1.bf16.msra.mxu0 %v7596_v25  ;;  %5602 = vmatpush1.bf16.msra.mxu1 %v7600_v28 }
 0x3fa   :  { %5540 = vmatprep.subr.bf16.mxu0 %v9248_v14  ;;  %5604 = vmatprep.subr.bf16.mxu1 %v9249_v63 }
 0x3fd   :  { %5542 = vmatpush1.bf16.msra.mxu0 %v9250_v57  ;;  %5606 = vmatpush1.bf16.msra.mxu1 %v9251_v50  ;;  %v150_v57 = vmul.f32 %v9134_v15, %v93_v27  ;;  %v2424_v27 = vld [vmem:[#allocation4 + $0x10] sm:$0xff] }
 0x3fe   :  { %5608 = vmatprep.subr.bf16.mxu0 %v7744_v24  ;;  %5640 = vmatprep.subr.bf16.mxu1 %v7746_v8 }
 0x3ff   :  { %v204_v4 = vadd.f32 %v9135_v39, %v150_v57 }
 0x473   :  { %v1782_v28 = vpop.f32.mrb[8].mxu0  ;;  %v1853_v20 = vpop.f32.mrb[12].mxu1 }
 0x474   :  { %v1783_v25 = vadd.f32 %v1782_v28, %v7295_v2  ;;  %v1784_v31 = vpop.f32.mrb[9].mxu0  ;;  %v1855_v56 = vpop.f32.mrb[13].mxu1  ;;  %v1854_v55 = vadd.f32 %v1853_v20, %v9254_v5 }
 0x475   :  { %v1785_v21 = vadd.f32 %v1784_v31, %v9252_v44  ;;  %v1856_v29 = vadd.f32 %v1855_v56, %v9253_v52 }
 0x476   :  { %v4735_v30 = vmul.f32 -1.442695, %v1783_v25 }
 0x477   :  { %v4736_v22 = vmul.f32 -1.442695, %v1785_v21  ;;  %v4737_v46 = vmul.f32 -1.442695, %v1856_v29 }
 0x478   :  { %6495 = vpow2.f32 %v4735_v30 }
 0x479   :  { %6497 = vpow2.f32 %v4736_v22 }
 0x47a   :  { %6499 = vpow2.f32 %v4737_v46 }
 0x47b   :  { %6501 = vtanh.f32 %v1854_v55 }
 0x482   :  { %v6496_v11 = vpop.eup %6495 }
 0x483   :  { %v6498_v18 = vpop.eup %6497  ;;  %v1861_v62 = vadd.f32 1.0, %v6496_v11 }
 0x484   :  { %v1867_v53 = vadd.f32 1.0, %v6498_v18  ;;  %v6500_v45 = vpop.eup %6499 }
 0x485   :  { %6503 = vrcp.f32 %v1861_v62  ;;  %v6502_v35 = vpop.eup %6501  ;;  %v1874_v1 = vadd.f32 1.0, %v6500_v45  ;;  %v2426_v45 = vld [vmem:[#allocation4 + $0x20] sm:$0xff] }
 0x486   :  { %6505 = vrcp.f32 %v1867_v53  ;;  %v2422_v53 = vld [vmem:[#allocation4] sm:$0xff] }
 0x487   :  { %6507 = vrcp.f32 %v1874_v1 }
 0x48f   :  { %v6504_v41 = vpop.eup %6503 }
 0x490   :  { %v6506_v12 = vpop.eup %6505  ;;  %v1878_v17 = vmul.f32 %v6504_v41, %v6502_v35  ;;  %v2428_v35 = vld [vmem:[#allocation4 + $0x30] sm:$0xff]  ;;  %v2435_v41 = vld [vmem:[#allocation4 + $0x68] sm:$0xff] }
 0x491   :  { %v1877_v43 = vmul.f32 %v6506_v12, %v7628_v16  ;;  %v205_v16 = vadd.f32 %v7161_v47, %v151_v13  ;;  %v6508_v3 = vpop.eup %6507  ;;  %v2437_v12 = vld [vmem:[#allocation4 + $0x78] sm:$0xff]  ;;  %v2443_v13 = vld [vmem:[#allocation4 + $0xa8] sm:$0xff] }
 0x493   :  { %v2018_v9 = vpop.f32.mrb[10].mxu0  ;;  %v2089_v34 = vpop.f32.mrb[14].mxu1  ;;  %v7759_v38 = vadd.f32 %v1878_v17, %v1877_v43  ;;  %v7774_v43 = vpack.c.bf16 %v2426_v45, %v2422_v53  ;;  %v2452_v53 = vld [vmem:[#allocation4 + $0xf0] sm:$0xff]  ;;  %v2455_v45 = vld [vmem:[#allocation4 + $0x108] sm:$0xff] }
 0x494   :  { %v2094_v59 = vadd.f32 %v2018_v9, %v202_v0  ;;  %v2020_v60 = vpop.f32.mrb[11].mxu0  ;;  %v2091_v42 = vpop.f32.mrb[15].mxu1  ;;  %v2096_v28 = vadd.f32 %v2089_v34, %v204_v4  ;;  %v7776_v0 = vpack.c.bf16 %v2428_v35, %v2424_v27  ;;  %v2434_v9 = vld [vmem:[#allocation4 + $0x60] sm:$0xff]  ;;  %v2459_v27 = vld [vmem:[#allocation4 + $0x128] sm:$0xff]  ;;  %v2457_v35 = vld [vmem:[#allocation4 + $0x118] sm:$0xff] }
 0x495   :  { %v2095_v48 = vadd.f32 %v2020_v60, %v203_v37  ;;  %6509 = vtanh.f32 %v7759_v38  ;;  %v2097_v50 = vadd.f32 %v2091_v42, %v205_v16  ;;  %v7780_v37 = vpack.c.bf16 %v2435_v41, %v2431_v33  ;;  %v2432_v60 = vld [vmem:[#allocation4 + $0x50] sm:$0xff]  ;;  %v2461_v33 = vld [vmem:[#allocation4 + $0x138] sm:$0xff] }
 0x496   :  { %v4738_v14 = vmul.f32 -1.442695, %v2094_v59  ;;  %v7782_v59 = vpack.c.bf16 %v2437_v12, %v2433_v49  ;;  %v2436_v42 = vld [vmem:[#allocation4 + $0x70] sm:$0xff]  ;;  %v2454_v12 = vld [vmem:[#allocation4 + $0x100] sm:$0xff] }
 0x497   :  { %v4739_v63 = vmul.f32 -1.442695, %v2095_v48  ;;  %v4740_v19 = vmul.f32 -1.442695, %v2097_v50  ;;  %v2439_v48 = vld [vmem:[#allocation4 + $0x88] sm:$0xff]  ;;  %v7790_v57 = vpack.c.bf16 %v2436_v42, %v2432_v60  ;;  %v2438_v50 = vld [vmem:[#allocation4 + $0x80] sm:$0xff] }
 0x498   :  { %6511 = vpow2.f32 %v4738_v14  ;;  %v2441_v14 = vld [vmem:[#allocation4 + $0x98] sm:$0xff]  ;;  %v7794_v4 = vpack.c.bf16 %v2443_v13, %v2439_v48  ;;  %v2460_v60 = vld [vmem:[#allocation4 + $0x130] sm:$0xff]  ;;  %v2463_v42 = vld [vmem:[#allocation4 + $0x148] sm:$0xff] }
 0x499   :  { %6513 = vpow2.f32 %v4739_v63  ;;  %v2445_v63 = vld [vmem:[#allocation4 + $0xb8] sm:$0xff]  ;;  %v2467_v48 = vld [vmem:[#allocation4 + $0x168] sm:$0xff] }
 0x49a   :  { %6515 = vpow2.f32 %v4740_v19  ;;  %v2440_v19 = vld [vmem:[#allocation4 + $0x90] sm:$0xff]  ;;  %v2465_v13 = vld [vmem:[#allocation4 + $0x158] sm:$0xff] }
 0x49b   :  { %6517 = vtanh.f32 %v2096_v28  ;;  %v2444_v28 = vld [vmem:[#allocation4 + $0xb0] sm:$0xff] }
 0x49f   :  { %v6510_v7 = vpop.eup %6509 }
 0x4a0   :  { %v7766_v20 = vmul.f32 %v6510_v7, %v6508_v3  ;;  %v2442_v3 = vld [vmem:[#allocation4 + $0xa0] sm:$0xff]  ;;  %v7796_v7 = vpack.c.bf16 %v2445_v63, %v2441_v14  ;;  %v2469_v14 = vld [vmem:[#allocation4 + $0x178] sm:$0xff] }
 0x4a2   :  { %9257 = vst [vmem:[#allocation15_spill] sm:$0xff] %v7766_v20  ;;  %v6512_v25 = vpop.eup %6511  ;;  %2314 = vmatprep.mubr.f32.mxu0 %v7766_v20  ;;  %2385 = vmatprep.mubr.f32.mxu1 %v7766_v20 }
 0x4a3   :  { %v6514_v31 = vpop.eup %6513  ;;  %v2101_v56 = vadd.f32 1.0, %v6512_v25  ;;  %v2447_v25 = vld [vmem:[#allocation4 + $0xc8] sm:$0xff] }
 0x4a4   :  { %v2107_v21 = vadd.f32 1.0, %v6514_v31  ;;  %v6516_v30 = vpop.eup %6515  ;;  %v2451_v31 = vld [vmem:[#allocation4 + $0xe8] sm:$0xff] }
 0x4a5   :  { %6519 = vrcp.f32 %v2101_v56  ;;  %v6518_v22 = vpop.eup %6517  ;;  %v2114_v11 = vadd.f32 1.0, %v6516_v30  ;;  %v2449_v56 = vld [vmem:[#allocation4 + $0xd8] sm:$0xff]  ;;  %v7802_v30 = vpack.c.bf16 %v2442_v3, %v2438_v50  ;;  %v2462_v3 = vld [vmem:[#allocation4 + $0x140] sm:$0xff] }
 0x4a6   :  { %6521 = vrcp.f32 %v2107_v21  ;;  %v2453_v21 = vld [vmem:[#allocation4 + $0xf8] sm:$0xff] }
 0x4a7   :  { %6523 = vrcp.f32 %v2114_v11  ;;  %v7810_v11 = vpack.c.bf16 %v2453_v21, %v2449_v56  ;;  %v2468_v56 = vld [vmem:[#allocation4 + $0x170] sm:$0xff]  ;;  %v2471_v21 = vld [vmem:[#allocation4 + $0x188] sm:$0xff] }
 0x4af   :  { %v6520_v29 = vpop.eup %6519 }
 0x4b0   :  { %v6522_v46 = vpop.eup %6521  ;;  %v2118_v55 = vmul.f32 %v6520_v29, %v6518_v22  ;;  %v7804_v22 = vpack.c.bf16 %v2444_v28, %v2440_v19  ;;  %v2446_v29 = vld [vmem:[#allocation4 + $0xc0] sm:$0xff]  ;;  %v7832_v28 = vpack.c.bf16 %v2467_v48, %v2463_v42  ;;  %v2480_v48 = vld [vmem:[#allocation4 + $0x1d0] sm:$0xff] }
 0x4b1   :  { %v2117_v18 = vmul.f32 %v6522_v46, %v7639_v32  ;;  %v6524_v17 = vpop.eup %6523  ;;  %v2430_v32 = vld [vmem:[#allocation4 + $0x40] sm:$0xff] }
 0x4b2   :  { %v7788_v16 = vpack.c.bf16 %v2434_v9, %v2430_v32  ;;  %v2450_v46 = vld [vmem:[#allocation4 + $0xe0] sm:$0xff]  ;;  %v7822_v32 = vpack.c.bf16 %v2461_v33, %v2457_v35  ;;  %v2456_v9 = vld [vmem:[#allocation4 + $0x110] sm:$0xff] }
 0x4b3   :  { %v7771_v62 = vadd.f32 %v2118_v55, %v2117_v18  ;;  %v7808_v55 = vpack.c.bf16 %v2451_v31, %v2447_v25  ;;  %v2448_v18 = vld [vmem:[#allocation4 + $0xd0] sm:$0xff]  ;;  %v7814_v41 = vpack.c.bf16 %v2450_v46, %v2446_v29  ;;  %v7828_v50 = vpack.c.bf16 %v2460_v60, %v2456_v9  ;;  %v2466_v19 = vld [vmem:[#allocation4 + $0x160] sm:$0xff]  ;;  %v2475_v29 = vld [vmem:[#allocation4 + $0x1a8] sm:$0xff] }
 0x4b4   :  { %v7816_v49 = vpack.c.bf16 %v2452_v53, %v2448_v18  ;;  %v7834_v25 = vpack.c.bf16 %v2469_v14, %v2465_v13  ;;  %v2464_v31 = vld [vmem:[#allocation4 + $0x150] sm:$0xff]  ;;  %v2473_v46 = vld [vmem:[#allocation4 + $0x198] sm:$0xff]  ;;  %v7838_v53 = vpack.c.bf16 %v2466_v19, %v2462_v3  ;;  %v2657_v3 = vld [vmem:[#allocation6 + $0x8] sm:$0xff] }
 0x4b5   :  { %6525 = vtanh.f32 %v7771_v62  ;;  %v2477_v18 = vld [vmem:[#allocation4 + $0x1b8] sm:$0xff]  ;;  %v2472_v33 = vld [vmem:[#allocation4 + $0x190] sm:$0xff]  ;;  %v2661_v19 = vld [vmem:[#allocation6 + $0x28] sm:$0xff] }
 0x4b6   :  { %v7846_v35 = vpack.c.bf16 %v2477_v18, %v2473_v46  ;;  %v2485_v9 = vld [vmem:[#allocation4 + $0x1f8] sm:$0xff]  ;;  %v2484_v13 = vld [vmem:[#allocation4 + $0x1f0] sm:$0xff] }
 0x4b7   :  { %v7858_v14 = vpack.c.bf16 %v2484_v13, %v2480_v48  ;;  %v2658_v18 = vld [vmem:[#allocation6 + $0x10] sm:$0xff]  ;;  %v2671_v48 = vld [vmem:[#allocation6 + $0x78] sm:$0xff]  ;;  %v2664_v13 = vld [vmem:[#allocation6 + $0x40] sm:$0xff] }
 0x4bf   :  { %v6526_v1 = vpop.eup %6525 }
 0x4c0   :  { %v7778_v34 = vmul.f32 %v6526_v1, %v6524_v17  ;;  %v2458_v17 = vld [vmem:[#allocation4 + $0x120] sm:$0xff]  ;;  %v7820_v1 = vpack.c.bf16 %v2459_v27, %v2455_v45  ;;  %v7840_v45 = vpack.c.bf16 %v2468_v56, %v2464_v31  ;;  %v7844_v27 = vpack.c.bf16 %v2475_v29, %v2471_v21  ;;  %v2659_v31 = vld [vmem:[#allocation6 + $0x18] sm:$0xff] }
 0x4c1   :  { %v7826_v63 = vpack.c.bf16 %v2458_v17, %v2454_v12  ;;  %v2476_v12 = vld [vmem:[#allocation4 + $0x1b0] sm:$0xff]  ;;  %v2481_v17 = vld [vmem:[#allocation4 + $0x1d8] sm:$0xff]  ;;  %v2656_v21 = vld [vmem:[#allocation6] sm:$0xff] }
 0x4c2   :  { %2315 = vmatmul.mubr.f32.vlgmr.msra.gmra.mrb[12].mxu0 %v7778_v34  ;;  %2386 = vmatmul.mubr.f32.vlgmr.msra.gmra.mrb[16].mxu1 %v7778_v34  ;;  %v7850_v60 = vpack.c.bf16 %v2476_v12, %v2472_v33  ;;  %v7854_v42 = vpack.c.bf16 %v2485_v9, %v2481_v17  ;;  %v2663_v56 = vld [vmem:[#allocation6 + $0x38] sm:$0xff]  ;;  %v2660_v29 = vld [vmem:[#allocation6 + $0x20] sm:$0xff]  ;;  %v2669_v12 = vld [vmem:[#allocation6 + $0x68] sm:$0xff] }
 0x4c3   :  { %5610 = vmatpush1.bf16.msra.mxu0 %v7774_v43  ;;  %5642 = vmatpush1.bf16.msra.mxu1 %v7776_v0  ;;  %v7868_v46 = vpack.c.bf16 %v2663_v56, %v2659_v31  ;;  %v2667_v17 = vld [vmem:[#allocation6 + $0x58] sm:$0xff]  ;;  %v2666_v56 = vld [vmem:[#allocation6 + $0x50] sm:$0xff] }
 0x4c4   :  { %5612 = vmatprep.subr.bf16.mxu0 %v7780_v37  ;;  %5644 = vmatprep.subr.bf16.mxu1 %v7782_v59 }
 0x4c5   :  { %2550 = vmatprep.mubr.f32.mxu0 %v9074_v61  ;;  %2621 = vmatprep.mubr.f32.mxu1 %v9074_v61 }
 0x4c7   :  { %5614 = vmatpush1.bf16.msra.mxu0 %v7788_v16  ;;  %5646 = vmatpush1.bf16.msra.mxu1 %v7790_v57 }
 0x4c8   :  { %5616 = vmatprep.subr.bf16.mxu0 %v7794_v4  ;;  %5648 = vmatprep.subr.bf16.mxu1 %v7796_v7 }
 0x4cb   :  { %5618 = vmatpush1.bf16.msra.mxu0 %v7802_v30  ;;  %5650 = vmatpush1.bf16.msra.mxu1 %v7804_v22 }
 0x4cc   :  { %5620 = vmatprep.subr.bf16.mxu0 %v7808_v55  ;;  %5652 = vmatprep.subr.bf16.mxu1 %v7810_v11 }
 0x4cf   :  { %5622 = vmatpush1.bf16.msra.mxu0 %v7814_v41  ;;  %5654 = vmatpush1.bf16.msra.mxu1 %v7816_v49 }
 0x4d0   :  { %5624 = vmatprep.subr.bf16.mxu0 %v7820_v1  ;;  %5656 = vmatprep.subr.bf16.mxu1 %v7822_v32 }
 0x4d3   :  { %5626 = vmatpush1.bf16.msra.mxu0 %v7826_v63  ;;  %5658 = vmatpush1.bf16.msra.mxu1 %v7828_v50 }
 0x4d4   :  { %5628 = vmatprep.subr.bf16.mxu0 %v7832_v28  ;;  %5660 = vmatprep.subr.bf16.mxu1 %v7834_v25 }
 0x4d7   :  { %5630 = vmatpush1.bf16.msra.mxu0 %v7838_v53  ;;  %5662 = vmatpush1.bf16.msra.mxu1 %v7840_v45 }
 0x4d8   :  { %5632 = vmatprep.subr.bf16.mxu0 %v7844_v27  ;;  %5664 = vmatprep.subr.bf16.mxu1 %v7846_v35 }
 0x4db   :  { %5634 = vmatpush1.bf16.msra.mxu0 %v7666_v58  ;;  %5666 = vmatpush1.bf16.msra.mxu1 %v7850_v60  ;;  %v7866_v58 = vpack.c.bf16 %v2661_v19, %v2657_v3  ;;  %v2668_v3 = vld [vmem:[#allocation6 + $0x60] sm:$0xff]  ;;  %v7880_v19 = vpack.c.bf16 %v2671_v48, %v2667_v17  ;;  %v2679_v17 = vld [vmem:[#allocation6 + $0xb8] sm:$0xff] }
 0x4dc   :  { %5636 = vmatprep.subr.bf16.mxu0 %v7670_v51  ;;  %5668 = vmatprep.subr.bf16.mxu1 %v7854_v42  ;;  %v7870_v51 = vpack.c.bf16 %v2660_v29, %v2656_v21  ;;  %v7882_v31 = vpack.c.bf16 %v2668_v3, %v2664_v13  ;;  %v2670_v21 = vld [vmem:[#allocation6 + $0x70] sm:$0xff]  ;;  %v2672_v48 = vld [vmem:[#allocation6 + $0x80] sm:$0xff] }
 0x4dd   :  { %9260 = vst [vmem:[#allocation18_spill] sm:$0xff] %v7880_v19  ;;  %v7885_v29 = vpack.c.bf16 %v2670_v21, %v2666_v56  ;;  %v2676_v13 = vld [vmem:[#allocation6 + $0xa0] sm:$0xff]  ;;  %v2674_v56 = vld [vmem:[#allocation6 + $0x90] sm:$0xff] }
 0x4de   :  { %9261 = vst [vmem:[#allocation19_spill] sm:$0xff] %v7882_v31  ;;  %v7894_v20 = vpack.c.bf16 %v2676_v13, %v2672_v48  ;;  %v2678_v21 = vld [vmem:[#allocation6 + $0xb0] sm:$0xff]  ;;  %v2684_v48 = vld [vmem:[#allocation6 + $0xe0] sm:$0xff] }
 0x4df   :  { %5638 = vmatpush1.bf16.msra.mxu0 %v7674_v40  ;;  %5670 = vmatpush1.bf16.msra.mxu1 %v7858_v14  ;;  %v2662_v40 = vld [vmem:[#allocation6 + $0x30] sm:$0xff]  ;;  %9262 = vst [vmem:[#allocation20_spill] sm:$0xff] %v7885_v29  ;;  %v7897_v10 = vpack.c.bf16 %v2678_v21, %v2674_v56 }
 0x4e0   :  { %5672 = vmatprep.subr.bf16.mxu0 %v7866_v58  ;;  %v7873_v33 = vpack.c.bf16 %v2662_v40, %v2658_v18  ;;  %5736 = vmatprep.subr.bf16.mxu1 %v7868_v46  ;;  %v2673_v18 = vld [vmem:[#allocation6 + $0x88] sm:$0xff]  ;;  %9265 = vst [vmem:[#allocation23_spill] sm:$0xff] %v7894_v20  ;;  %v2682_v56 = vld [vmem:[#allocation6 + $0xd0] sm:$0xff] }
 0x4e1   :  { %v2677_v40 = vld [vmem:[#allocation6 + $0xa8] sm:$0xff]  ;;  %9266 = vst [vmem:[#allocation24_spill] sm:$0xff] %v7897_v10  ;;  %v2686_v21 = vld [vmem:[#allocation6 + $0xf0] sm:$0xff] }
 0x4e2   :  { %2551 = vmatmul.mubr.f32.vlgmr.msra.gmra.mrb[14].mxu0 %v7778_v34  ;;  %2622 = vmatmul.mubr.f32.vlgmr.msra.gmra.mrb[18].mxu1 %v7778_v34  ;;  %9258 = vst [vmem:[#allocation16_spill] sm:$0xff] %v7873_v33  ;;  %v2665_v34 = vld [vmem:[#allocation6 + $0x48] sm:$0xff] }
 0x4e3   :  { %5674 = vmatpush1.bf16.msra.mxu0 %v7870_v51  ;;  %5738 = vmatpush1.bf16.msra.mxu1 %v7873_v33  ;;  %v7878_v9 = vpack.c.bf16 %v2669_v12, %v2665_v34  ;;  %v2675_v34 = vld [vmem:[#allocation6 + $0x98] sm:$0xff]  ;;  %v7890_v12 = vpack.c.bf16 %v2677_v40, %v2673_v18  ;;  %v2685_v18 = vld [vmem:[#allocation6 + $0xe8] sm:$0xff] }
 0x4e4   :  { %5740 = vmatprep.subr.bf16.mxu1 %v7880_v19  ;;  %v7892_v3 = vpack.c.bf16 %v2679_v17, %v2675_v34  ;;  %v2683_v40 = vld [vmem:[#allocation6 + $0xd8] sm:$0xff]  ;;  %v2680_v17 = vld [vmem:[#allocation6 + $0xc0] sm:$0xff] }
 0x4e5   :  { %9259 = vst [vmem:[#allocation17_spill] sm:$0xff] %v7878_v9  ;;  %5676 = vmatprep.subr.bf16.mxu0 %v7878_v9  ;;  %9263 = vst [vmem:[#allocation21_spill] sm:$0xff] %v7890_v12  ;;  %v2687_v34 = vld [vmem:[#allocation6 + $0xf8] sm:$0xff]  ;;  %v7906_v19 = vpack.c.bf16 %v2684_v48, %v2680_v17  ;;  %v2692_v17 = vld [vmem:[#allocation6 + $0x120] sm:$0xff] }
 0x4e6   :  { %9264 = vst [vmem:[#allocation22_spill] sm:$0xff] %v7892_v3  ;;  %v7904_v13 = vpack.c.bf16 %v2687_v34, %v2683_v40  ;;  %v2695_v40 = vld [vmem:[#allocation6 + $0x138] sm:$0xff]  ;;  %v2688_v34 = vld [vmem:[#allocation6 + $0x100] sm:$0xff] }
 0x4e7   :  { %5678 = vmatpush1.bf16.msra.mxu0 %v7882_v31  ;;  %5742 = vmatpush1.bf16.msra.mxu1 %v7885_v29  ;;  %v2681_v29 = vld [vmem:[#allocation6 + $0xc8] sm:$0xff]  ;;  %9269 = vst [vmem:[#allocation27_spill] sm:$0xff] %v7906_v19  ;;  %v2771_v9 = vld [vmem:[#allocation6 + $0x398] sm:$0xff] }
 0x4e8   :  { %5680 = vmatprep.subr.bf16.mxu0 %v7890_v12  ;;  %5744 = vmatprep.subr.bf16.mxu1 %v7892_v3  ;;  %v7902_v31 = vpack.c.bf16 %v2685_v18, %v2681_v29  ;;  %9268 = vst [vmem:[#allocation26_spill] sm:$0xff] %v7904_v13  ;;  %v7909_v3 = vpack.c.bf16 %v2686_v21, %v2682_v56  ;;  %v2693_v29 = vld [vmem:[#allocation6 + $0x128] sm:$0xff]  ;;  %v2691_v18 = vld [vmem:[#allocation6 + $0x118] sm:$0xff]  ;;  %v2690_v56 = vld [vmem:[#allocation6 + $0x110] sm:$0xff] }
 0x4e9   :  { %v7916_v48 = vpack.c.bf16 %v2695_v40, %v2691_v18  ;;  %v7918_v12 = vpack.c.bf16 %v2692_v17, %v2688_v34  ;;  %v2694_v21 = vld [vmem:[#allocation6 + $0x130] sm:$0xff]  ;;  %v2703_v18 = vld [vmem:[#allocation6 + $0x178] sm:$0xff]  ;;  %v2696_v40 = vld [vmem:[#allocation6 + $0x140] sm:$0xff] }
 0x4ea   :  { %9267 = vst [vmem:[#allocation25_spill] sm:$0xff] %v7902_v31  ;;  %9270 = vst [vmem:[#allocation28_spill] sm:$0xff] %v7909_v3  ;;  %v2700_v34 = vld [vmem:[#allocation6 + $0x160] sm:$0xff]  ;;  %v2775_v33 = vld [vmem:[#allocation6 + $0x3b8] sm:$0xff] }
 0x4eb   :  { %5682 = vmatpush1.bf16.msra.mxu0 %v7894_v20  ;;  %5746 = vmatpush1.bf16.msra.mxu1 %v7897_v10  ;;  %v2689_v10 = vld [vmem:[#allocation6 + $0x108] sm:$0xff]  ;;  %9272 = vst [vmem:[#allocation30_spill] sm:$0xff] %v7916_v48  ;;  %9273 = vst [vmem:[#allocation31_spill] sm:$0xff] %v7918_v12 }
 0x4ec   :  { %5684 = vmatprep.subr.bf16.mxu0 %v7902_v31  ;;  %5748 = vmatprep.subr.bf16.mxu1 %v7904_v13  ;;  %v7914_v20 = vpack.c.bf16 %v2693_v29, %v2689_v10  ;;  %v7921_v13 = vpack.c.bf16 %v2694_v21, %v2690_v56  ;;  %v2697_v10 = vld [vmem:[#allocation6 + $0x148] sm:$0xff]  ;;  %v7930_v31 = vpack.c.bf16 %v2700_v34, %v2696_v40  ;;  %v2698_v56 = vld [vmem:[#allocation6 + $0x150] sm:$0xff]  ;;  %v2708_v40 = vld [vmem:[#allocation6 + $0x1a0] sm:$0xff] }
 0x4ed   :  { %v2701_v29 = vld [vmem:[#allocation6 + $0x168] sm:$0xff]  ;;  %v2702_v21 = vld [vmem:[#allocation6 + $0x170] sm:$0xff] }
 0x4ee   :  { %9271 = vst [vmem:[#allocation29_spill] sm:$0xff] %v7914_v20  ;;  %9274 = vst [vmem:[#allocation32_spill] sm:$0xff] %v7921_v13 }
 0x4ef   :  { %5686 = vmatpush1.bf16.msra.mxu0 %v7906_v19  ;;  %5750 = vmatpush1.bf16.msra.mxu1 %v7909_v3  ;;  %v2699_v3 = vld [vmem:[#allocation6 + $0x158] sm:$0xff]  ;;  %v7926_v19 = vpack.c.bf16 %v2701_v29, %v2697_v10  ;;  %9277 = vst [vmem:[#allocation35_spill] sm:$0xff] %v7930_v31  ;;  %v2709_v10 = vld [vmem:[#allocation6 + $0x1a8] sm:$0xff] }
 0x4f0   :  { %5688 = vmatprep.subr.bf16.mxu0 %v7914_v20  ;;  %5752 = vmatprep.subr.bf16.mxu1 %v7916_v48  ;;  %v7928_v17 = vpack.c.bf16 %v2703_v18, %v2699_v3  ;;  %v7933_v48 = vpack.c.bf16 %v2702_v21, %v2698_v56  ;;  %v2707_v29 = vld [vmem:[#allocation6 + $0x198] sm:$0xff]  ;;  %v2704_v18 = vld [vmem:[#allocation6 + $0x180] sm:$0xff]  ;;  %v2706_v56 = vld [vmem:[#allocation6 + $0x190] sm:$0xff] }
 0x4f1   :  { %9275 = vst [vmem:[#allocation33_spill] sm:$0xff] %v7926_v19  ;;  %v2711_v3 = vld [vmem:[#allocation6 + $0x1b8] sm:$0xff]  ;;  %v7942_v20 = vpack.c.bf16 %v2708_v40, %v2704_v18  ;;  %v2710_v21 = vld [vmem:[#allocation6 + $0x1b0] sm:$0xff]  ;;  %v2716_v18 = vld [vmem:[#allocation6 + $0x1e0] sm:$0xff] }
 0x4f2   :  { %9276 = vst [vmem:[#allocation34_spill] sm:$0xff] %v7928_v17  ;;  %9278 = vst [vmem:[#allocation36_spill] sm:$0xff] %v7933_v48  ;;  %v7940_v34 = vpack.c.bf16 %v2711_v3, %v2707_v29  ;;  %v2719_v29 = vld [vmem:[#allocation6 + $0x1f8] sm:$0xff]  ;;  %v2712_v3 = vld [vmem:[#allocation6 + $0x1c0] sm:$0xff] }
 0x4f3   :  { %5690 = vmatpush1.bf16.msra.mxu0 %v7918_v12  ;;  %5754 = vmatpush1.bf16.msra.mxu1 %v7921_v13  ;;  %v2705_v13 = vld [vmem:[#allocation6 + $0x188] sm:$0xff]  ;;  %9281 = vst [vmem:[#allocation39_spill] sm:$0xff] %v7942_v20 }
 0x4f4   :  { %5692 = vmatprep.subr.bf16.mxu0 %v7926_v19  ;;  %5756 = vmatprep.subr.bf16.mxu1 %v7928_v17  ;;  %v7938_v12 = vpack.c.bf16 %v2709_v10, %v2705_v13  ;;  %9280 = vst [vmem:[#allocation38_spill] sm:$0xff] %v7940_v34  ;;  %v7945_v17 = vpack.c.bf16 %v2710_v21, %v2706_v56  ;;  %v2717_v13 = vld [vmem:[#allocation6 + $0x1e8] sm:$0xff]  ;;  %v2715_v10 = vld [vmem:[#allocation6 + $0x1d8] sm:$0xff]  ;;  %v2714_v56 = vld [vmem:[#allocation6 + $0x1d0] sm:$0xff] }
 0x4f5   :  { %v7952_v40 = vpack.c.bf16 %v2719_v29, %v2715_v10  ;;  %v7954_v19 = vpack.c.bf16 %v2716_v18, %v2712_v3  ;;  %v2718_v21 = vld [vmem:[#allocation6 + $0x1f0] sm:$0xff]  ;;  %v2727_v10 = vld [vmem:[#allocation6 + $0x238] sm:$0xff]  ;;  %v2720_v29 = vld [vmem:[#allocation6 + $0x200] sm:$0xff] }
 0x4f6   :  { %9279 = vst [vmem:[#allocation37_spill] sm:$0xff] %v7938_v12  ;;  %9282 = vst [vmem:[#allocation40_spill] sm:$0xff] %v7945_v17  ;;  %v2724_v3 = vld [vmem:[#allocation6 + $0x220] sm:$0xff] }
 0x4f7   :  { %5694 = vmatpush1.bf16.msra.mxu0 %v7930_v31  ;;  %5758 = vmatpush1.bf16.msra.mxu1 %v7933_v48  ;;  %v2713_v48 = vld [vmem:[#allocation6 + $0x1c8] sm:$0xff]  ;;  %9284 = vst [vmem:[#allocation42_spill] sm:$0xff] %v7952_v40  ;;  %9285 = vst [vmem:[#allocation43_spill] sm:$0xff] %v7954_v19 }
 0x4f8   :  { %5696 = vmatprep.subr.bf16.mxu0 %v7938_v12  ;;  %5760 = vmatprep.subr.bf16.mxu1 %v7940_v34  ;;  %v7950_v31 = vpack.c.bf16 %v2717_v13, %v2713_v48  ;;  %v7957_v34 = vpack.c.bf16 %v2718_v21, %v2714_v56  ;;  %v2725_v48 = vld [vmem:[#allocation6 + $0x228] sm:$0xff]  ;;  %v2723_v13 = vld [vmem:[#allocation6 + $0x218] sm:$0xff]  ;;  %v7966_v12 = vpack.c.bf16 %v2724_v3, %v2720_v29  ;;  %v2722_v56 = vld [vmem:[#allocation6 + $0x210] sm:$0xff] }
 0x4f9   :  { %v7964_v18 = vpack.c.bf16 %v2727_v10, %v2723_v13  ;;  %v2726_v21 = vld [vmem:[#allocation6 + $0x230] sm:$0xff]  ;;  %v2735_v13 = vld [vmem:[#allocation6 + $0x278] sm:$0xff]  ;;  %v2728_v10 = vld [vmem:[#allocation6 + $0x240] sm:$0xff] }
 0x4fa   :  { %9283 = vst [vmem:[#allocation41_spill] sm:$0xff] %v7950_v31  ;;  %9286 = vst [vmem:[#allocation44_spill] sm:$0xff] %v7957_v34  ;;  %v2732_v29 = vld [vmem:[#allocation6 + $0x260] sm:$0xff] }
 0x4fb   :  { %5698 = vmatpush1.bf16.msra.mxu0 %v7942_v20  ;;  %5762 = vmatpush1.bf16.msra.mxu1 %v7945_v17  ;;  %v2721_v17 = vld [vmem:[#allocation6 + $0x208] sm:$0xff]  ;;  %9288 = vst [vmem:[#allocation46_spill] sm:$0xff] %v7964_v18  ;;  %9289 = vst [vmem:[#allocation47_spill] sm:$0xff] %v7966_v12 }
 0x4fc   :  { %5700 = vmatprep.subr.bf16.mxu0 %v7950_v31  ;;  %5764 = vmatprep.subr.bf16.mxu1 %v7952_v40  ;;  %v7962_v20 = vpack.c.bf16 %v2725_v48, %v2721_v17  ;;  %v7969_v40 = vpack.c.bf16 %v2726_v21, %v2722_v56  ;;  %v2733_v17 = vld [vmem:[#allocation6 + $0x268] sm:$0xff]  ;;  %v2731_v48 = vld [vmem:[#allocation6 + $0x258] sm:$0xff]  ;;  %v7978_v31 = vpack.c.bf16 %v2732_v29, %v2728_v10  ;;  %v2730_v56 = vld [vmem:[#allocation6 + $0x250] sm:$0xff] }
 0x4fd   :  { %v7976_v3 = vpack.c.bf16 %v2735_v13, %v2731_v48  ;;  %v2734_v21 = vld [vmem:[#allocation6 + $0x270] sm:$0xff]  ;;  %v2743_v48 = vld [vmem:[#allocation6 + $0x2b8] sm:$0xff]  ;;  %v2736_v13 = vld [vmem:[#allocation6 + $0x280] sm:$0xff] }
 0x4fe   :  { %9287 = vst [vmem:[#allocation45_spill] sm:$0xff] %v7962_v20  ;;  %9290 = vst [vmem:[#allocation48_spill] sm:$0xff] %v7969_v40  ;;  %v2740_v10 = vld [vmem:[#allocation6 + $0x2a0] sm:$0xff] }
 0x4ff   :  { %5702 = vmatpush1.bf16.msra.mxu0 %v7954_v19  ;;  %5766 = vmatpush1.bf16.msra.mxu1 %v7957_v34  ;;  %v2729_v34 = vld [vmem:[#allocation6 + $0x248] sm:$0xff]  ;;  %9292 = vst [vmem:[#allocation50_spill] sm:$0xff] %v7976_v3  ;;  %9293 = vst [vmem:[#allocation51_spill] sm:$0xff] %v7978_v31 }
 0x500   :  { %5704 = vmatprep.subr.bf16.mxu0 %v7962_v20  ;;  %5768 = vmatprep.subr.bf16.mxu1 %v7964_v18  ;;  %v7974_v19 = vpack.c.bf16 %v2733_v17, %v2729_v34  ;;  %v7981_v18 = vpack.c.bf16 %v2734_v21, %v2730_v56  ;;  %v2741_v34 = vld [vmem:[#allocation6 + $0x2a8] sm:$0xff]  ;;  %v2739_v17 = vld [vmem:[#allocation6 + $0x298] sm:$0xff]  ;;  %v7990_v20 = vpack.c.bf16 %v2740_v10, %v2736_v13  ;;  %v2738_v56 = vld [vmem:[#allocation6 + $0x290] sm:$0xff] }
 0x501   :  { %v7988_v29 = vpack.c.bf16 %v2743_v48, %v2739_v17  ;;  %v2742_v21 = vld [vmem:[#allocation6 + $0x2b0] sm:$0xff]  ;;  %v2751_v17 = vld [vmem:[#allocation6 + $0x2f8] sm:$0xff]  ;;  %v2744_v48 = vld [vmem:[#allocation6 + $0x2c0] sm:$0xff] }
 0x502   :  { %9291 = vst [vmem:[#allocation49_spill] sm:$0xff] %v7974_v19  ;;  %9294 = vst [vmem:[#allocation52_spill] sm:$0xff] %v7981_v18  ;;  %v2748_v13 = vld [vmem:[#allocation6 + $0x2e0] sm:$0xff] }
 0x503   :  { %5706 = vmatpush1.bf16.msra.mxu0 %v7966_v12  ;;  %5770 = vmatpush1.bf16.msra.mxu1 %v7969_v40  ;;  %v2737_v40 = vld [vmem:[#allocation6 + $0x288] sm:$0xff]  ;;  %9296 = vst [vmem:[#allocation54_spill] sm:$0xff] %v7988_v29  ;;  %9297 = vst [vmem:[#allocation55_spill] sm:$0xff] %v7990_v20 }
 0x504   :  { %5708 = vmatprep.subr.bf16.mxu0 %v7974_v19  ;;  %5772 = vmatprep.subr.bf16.mxu1 %v7976_v3  ;;  %v7986_v12 = vpack.c.bf16 %v2741_v34, %v2737_v40  ;;  %v7993_v3 = vpack.c.bf16 %v2742_v21, %v2738_v56  ;;  %v2749_v40 = vld [vmem:[#allocation6 + $0x2e8] sm:$0xff]  ;;  %v2747_v34 = vld [vmem:[#allocation6 + $0x2d8] sm:$0xff]  ;;  %v8002_v19 = vpack.c.bf16 %v2748_v13, %v2744_v48  ;;  %v2746_v56 = vld [vmem:[#allocation6 + $0x2d0] sm:$0xff] }
 0x505   :  { %v8000_v10 = vpack.c.bf16 %v2751_v17, %v2747_v34  ;;  %v2750_v21 = vld [vmem:[#allocation6 + $0x2f0] sm:$0xff]  ;;  %v2759_v34 = vld [vmem:[#allocation6 + $0x338] sm:$0xff]  ;;  %v2752_v17 = vld [vmem:[#allocation6 + $0x300] sm:$0xff] }
 0x506   :  { %9295 = vst [vmem:[#allocation53_spill] sm:$0xff] %v7986_v12  ;;  %9298 = vst [vmem:[#allocation56_spill] sm:$0xff] %v7993_v3  ;;  %v2756_v48 = vld [vmem:[#allocation6 + $0x320] sm:$0xff] }
 0x507   :  { %5710 = vmatpush1.bf16.msra.mxu0 %v7978_v31  ;;  %5774 = vmatpush1.bf16.msra.mxu1 %v7981_v18  ;;  %v2745_v18 = vld [vmem:[#allocation6 + $0x2c8] sm:$0xff]  ;;  %9300 = vst [vmem:[#allocation59_spill] sm:$0xff] %v8000_v10  ;;  %9301 = vst [vmem:[#allocation58_spill] sm:$0xff] %v8002_v19 }
 0x508   :  { %5712 = vmatprep.subr.bf16.mxu0 %v7986_v12  ;;  %5776 = vmatprep.subr.bf16.mxu1 %v7988_v29  ;;  %v7998_v31 = vpack.c.bf16 %v2749_v40, %v2745_v18  ;;  %v8005_v29 = vpack.c.bf16 %v2750_v21, %v2746_v56  ;;  %v2757_v18 = vld [vmem:[#allocation6 + $0x328] sm:$0xff]  ;;  %v2755_v40 = vld [vmem:[#allocation6 + $0x318] sm:$0xff]  ;;  %v8014_v12 = vpack.c.bf16 %v2756_v48, %v2752_v17  ;;  %v2754_v56 = vld [vmem:[#allocation6 + $0x310] sm:$0xff] }
 0x509   :  { %v8012_v13 = vpack.c.bf16 %v2759_v34, %v2755_v40  ;;  %v2758_v21 = vld [vmem:[#allocation6 + $0x330] sm:$0xff]  ;;  %v2767_v40 = vld [vmem:[#allocation6 + $0x378] sm:$0xff]  ;;  %v2760_v34 = vld [vmem:[#allocation6 + $0x340] sm:$0xff] }
 0x50a   :  { %9299 = vst [vmem:[#allocation57_spill] sm:$0xff] %v7998_v31  ;;  %9302 = vst [vmem:[#allocation63_spill] sm:$0xff] %v8005_v29  ;;  %v2764_v17 = vld [vmem:[#allocation6 + $0x360] sm:$0xff] }
 0x50b   :  { %5714 = vmatpush1.bf16.msra.mxu0 %v7990_v20  ;;  %5778 = vmatpush1.bf16.msra.mxu1 %v7993_v3  ;;  %v2753_v3 = vld [vmem:[#allocation6 + $0x308] sm:$0xff]  ;;  %9304 = vst [vmem:[#allocation65_spill] sm:$0xff] %v8012_v13  ;;  %9305 = vst [vmem:[#allocation64_spill] sm:$0xff] %v8014_v12 }
 0x50c   :  { %5716 = vmatprep.subr.bf16.mxu0 %v7998_v31  ;;  %5780 = vmatprep.subr.bf16.mxu1 %v8000_v10  ;;  %v8010_v20 = vpack.c.bf16 %v2757_v18, %v2753_v3  ;;  %v8017_v10 = vpack.c.bf16 %v2758_v21, %v2754_v56  ;;  %v2765_v3 = vld [vmem:[#allocation6 + $0x368] sm:$0xff]  ;;  %v2763_v18 = vld [vmem:[#allocation6 + $0x358] sm:$0xff]  ;;  %v8026_v31 = vpack.c.bf16 %v2764_v17, %v2760_v34  ;;  %v2762_v56 = vld [vmem:[#allocation6 + $0x350] sm:$0xff] }
 0x50d   :  { %v8024_v48 = vpack.c.bf16 %v2767_v40, %v2763_v18  ;;  %v2766_v21 = vld [vmem:[#allocation6 + $0x370] sm:$0xff]  ;;  %v2768_v18 = vld [vmem:[#allocation6 + $0x380] sm:$0xff] }
 0x50e   :  { %9303 = vst [vmem:[#allocation62_spill] sm:$0xff] %v8010_v20  ;;  %9306 = vst [vmem:[#allocation66_spill] sm:$0xff] %v8017_v10  ;;  %v2772_v40 = vld [vmem:[#allocation6 + $0x3a0] sm:$0xff]  ;;  %v2770_v34 = vld [vmem:[#allocation6 + $0x390] sm:$0xff] }
 0x50f   :  { %5718 = vmatpush1.bf16.msra.mxu0 %v8002_v19  ;;  %5782 = vmatpush1.bf16.msra.mxu1 %v8005_v29  ;;  %v2761_v29 = vld [vmem:[#allocation6 + $0x348] sm:$0xff]  ;;  %9308 = vst [vmem:[#allocation68_spill] sm:$0xff] %v8024_v48  ;;  %9309 = vst [vmem:[#allocation69_spill] sm:$0xff] %v8026_v31  ;;  %v8038_v17 = vpack.c.bf16 %v2772_v40, %v2768_v18  ;;  %v2782_v18 = vld [vmem:[#allocation6 + $0x3f0] sm:$0xff] }
 0x510   :  { %5720 = vmatprep.subr.bf16.mxu0 %v8010_v20  ;;  %5784 = vmatprep.subr.bf16.mxu1 %v8012_v13  ;;  %v8022_v19 = vpack.c.bf16 %v2765_v3, %v2761_v29  ;;  %v2769_v20 = vld [vmem:[#allocation6 + $0x388] sm:$0xff]  ;;  %v8035_v3 = vpack.c.bf16 %v2775_v33, %v2771_v9  ;;  %v2779_v33 = vld [vmem:[#allocation6 + $0x3d8] sm:$0xff] }
 0x511   :  { %v2773_v13 = vld [vmem:[#allocation6 + $0x3a8] sm:$0xff]  ;;  %v2783_v9 = vld [vmem:[#allocation6 + $0x3f8] sm:$0xff] }
 0x512   :  { %9307 = vst [vmem:[#allocation67_spill] sm:$0xff] %v8022_v19  ;;  %v8033_v29 = vpack.c.bf16 %v2773_v13, %v2769_v20  ;;  %v2776_v13 = vld [vmem:[#allocation6 + $0x3c0] sm:$0xff] }
 0x513   :  { %5722 = vmatpush1.bf16.msra.mxu0 %v8014_v12  ;;  %5786 = vmatpush1.bf16.msra.mxu1 %v8017_v10  ;;  %v8029_v12 = vpack.c.bf16 %v2766_v21, %v2762_v56  ;;  %v2774_v56 = vld [vmem:[#allocation6 + $0x3b0] sm:$0xff]  ;;  %v2777_v21 = vld [vmem:[#allocation6 + $0x3c8] sm:$0xff]  ;;  %v2780_v10 = vld [vmem:[#allocation6 + $0x3e0] sm:$0xff] }
 0x514   :  { %5724 = vmatprep.subr.bf16.mxu0 %v8022_v19  ;;  %5788 = vmatprep.subr.bf16.mxu1 %v8024_v48  ;;  %v2781_v19 = vld [vmem:[#allocation6 + $0x3e8] sm:$0xff]  ;;  %v8042_v48 = vpack.c.bf16 %v2774_v56, %v2770_v34  ;;  %v8049_v40 = vpack.c.bf16 %v2780_v10, %v2776_v13 }
 0x515   :  { %9310 = vst [vmem:[#allocation70_spill] sm:$0xff] %v8029_v12  ;;  %v8044_v20 = vpack.c.bf16 %v2781_v19, %v2777_v21 }
 0x516   :  { %9313 = vst [vmem:[#allocation73_spill] sm:$0xff] %v8049_v40 }
 0x517   :  { %5726 = vmatpush1.bf16.msra.mxu0 %v8026_v31  ;;  %5790 = vmatpush1.bf16.msra.mxu1 %v8029_v12  ;;  %9311 = vst [vmem:[#allocation71_spill] sm:$0xff] %v8044_v20  ;;  %v8046_v31 = vpack.c.bf16 %v2783_v9, %v2779_v33  ;;  %v2778_v12 = vld [vmem:[#allocation6 + $0x3d0] sm:$0xff] }
 0x518   :  { %5728 = vmatprep.subr.bf16.mxu0 %v8033_v29  ;;  %5792 = vmatprep.subr.bf16.mxu1 %v8035_v3  ;;  %v8053_v34 = vpack.c.bf16 %v2782_v18, %v2778_v12 }
 0x519   :  { %9312 = vst [vmem:[#allocation72_spill] sm:$0xff] %v8046_v31 }
 0x51a   :  { %9314 = vst [vmem:[#allocation11_spill] sm:$0xff] %v8053_v34 }
 0x51b   :  { %5730 = vmatpush1.bf16.msra.mxu0 %v8038_v17  ;;  %5794 = vmatpush1.bf16.msra.mxu1 %v8042_v48 }
 0x51c   :  { %5732 = vmatprep.subr.bf16.mxu0 %v8044_v20  ;;  %5796 = vmatprep.subr.bf16.mxu1 %v8046_v31 }
 0x51f   :  { %5734 = vmatpush1.bf16.msra.mxu0 %v8049_v40  ;;  %5798 = vmatpush1.bf16.msra.mxu1 %v8053_v34 }
 0x520   :  { %5800 = vmatprep.subr.bf16.mxu0 %v7744_v24  ;;  %5832 = vmatprep.subr.bf16.mxu1 %v7746_v8 }
 0x595   :  { %v2316_v19 = vpop.f32.mrb[12].mxu0  ;;  %v2387_v56 = vpop.f32.mrb[16].mxu1 }
 0x596   :  { %v2317_v10 = vadd.f32 %v2316_v19, %v7295_v2  ;;  %v2318_v21 = vpop.f32.mrb[13].mxu0  ;;  %v2389_v33 = vpop.f32.mrb[17].mxu1  ;;  %v2388_v34 = vadd.f32 %v2387_v56, %v9254_v5 }
 0x597   :  { %v2319_v9 = vadd.f32 %v2318_v21, %v9252_v44  ;;  %v2390_v18 = vadd.f32 %v2389_v33, %v9253_v52  ;;  %v98_v2 = vpop.permute.xlu0 %97 }
 0x598   :  { %v4741_v12 = vmul.f32 -1.442695, %v2317_v10  ;;  %v152_v10 = vmul.f32 %v9255_v36, %v98_v2 }
 0x599   :  { %v4742_v13 = vmul.f32 -1.442695, %v2319_v9  ;;  %v4743_v40 = vmul.f32 -1.442695, %v2390_v18 }
 0x59a   :  { %6527 = vpow2.f32 %v4741_v12  ;;  %v153_v12 = vmul.f32 %v9256_v54, %v98_v2  ;;  %v155_v54 = vmul.f32 %v9133_v23, %v98_v2 }
 0x59b   :  { %6529 = vpow2.f32 %v4742_v13 }
 0x59c   :  { %6531 = vpow2.f32 %v4743_v40 }
 0x59d   :  { %6533 = vtanh.f32 %v2388_v34 }
 0x5a4   :  { %v6528_v24 = vpop.eup %6527 }
 0x5a5   :  { %v6530_v31 = vpop.eup %6529  ;;  %v2395_v8 = vadd.f32 1.0, %v6528_v24  ;;  %v206_v24 = vadd.f32 %v9131_v26, %v152_v10  ;;  %v154_v10 = vmul.f32 %v9134_v15, %v98_v2 }
 0x5a6   :  { %v2401_v20 = vadd.f32 1.0, %v6530_v31  ;;  %v6532_v19 = vpop.eup %6531  ;;  %v207_v31 = vadd.f32 %v9132_v6, %v153_v12 }
 0x5a7   :  { %6535 = vrcp.f32 %v2395_v8  ;;  %v6534_v21 = vpop.eup %6533  ;;  %v2408_v18 = vadd.f32 1.0, %v6532_v19 }
 0x5a8   :  { %6537 = vrcp.f32 %v2401_v20 }
 0x5a9   :  { %6539 = vrcp.f32 %v2408_v18 }
 0x5b1   :  { %v6536_v9 = vpop.eup %6535 }
 0x5b2   :  { %v6538_v33 = vpop.eup %6537  ;;  %v2412_v13 = vmul.f32 %v6536_v9, %v6534_v21 }
 0x5b3   :  { %v2411_v56 = vmul.f32 %v6538_v33, %v7759_v38  ;;  %v209_v38 = vadd.f32 %v7161_v47, %v155_v54  ;;  %v6540_v12 = vpop.eup %6539  ;;  %v208_v33 = vadd.f32 %v9135_v39, %v154_v10 }
 0x5b5   :  { %v2552_v40 = vpop.f32.mrb[14].mxu0  ;;  %v2623_v34 = vpop.f32.mrb[18].mxu1  ;;  %v8069_v20 = vadd.f32 %v2412_v13, %v2411_v56 }
 0x5b6   :  { %v2628_v8 = vadd.f32 %v2552_v40, %v206_v24  ;;  %v2554_v5 = vpop.f32.mrb[15].mxu0  ;;  %v2625_v36 = vpop.f32.mrb[19].mxu1  ;;  %v2630_v56 = vadd.f32 %v2623_v34, %v208_v33  ;;  %v9338_v33 = vld [vmem:[#allocation38_spill] sm:$0xff] }
 0x5b7   :  { %v2629_v52 = vadd.f32 %v2554_v5, %v207_v31  ;;  %6541 = vtanh.f32 %v8069_v20  ;;  %v2631_v9 = vadd.f32 %v2625_v36, %v209_v38 }
 0x5b8   :  { %v4744_v19 = vmul.f32 -1.442695, %v2628_v8 }
 0x5b9   :  { %v4745_v21 = vmul.f32 -1.442695, %v2629_v52  ;;  %v4746_v18 = vmul.f32 -1.442695, %v2631_v9 }
 0x5ba   :  { %6543 = vpow2.f32 %v4744_v19 }
 0x5bb   :  { %6545 = vpow2.f32 %v4745_v21 }
 0x5bc   :  { %6547 = vpow2.f32 %v4746_v18  ;;  %v9340_v18 = vld [vmem:[#allocation40_spill] sm:$0xff] }
 0x5bd   :  { %6549 = vtanh.f32 %v2630_v56  ;;  %v9341_v56 = vld [vmem:[#allocation41_spill] sm:$0xff] }
 0x5c1   :  { %v6542_v13 = vpop.eup %6541 }
 0x5c2   :  { %v8076_v5 = vmul.f32 %v6542_v13, %v6540_v12  ;;  %v9339_v13 = vld [vmem:[#allocation39_spill] sm:$0xff] }
 0x5c4   :  { %9315 = vst [vmem:[#allocation75_spill] sm:$0xff] %v8076_v5  ;;  %v6544_v24 = vpop.eup %6543  ;;  %2848 = vmatprep.mubr.f32.mxu0 %v8076_v5  ;;  %2919 = vmatprep.mubr.f32.mxu1 %v8076_v5 }
 0x5c5   :  { %v6546_v52 = vpop.eup %6545  ;;  %v2635_v40 = vadd.f32 1.0, %v6544_v24  ;;  %v9342_v24 = vld [vmem:[#allocation42_spill] sm:$0xff] }
 0x5c6   :  { %v2641_v54 = vadd.f32 1.0, %v6546_v52  ;;  %v6548_v2 = vpop.eup %6547  ;;  %v9343_v52 = vld [vmem:[#allocation43_spill] sm:$0xff] }
 0x5c7   :  { %6551 = vrcp.f32 %v2635_v40  ;;  %v6550_v36 = vpop.eup %6549  ;;  %v2648_v34 = vadd.f32 1.0, %v6548_v2  ;;  %v9344_v40 = vld [vmem:[#allocation44_spill] sm:$0xff]  ;;  %v9346_v2 = vld [vmem:[#allocation46_spill] sm:$0xff] }
 0x5c8   :  { %6553 = vrcp.f32 %v2641_v54  ;;  %v9345_v54 = vld [vmem:[#allocation45_spill] sm:$0xff] }
 0x5c9   :  { %6555 = vrcp.f32 %v2648_v34  ;;  %v9351_v34 = vld [vmem:[#allocation51_spill] sm:$0xff] }
 0x5d1   :  { %v6552_v31 = vpop.eup %6551 }
 0x5d2   :  { %v6554_v8 = vpop.eup %6553  ;;  %v2652_v19 = vmul.f32 %v6552_v31, %v6550_v36  ;;  %v9347_v36 = vld [vmem:[#allocation47_spill] sm:$0xff]  ;;  %v9348_v31 = vld [vmem:[#allocation48_spill] sm:$0xff] }
 0x5d3   :  { %v2651_v21 = vmul.f32 %v6554_v8, %v7771_v62  ;;  %v6556_v10 = vpop.eup %6555  ;;  %v3004_v62 = vld [vmem:[#allocation4 + $0x180] sm:$0xff]  ;;  %v9349_v8 = vld [vmem:[#allocation49_spill] sm:$0xff] }
 0x5d5   :  { %v8081_v38 = vadd.f32 %v2652_v19, %v2651_v21  ;;  %v9350_v19 = vld [vmem:[#allocation50_spill] sm:$0xff]  ;;  %v9352_v21 = vld [vmem:[#allocation52_spill] sm:$0xff] }
 0x5d7   :  { %6557 = vtanh.f32 %v8081_v38 }
 0x5e1   :  { %v6558_v9 = vpop.eup %6557 }
 0x5e2   :  { %v2655_v12 = vmul.f32 %v6558_v9, %v6556_v10  ;;  %v9353_v10 = vld [vmem:[#allocation53_spill] sm:$0xff]  ;;  %v9354_v9 = vld [vmem:[#allocation54_spill] sm:$0xff] }
 0x5e4   :  { %2849 = vmatmul.mubr.f32.vlgmr.msra.gmra.mrb[16].mxu0 %v2655_v12  ;;  %2920 = vmatmul.mubr.f32.vlgmr.msra.gmra.mrb[20].mxu1 %v2655_v12 }
 0x5e5   :  { %5802 = vmatpush1.bf16.msra.mxu0 %v7774_v43  ;;  %5834 = vmatpush1.bf16.msra.mxu1 %v7776_v0  ;;  %v3008_v43 = vld [vmem:[#allocation4 + $0x1a0] sm:$0xff]  ;;  %v3013_v0 = vld [vmem:[#allocation4 + $0x1c8] sm:$0xff] }
 0x5e6   :  { %5804 = vmatprep.subr.bf16.mxu0 %v7780_v37  ;;  %5836 = vmatprep.subr.bf16.mxu1 %v7782_v59  ;;  %v3017_v37 = vld [vmem:[#allocation4 + $0x1e8] sm:$0xff]  ;;  %v8108_v59 = vpack.c.bf16 %v3008_v43, %v3004_v62  ;;  %v9356_v62 = vld [vmem:[#allocation56_spill] sm:$0xff]  ;;  %v9357_v43 = vld [vmem:[#allocation57_spill] sm:$0xff] }
 0x5e7   :  { %3084 = vmatprep.mubr.f32.mxu0 %v9074_v61  ;;  %3155 = vmatprep.mubr.f32.mxu1 %v9074_v61 }
 0x5e9   :  { %5806 = vmatpush1.bf16.msra.mxu0 %v7788_v16  ;;  %5838 = vmatpush1.bf16.msra.mxu1 %v7790_v57  ;;  %v8112_v16 = vpack.c.bf16 %v3017_v37, %v3013_v0  ;;  %v3012_v57 = vld [vmem:[#allocation4 + $0x1c0] sm:$0xff]  ;;  %v9358_v0 = vld [vmem:[#allocation59_spill] sm:$0xff] }
 0x5ea   :  { %5808 = vmatprep.subr.bf16.mxu0 %v7794_v4  ;;  %5840 = vmatprep.subr.bf16.mxu1 %v7796_v7  ;;  %v3016_v4 = vld [vmem:[#allocation4 + $0x1e0] sm:$0xff] }
 0x5eb   :  { %v8116_v7 = vpack.c.bf16 %v3016_v4, %v3012_v57  ;;  %v9359_v37 = vld [vmem:[#allocation58_spill] sm:$0xff]  ;;  %v9360_v57 = vld [vmem:[#allocation63_spill] sm:$0xff] }
 0x5ec   :  { %v9361_v4 = vld [vmem:[#allocation62_spill] sm:$0xff] }
 0x5ed   :  { %5810 = vmatpush1.bf16.msra.mxu0 %v7802_v30  ;;  %5842 = vmatpush1.bf16.msra.mxu1 %v7804_v22  ;;  %v9316_v30 = vld [vmem:[#allocation16_spill] sm:$0xff]  ;;  %v9317_v22 = vld [vmem:[#allocation17_spill] sm:$0xff] }
 0x5ee   :  { %5812 = vmatprep.subr.bf16.mxu0 %v7808_v55  ;;  %5844 = vmatprep.subr.bf16.mxu1 %v7810_v11  ;;  %v9318_v55 = vld [vmem:[#allocation18_spill] sm:$0xff]  ;;  %v9319_v11 = vld [vmem:[#allocation19_spill] sm:$0xff] }
 0x5f1   :  { %5814 = vmatpush1.bf16.msra.mxu0 %v7814_v41  ;;  %5846 = vmatpush1.bf16.msra.mxu1 %v7816_v49  ;;  %v9320_v41 = vld [vmem:[#allocation20_spill] sm:$0xff]  ;;  %v9321_v49 = vld [vmem:[#allocation21_spill] sm:$0xff] }
 0x5f2   :  { %5816 = vmatprep.subr.bf16.mxu0 %v7820_v1  ;;  %5848 = vmatprep.subr.bf16.mxu1 %v7822_v32  ;;  %v9322_v1 = vld [vmem:[#allocation22_spill] sm:$0xff]  ;;  %v9323_v32 = vld [vmem:[#allocation23_spill] sm:$0xff] }
 0x5f5   :  { %5818 = vmatpush1.bf16.msra.mxu0 %v7826_v63  ;;  %5850 = vmatpush1.bf16.msra.mxu1 %v7828_v50  ;;  %v9324_v63 = vld [vmem:[#allocation24_spill] sm:$0xff]  ;;  %v9325_v50 = vld [vmem:[#allocation25_spill] sm:$0xff] }
 0x5f6   :  { %5820 = vmatprep.subr.bf16.mxu0 %v7832_v28  ;;  %5852 = vmatprep.subr.bf16.mxu1 %v7834_v25  ;;  %v9326_v28 = vld [vmem:[#allocation26_spill] sm:$0xff]  ;;  %v9327_v25 = vld [vmem:[#allocation27_spill] sm:$0xff] }
 0x5f9   :  { %5822 = vmatpush1.bf16.msra.mxu0 %v7838_v53  ;;  %5854 = vmatpush1.bf16.msra.mxu1 %v7840_v45  ;;  %v9328_v53 = vld [vmem:[#allocation28_spill] sm:$0xff]  ;;  %v9329_v45 = vld [vmem:[#allocation29_spill] sm:$0xff] }
 0x5fa   :  { %5824 = vmatprep.subr.bf16.mxu0 %v7844_v27  ;;  %5856 = vmatprep.subr.bf16.mxu1 %v7846_v35  ;;  %v9330_v27 = vld [vmem:[#allocation30_spill] sm:$0xff]  ;;  %v9331_v35 = vld [vmem:[#allocation31_spill] sm:$0xff] }
 0x5fd   :  { %5826 = vmatpush1.bf16.msra.mxu0 %v8108_v59  ;;  %5858 = vmatpush1.bf16.msra.mxu1 %v7850_v60  ;;  %v9332_v60 = vld [vmem:[#allocation32_spill] sm:$0xff] }
 0x5fe   :  { %5828 = vmatprep.subr.bf16.mxu0 %v8112_v16  ;;  %5860 = vmatprep.subr.bf16.mxu1 %v7854_v42  ;;  %v9333_v42 = vld [vmem:[#allocation33_spill] sm:$0xff] }
 0x601   :  { %5830 = vmatpush1.bf16.msra.mxu0 %v8116_v7  ;;  %5862 = vmatpush1.bf16.msra.mxu1 %v7858_v14  ;;  %v9334_v14 = vld [vmem:[#allocation34_spill] sm:$0xff] }
 0x602   :  { %5864 = vmatprep.subr.bf16.mxu0 %v7866_v58  ;;  %5928 = vmatprep.subr.bf16.mxu1 %v7868_v46  ;;  %v9335_v58 = vld [vmem:[#allocation35_spill] sm:$0xff]  ;;  %v9336_v46 = vld [vmem:[#allocation36_spill] sm:$0xff] }
 0x604   :  { %3085 = vmatmul.mubr.f32.vlgmr.msra.gmra.mrb[18].mxu0 %v2655_v12  ;;  %3156 = vmatmul.mubr.f32.vlgmr.msra.gmra.mrb[22].mxu1 %v2655_v12  ;;  %v9355_v12 = vld [vmem:[#allocation55_spill] sm:$0xff] }
 0x605   :  { %5866 = vmatpush1.bf16.msra.mxu0 %v7870_v51  ;;  %5930 = vmatpush1.bf16.msra.mxu1 %v9316_v30  ;;  %v9337_v51 = vld [vmem:[#allocation37_spill] sm:$0xff] }
 0x606   :  { %5868 = vmatprep.subr.bf16.mxu0 %v9317_v22  ;;  %5932 = vmatprep.subr.bf16.mxu1 %v9318_v55  ;;  %v9362_v30 = vld [vmem:[#allocation65_spill] sm:$0xff]  ;;  %v9363_v22 = vld [vmem:[#allocation64_spill] sm:$0xff]  ;;  %v9364_v55 = vld [vmem:[#allocation66_spill] sm:$0xff] }
 0x609   :  { %5870 = vmatpush1.bf16.msra.mxu0 %v9319_v11  ;;  %5934 = vmatpush1.bf16.msra.mxu1 %v9320_v41  ;;  %v9365_v11 = vld [vmem:[#allocation67_spill] sm:$0xff]  ;;  %v9366_v41 = vld [vmem:[#allocation68_spill] sm:$0xff] }
 0x60a   :  { %5872 = vmatprep.subr.bf16.mxu0 %v9321_v49  ;;  %5936 = vmatprep.subr.bf16.mxu1 %v9322_v1  ;;  %v9367_v49 = vld [vmem:[#allocation69_spill] sm:$0xff]  ;;  %v9368_v1 = vld [vmem:[#allocation70_spill] sm:$0xff] }
 0x60d   :  { %5874 = vmatpush1.bf16.msra.mxu0 %v9323_v32  ;;  %5938 = vmatpush1.bf16.msra.mxu1 %v9324_v63  ;;  %v9369_v32 = vld [vmem:[#allocation71_spill] sm:$0xff]  ;;  %v9370_v63 = vld [vmem:[#allocation72_spill] sm:$0xff] }
 0x60e   :  { %5876 = vmatprep.subr.bf16.mxu0 %v9325_v50  ;;  %5940 = vmatprep.subr.bf16.mxu1 %v9326_v28  ;;  %v9371_v50 = vld [vmem:[#allocation73_spill] sm:$0xff]  ;;  %v9372_v28 = vld [vmem:[#allocation11_spill] sm:$0xff] }
 0x611   :  { %5878 = vmatpush1.bf16.msra.mxu0 %v9327_v25  ;;  %5942 = vmatpush1.bf16.msra.mxu1 %v9328_v53  ;;  %v3491_v25 = vld [vmem:[#allocation4 + $0x8] sm:$0xff] }
 0x612   :  { %5880 = vmatprep.subr.bf16.mxu0 %v9329_v45  ;;  %5944 = vmatprep.subr.bf16.mxu1 %v9330_v27  ;;  %v3495_v53 = vld [vmem:[#allocation4 + $0x28] sm:$0xff]  ;;  %v3493_v45 = vld [vmem:[#allocation4 + $0x18] sm:$0xff] }
 0x613   :  { %v8186_v27 = vpack.c.bf16 %v3495_v53, %v3491_v25 }
 0x615   :  { %5882 = vmatpush1.bf16.msra.mxu0 %v9331_v35  ;;  %5946 = vmatpush1.bf16.msra.mxu1 %v9332_v60 }
 0x616   :  { %5884 = vmatprep.subr.bf16.mxu0 %v9333_v42  ;;  %5948 = vmatprep.subr.bf16.mxu1 %v9334_v14 }
 0x619   :  { %5886 = vmatpush1.bf16.msra.mxu0 %v9335_v58  ;;  %5950 = vmatpush1.bf16.msra.mxu1 %v9336_v46 }
 0x61a   :  { %5888 = vmatprep.subr.bf16.mxu0 %v9337_v51  ;;  %5952 = vmatprep.subr.bf16.mxu1 %v9338_v33  ;;  %v9374_v33 = vld [vmem:[#allocation12_spill] sm:$0xff] }
 0x61d   :  { %5890 = vmatpush1.bf16.msra.mxu0 %v9339_v13  ;;  %5954 = vmatpush1.bf16.msra.mxu1 %v9340_v18 }
 0x61e   :  { %5892 = vmatprep.subr.bf16.mxu0 %v9341_v56  ;;  %5956 = vmatprep.subr.bf16.mxu1 %v9342_v24  ;;  %v9375_v56 = vld [vmem:[#allocation13_spill] sm:$0xff] }
 0x621   :  { %5894 = vmatpush1.bf16.msra.mxu0 %v9343_v52  ;;  %5958 = vmatpush1.bf16.msra.mxu1 %v9344_v40 }
 0x622   :  { %5896 = vmatprep.subr.bf16.mxu0 %v9345_v54  ;;  %5960 = vmatprep.subr.bf16.mxu1 %v9346_v2 }
 0x625   :  { %5898 = vmatpush1.bf16.msra.mxu0 %v9347_v36  ;;  %5962 = vmatpush1.bf16.msra.mxu1 %v9348_v31  ;;  %v103_v31 = vpop.permute.xlu1 %102 }
 0x626   :  { %5900 = vmatprep.subr.bf16.mxu0 %v9349_v8  ;;  %5964 = vmatprep.subr.bf16.mxu1 %v9350_v19  ;;  %v9376_v19 = vld [vmem:[#allocation61_spill] sm:$0xff] }
 0x629   :  { %5902 = vmatpush1.bf16.msra.mxu0 %v9351_v34  ;;  %5966 = vmatpush1.bf16.msra.mxu1 %v9352_v21  ;;  %v156_v34 = vmul.f32 %v9376_v19, %v103_v31 }
 0x62a   :  { %5904 = vmatprep.subr.bf16.mxu0 %v9353_v10  ;;  %5968 = vmatprep.subr.bf16.mxu1 %v9354_v9  ;;  %v9377_v10 = vld [vmem:[#allocation60_spill] sm:$0xff] }
 0x62b   :  { %v157_v9 = vmul.f32 %v9377_v10, %v103_v31 }
 0x62d   :  { %5906 = vmatpush1.bf16.msra.mxu0 %v9355_v12  ;;  %5970 = vmatpush1.bf16.msra.mxu1 %v9356_v62 }
 0x62e   :  { %5908 = vmatprep.subr.bf16.mxu0 %v9357_v43  ;;  %5972 = vmatprep.subr.bf16.mxu1 %v9358_v0 }
 0x631   :  { %5910 = vmatpush1.bf16.msra.mxu0 %v9359_v37  ;;  %5974 = vmatpush1.bf16.msra.mxu1 %v9360_v57  ;;  %v210_v37 = vadd.f32 %v9131_v26, %v156_v34  ;;  %v3499_v34 = vld [vmem:[#allocation4 + $0x48] sm:$0xff] }
 0x632   :  { %5912 = vmatprep.subr.bf16.mxu0 %v9361_v4  ;;  %5976 = vmatprep.subr.bf16.mxu1 %v9362_v30  ;;  %v211_v30 = vadd.f32 %v9132_v6, %v157_v9  ;;  %v3501_v9 = vld [vmem:[#allocation4 + $0x58] sm:$0xff] }
 0x635   :  { %5914 = vmatpush1.bf16.msra.mxu0 %v9363_v22  ;;  %5978 = vmatpush1.bf16.msra.mxu1 %v9364_v55 }
 0x636   :  { %5916 = vmatprep.subr.bf16.mxu0 %v9365_v11  ;;  %5980 = vmatprep.subr.bf16.mxu1 %v9366_v41 }
 0x639   :  { %5918 = vmatpush1.bf16.msra.mxu0 %v9367_v49  ;;  %5982 = vmatpush1.bf16.msra.mxu1 %v9368_v1  ;;  %v159_v1 = vmul.f32 %v9133_v23, %v103_v31 }
 0x63a   :  { %5920 = vmatprep.subr.bf16.mxu0 %v8033_v29  ;;  %5984 = vmatprep.subr.bf16.mxu1 %v8035_v3  ;;  %v3497_v29 = vld [vmem:[#allocation4 + $0x38] sm:$0xff] }
 0x63b   :  { %v8188_v35 = vpack.c.bf16 %v3497_v29, %v3493_v45 }
 0x63d   :  { %5922 = vmatpush1.bf16.msra.mxu0 %v8038_v17  ;;  %5986 = vmatpush1.bf16.msra.mxu1 %v8042_v48  ;;  %v9373_v17 = vld [vmem:[#allocation10_spill] sm:$0xff] }
 0x63e   :  { %5924 = vmatprep.subr.bf16.mxu0 %v9369_v32  ;;  %5988 = vmatprep.subr.bf16.mxu1 %v9370_v63 }
 0x641   :  { %5926 = vmatpush1.bf16.msra.mxu0 %v9371_v50  ;;  %5990 = vmatpush1.bf16.msra.mxu1 %v9372_v28  ;;  %v158_v50 = vmul.f32 %v9134_v15, %v103_v31  ;;  %v3492_v31 = vld [vmem:[#allocation4 + $0x10] sm:$0xff] }
 0x642   :  { %5992 = vmatprep.subr.bf16.mxu0 %v8186_v27  ;;  %6024 = vmatprep.subr.bf16.mxu1 %v8188_v35 }
 0x643   :  { %v212_v53 = vadd.f32 %v9135_v39, %v158_v50 }
 0x6b7   :  { %v2850_v48 = vpop.f32.mrb[16].mxu0  ;;  %v2921_v3 = vpop.f32.mrb[20].mxu1 }
 0x6b8   :  { %v2851_v60 = vadd.f32 %v2850_v48, %v9373_v17  ;;  %v2852_v42 = vpop.f32.mrb[17].mxu0  ;;  %v2923_v14 = vpop.f32.mrb[21].mxu1  ;;  %v2922_v24 = vadd.f32 %v2921_v3, %v9375_v56 }
 0x6b9   :  { %v2853_v58 = vadd.f32 %v2852_v42, %v9252_v44  ;;  %v2924_v13 = vadd.f32 %v2923_v14, %v9374_v33 }
 0x6ba   :  { %v4747_v46 = vmul.f32 -1.442695, %v2851_v60 }
 0x6bb   :  { %v4748_v51 = vmul.f32 -1.442695, %v2853_v58  ;;  %v4749_v18 = vmul.f32 -1.442695, %v2924_v13 }
 0x6bc   :  { %6559 = vpow2.f32 %v4747_v46 }
 0x6bd   :  { %6561 = vpow2.f32 %v4748_v51 }
 0x6be   :  { %6563 = vpow2.f32 %v4749_v18 }
 0x6bf   :  { %6565 = vtanh.f32 %v2922_v24 }
 0x6c6   :  { %v6560_v52 = vpop.eup %6559 }
 0x6c7   :  { %v6562_v40 = vpop.eup %6561  ;;  %v2929_v54 = vadd.f32 1.0, %v6560_v52 }
 0x6c8   :  { %v2935_v2 = vadd.f32 1.0, %v6562_v40  ;;  %v6564_v36 = vpop.eup %6563 }
 0x6c9   :  { %6567 = vrcp.f32 %v2929_v54  ;;  %v6566_v8 = vpop.eup %6565  ;;  %v2942_v43 = vadd.f32 1.0, %v6564_v36  ;;  %v3494_v36 = vld [vmem:[#allocation4 + $0x20] sm:$0xff] }
 0x6ca   :  { %6569 = vrcp.f32 %v2935_v2  ;;  %v3490_v2 = vld [vmem:[#allocation4] sm:$0xff] }
 0x6cb   :  { %6571 = vrcp.f32 %v2942_v43 }
 0x6d3   :  { %v6568_v21 = vpop.eup %6567 }
 0x6d4   :  { %v6570_v12 = vpop.eup %6569  ;;  %v2946_v62 = vmul.f32 %v6568_v21, %v6566_v8  ;;  %v3496_v8 = vld [vmem:[#allocation4 + $0x30] sm:$0xff]  ;;  %v3503_v21 = vld [vmem:[#allocation4 + $0x68] sm:$0xff] }
 0x6d5   :  { %v2945_v0 = vmul.f32 %v6570_v12, %v8069_v20  ;;  %v213_v20 = vadd.f32 %v7161_v47, %v159_v1  ;;  %v6572_v25 = vpop.eup %6571  ;;  %v3505_v12 = vld [vmem:[#allocation4 + $0x78] sm:$0xff]  ;;  %v3511_v1 = vld [vmem:[#allocation4 + $0xa8] sm:$0xff] }
 0x6d7   :  { %v3086_v57 = vpop.f32.mrb[18].mxu0  ;;  %v3157_v4 = vpop.f32.mrb[22].mxu1  ;;  %v8201_v22 = vadd.f32 %v2946_v62, %v2945_v0  ;;  %v8216_v0 = vpack.c.bf16 %v3494_v36, %v3490_v2  ;;  %v3520_v2 = vld [vmem:[#allocation4 + $0xf0] sm:$0xff]  ;;  %v3523_v36 = vld [vmem:[#allocation4 + $0x108] sm:$0xff] }
 0x6d8   :  { %v3162_v55 = vadd.f32 %v3086_v57, %v210_v37  ;;  %v3088_v11 = vpop.f32.mrb[19].mxu0  ;;  %v3159_v41 = vpop.f32.mrb[23].mxu1  ;;  %v3164_v48 = vadd.f32 %v3157_v4, %v212_v53  ;;  %v8218_v37 = vpack.c.bf16 %v3496_v8, %v3492_v31  ;;  %v3502_v57 = vld [vmem:[#allocation4 + $0x60] sm:$0xff]  ;;  %v3527_v31 = vld [vmem:[#allocation4 + $0x128] sm:$0xff]  ;;  %v3525_v8 = vld [vmem:[#allocation4 + $0x118] sm:$0xff] }
 0x6d9   :  { %v3163_v49 = vadd.f32 %v3088_v11, %v211_v30  ;;  %6573 = vtanh.f32 %v8201_v22  ;;  %v3165_v28 = vadd.f32 %v3159_v41, %v213_v20  ;;  %v8222_v30 = vpack.c.bf16 %v3503_v21, %v3499_v34  ;;  %v3500_v11 = vld [vmem:[#allocation4 + $0x50] sm:$0xff]  ;;  %v3529_v34 = vld [vmem:[#allocation4 + $0x138] sm:$0xff] }
 0x6da   :  { %v4750_v32 = vmul.f32 -1.442695, %v3162_v55  ;;  %v8224_v55 = vpack.c.bf16 %v3505_v12, %v3501_v9  ;;  %v3504_v41 = vld [vmem:[#allocation4 + $0x70] sm:$0xff]  ;;  %v3522_v12 = vld [vmem:[#allocation4 + $0x100] sm:$0xff] }
 0x6db   :  { %v4751_v63 = vmul.f32 -1.442695, %v3163_v49  ;;  %v4752_v29 = vmul.f32 -1.442695, %v3165_v28  ;;  %v3507_v49 = vld [vmem:[#allocation4 + $0x88] sm:$0xff]  ;;  %v8232_v50 = vpack.c.bf16 %v3504_v41, %v3500_v11  ;;  %v3506_v28 = vld [vmem:[#allocation4 + $0x80] sm:$0xff] }
 0x6dc   :  { %6575 = vpow2.f32 %v4750_v32  ;;  %v3509_v32 = vld [vmem:[#allocation4 + $0x98] sm:$0xff]  ;;  %v8236_v53 = vpack.c.bf16 %v3511_v1, %v3507_v49  ;;  %v3528_v11 = vld [vmem:[#allocation4 + $0x130] sm:$0xff]  ;;  %v3531_v41 = vld [vmem:[#allocation4 + $0x148] sm:$0xff] }
 0x6dd   :  { %6577 = vpow2.f32 %v4751_v63  ;;  %v3513_v63 = vld [vmem:[#allocation4 + $0xb8] sm:$0xff]  ;;  %v3535_v49 = vld [vmem:[#allocation4 + $0x168] sm:$0xff] }
 0x6de   :  { %6579 = vpow2.f32 %v4752_v29  ;;  %v3508_v29 = vld [vmem:[#allocation4 + $0x90] sm:$0xff]  ;;  %v3533_v1 = vld [vmem:[#allocation4 + $0x158] sm:$0xff] }
 0x6df   :  { %6581 = vtanh.f32 %v3164_v48  ;;  %v3512_v48 = vld [vmem:[#allocation4 + $0xb0] sm:$0xff] }
 0x6e3   :  { %v6574_v45 = vpop.eup %6573 }
 0x6e4   :  { %v8208_v3 = vmul.f32 %v6574_v45, %v6572_v25  ;;  %v3510_v25 = vld [vmem:[#allocation4 + $0xa0] sm:$0xff]  ;;  %v8238_v45 = vpack.c.bf16 %v3513_v63, %v3509_v32  ;;  %v3537_v32 = vld [vmem:[#allocation4 + $0x178] sm:$0xff] }
 0x6e6   :  { %9378 = vst [vmem:[#allocation16_spill] sm:$0xff] %v8208_v3  ;;  %v6576_v60 = vpop.eup %6575  ;;  %3382 = vmatprep.mubr.f32.mxu0 %v8208_v3  ;;  %3453 = vmatprep.mubr.f32.mxu1 %v8208_v3 }
 0x6e7   :  { %v6578_v42 = vpop.eup %6577  ;;  %v3169_v14 = vadd.f32 1.0, %v6576_v60  ;;  %v3515_v60 = vld [vmem:[#allocation4 + $0xc8] sm:$0xff] }
 0x6e8   :  { %v3175_v58 = vadd.f32 1.0, %v6578_v42  ;;  %v6580_v46 = vpop.eup %6579  ;;  %v3519_v42 = vld [vmem:[#allocation4 + $0xe8] sm:$0xff] }
 0x6e9   :  { %6583 = vrcp.f32 %v3169_v14  ;;  %v6582_v51 = vpop.eup %6581  ;;  %v3182_v52 = vadd.f32 1.0, %v6580_v46  ;;  %v3517_v14 = vld [vmem:[#allocation4 + $0xd8] sm:$0xff]  ;;  %v8244_v46 = vpack.c.bf16 %v3510_v25, %v3506_v28  ;;  %v3530_v25 = vld [vmem:[#allocation4 + $0x140] sm:$0xff] }
 0x6ea   :  { %6585 = vrcp.f32 %v3175_v58  ;;  %v3521_v58 = vld [vmem:[#allocation4 + $0xf8] sm:$0xff] }
 0x6eb   :  { %6587 = vrcp.f32 %v3182_v52  ;;  %v8252_v52 = vpack.c.bf16 %v3521_v58, %v3517_v14  ;;  %v3536_v14 = vld [vmem:[#allocation4 + $0x170] sm:$0xff]  ;;  %v3539_v58 = vld [vmem:[#allocation4 + $0x188] sm:$0xff] }
 0x6f3   :  { %v6584_v13 = vpop.eup %6583 }
 0x6f4   :  { %v6586_v18 = vpop.eup %6585  ;;  %v3186_v24 = vmul.f32 %v6584_v13, %v6582_v51  ;;  %v8246_v51 = vpack.c.bf16 %v3512_v48, %v3508_v29  ;;  %v3514_v13 = vld [vmem:[#allocation4 + $0xc0] sm:$0xff]  ;;  %v8274_v48 = vpack.c.bf16 %v3535_v49, %v3531_v41  ;;  %v3548_v49 = vld [vmem:[#allocation4 + $0x1d0] sm:$0xff] }
 0x6f5   :  { %v3185_v40 = vmul.f32 %v6586_v18, %v8081_v38  ;;  %v6588_v62 = vpop.eup %6587  ;;  %v3498_v38 = vld [vmem:[#allocation4 + $0x40] sm:$0xff] }
 0x6f6   :  { %v8230_v20 = vpack.c.bf16 %v3502_v57, %v3498_v38  ;;  %v3518_v18 = vld [vmem:[#allocation4 + $0xe0] sm:$0xff]  ;;  %v8264_v38 = vpack.c.bf16 %v3529_v34, %v3525_v8  ;;  %v3524_v57 = vld [vmem:[#allocation4 + $0x110] sm:$0xff] }
 0x6f7   :  { %v8213_v54 = vadd.f32 %v3186_v24, %v3185_v40  ;;  %v8250_v24 = vpack.c.bf16 %v3519_v42, %v3515_v60  ;;  %v3516_v40 = vld [vmem:[#allocation4 + $0xd0] sm:$0xff]  ;;  %v8256_v21 = vpack.c.bf16 %v3518_v18, %v3514_v13  ;;  %v8270_v28 = vpack.c.bf16 %v3528_v11, %v3524_v57  ;;  %v3534_v29 = vld [vmem:[#allocation4 + $0x160] sm:$0xff]  ;;  %v3543_v13 = vld [vmem:[#allocation4 + $0x1a8] sm:$0xff] }
 0x6f8   :  { %v8258_v9 = vpack.c.bf16 %v3520_v2, %v3516_v40  ;;  %v8276_v60 = vpack.c.bf16 %v3537_v32, %v3533_v1  ;;  %v3532_v42 = vld [vmem:[#allocation4 + $0x150] sm:$0xff]  ;;  %v3541_v18 = vld [vmem:[#allocation4 + $0x198] sm:$0xff]  ;;  %v8280_v2 = vpack.c.bf16 %v3534_v29, %v3530_v25  ;;  %v3725_v25 = vld [vmem:[#allocation6 + $0x8] sm:$0xff] }
 0x6f9   :  { %6589 = vtanh.f32 %v8213_v54  ;;  %v3545_v40 = vld [vmem:[#allocation4 + $0x1b8] sm:$0xff]  ;;  %v3540_v34 = vld [vmem:[#allocation4 + $0x190] sm:$0xff]  ;;  %v3729_v29 = vld [vmem:[#allocation6 + $0x28] sm:$0xff] }
 0x6fa   :  { %v8288_v8 = vpack.c.bf16 %v3545_v40, %v3541_v18  ;;  %v3553_v57 = vld [vmem:[#allocation4 + $0x1f8] sm:$0xff]  ;;  %v3552_v1 = vld [vmem:[#allocation4 + $0x1f0] sm:$0xff] }
 0x6fb   :  { %v8300_v32 = vpack.c.bf16 %v3552_v1, %v3548_v49  ;;  %v3726_v40 = vld [vmem:[#allocation6 + $0x10] sm:$0xff]  ;;  %v3739_v49 = vld [vmem:[#allocation6 + $0x78] sm:$0xff]  ;;  %v3732_v1 = vld [vmem:[#allocation6 + $0x40] sm:$0xff] }
 0x703   :  { %v6590_v43 = vpop.eup %6589 }
 0x704   :  { %v8220_v4 = vmul.f32 %v6590_v43, %v6588_v62  ;;  %v3526_v62 = vld [vmem:[#allocation4 + $0x120] sm:$0xff]  ;;  %v8262_v43 = vpack.c.bf16 %v3527_v31, %v3523_v36  ;;  %v8282_v36 = vpack.c.bf16 %v3536_v14, %v3532_v42  ;;  %v8286_v31 = vpack.c.bf16 %v3543_v13, %v3539_v58  ;;  %v3727_v42 = vld [vmem:[#allocation6 + $0x18] sm:$0xff] }
 0x705   :  { %v8268_v63 = vpack.c.bf16 %v3526_v62, %v3522_v12  ;;  %v3544_v12 = vld [vmem:[#allocation4 + $0x1b0] sm:$0xff]  ;;  %v3549_v62 = vld [vmem:[#allocation4 + $0x1d8] sm:$0xff]  ;;  %v3724_v58 = vld [vmem:[#allocation6] sm:$0xff] }
 0x706   :  { %3383 = vmatmul.mubr.f32.vlgmr.msra.gmra.mrb[20].mxu0 %v8220_v4  ;;  %3454 = vmatmul.mubr.f32.vlgmr.msra.gmra.mrb[24].mxu1 %v8220_v4  ;;  %v8292_v11 = vpack.c.bf16 %v3544_v12, %v3540_v34  ;;  %v8296_v41 = vpack.c.bf16 %v3553_v57, %v3549_v62  ;;  %v3731_v14 = vld [vmem:[#allocation6 + $0x38] sm:$0xff]  ;;  %v3728_v13 = vld [vmem:[#allocation6 + $0x20] sm:$0xff]  ;;  %v3737_v12 = vld [vmem:[#allocation6 + $0x68] sm:$0xff] }
 0x707   :  { %5994 = vmatpush1.bf16.msra.mxu0 %v8216_v0  ;;  %6026 = vmatpush1.bf16.msra.mxu1 %v8218_v37  ;;  %v8310_v18 = vpack.c.bf16 %v3731_v14, %v3727_v42  ;;  %v3735_v62 = vld [vmem:[#allocation6 + $0x58] sm:$0xff]  ;;  %v3734_v14 = vld [vmem:[#allocation6 + $0x50] sm:$0xff] }
 0x708   :  { %5996 = vmatprep.subr.bf16.mxu0 %v8222_v30  ;;  %6028 = vmatprep.subr.bf16.mxu1 %v8224_v55 }
 0x709   :  { %3618 = vmatprep.mubr.f32.mxu0 %v9074_v61  ;;  %3689 = vmatprep.mubr.f32.mxu1 %v9074_v61 }
 0x70b   :  { %5998 = vmatpush1.bf16.msra.mxu0 %v8230_v20  ;;  %6030 = vmatpush1.bf16.msra.mxu1 %v8232_v50 }
 0x70c   :  { %6000 = vmatprep.subr.bf16.mxu0 %v8236_v53  ;;  %6032 = vmatprep.subr.bf16.mxu1 %v8238_v45 }
 0x70f   :  { %6002 = vmatpush1.bf16.msra.mxu0 %v8244_v46  ;;  %6034 = vmatpush1.bf16.msra.mxu1 %v8246_v51 }
 0x710   :  { %6004 = vmatprep.subr.bf16.mxu0 %v8250_v24  ;;  %6036 = vmatprep.subr.bf16.mxu1 %v8252_v52 }
 0x713   :  { %6006 = vmatpush1.bf16.msra.mxu0 %v8256_v21  ;;  %6038 = vmatpush1.bf16.msra.mxu1 %v8258_v9 }
 0x714   :  { %6008 = vmatprep.subr.bf16.mxu0 %v8262_v43  ;;  %6040 = vmatprep.subr.bf16.mxu1 %v8264_v38 }
 0x717   :  { %6010 = vmatpush1.bf16.msra.mxu0 %v8268_v63  ;;  %6042 = vmatpush1.bf16.msra.mxu1 %v8270_v28 }
 0x718   :  { %6012 = vmatprep.subr.bf16.mxu0 %v8274_v48  ;;  %6044 = vmatprep.subr.bf16.mxu1 %v8276_v60 }
 0x71b   :  { %6014 = vmatpush1.bf16.msra.mxu0 %v8280_v2  ;;  %6046 = vmatpush1.bf16.msra.mxu1 %v8282_v36 }
 0x71c   :  { %6016 = vmatprep.subr.bf16.mxu0 %v8286_v31  ;;  %6048 = vmatprep.subr.bf16.mxu1 %v8288_v8 }
 0x71f   :  { %6018 = vmatpush1.bf16.msra.mxu0 %v8108_v59  ;;  %6050 = vmatpush1.bf16.msra.mxu1 %v8292_v11  ;;  %v8308_v59 = vpack.c.bf16 %v3729_v29, %v3725_v25  ;;  %v3736_v25 = vld [vmem:[#allocation6 + $0x60] sm:$0xff]  ;;  %v8322_v29 = vpack.c.bf16 %v3739_v49, %v3735_v62  ;;  %v3747_v62 = vld [vmem:[#allocation6 + $0xb8] sm:$0xff] }
 0x720   :  { %6020 = vmatprep.subr.bf16.mxu0 %v8112_v16  ;;  %6052 = vmatprep.subr.bf16.mxu1 %v8296_v41  ;;  %v8312_v16 = vpack.c.bf16 %v3728_v13, %v3724_v58  ;;  %v8324_v42 = vpack.c.bf16 %v3736_v25, %v3732_v1  ;;  %v3738_v58 = vld [vmem:[#allocation6 + $0x70] sm:$0xff]  ;;  %v3740_v49 = vld [vmem:[#allocation6 + $0x80] sm:$0xff] }
 0x721   :  { %9381 = vst [vmem:[#allocation19_spill] sm:$0xff] %v8322_v29  ;;  %v8327_v13 = vpack.c.bf16 %v3738_v58, %v3734_v14  ;;  %v3744_v1 = vld [vmem:[#allocation6 + $0xa0] sm:$0xff]  ;;  %v3742_v14 = vld [vmem:[#allocation6 + $0x90] sm:$0xff] }
 0x722   :  { %9382 = vst [vmem:[#allocation20_spill] sm:$0xff] %v8324_v42  ;;  %v8336_v3 = vpack.c.bf16 %v3744_v1, %v3740_v49  ;;  %v3746_v58 = vld [vmem:[#allocation6 + $0xb0] sm:$0xff]  ;;  %v3752_v49 = vld [vmem:[#allocation6 + $0xe0] sm:$0xff] }
 0x723   :  { %6022 = vmatpush1.bf16.msra.mxu0 %v8116_v7  ;;  %6054 = vmatpush1.bf16.msra.mxu1 %v8300_v32  ;;  %v3730_v7 = vld [vmem:[#allocation6 + $0x30] sm:$0xff]  ;;  %9383 = vst [vmem:[#allocation21_spill] sm:$0xff] %v8327_v13  ;;  %v8339_v5 = vpack.c.bf16 %v3746_v58, %v3742_v14 }
 0x724   :  { %6056 = vmatprep.subr.bf16.mxu0 %v8308_v59  ;;  %v8315_v34 = vpack.c.bf16 %v3730_v7, %v3726_v40  ;;  %6120 = vmatprep.subr.bf16.mxu1 %v8310_v18  ;;  %v3741_v40 = vld [vmem:[#allocation6 + $0x88] sm:$0xff]  ;;  %9386 = vst [vmem:[#allocation24_spill] sm:$0xff] %v8336_v3  ;;  %v3750_v14 = vld [vmem:[#allocation6 + $0xd0] sm:$0xff] }
 0x725   :  { %v3745_v7 = vld [vmem:[#allocation6 + $0xa8] sm:$0xff]  ;;  %9387 = vst [vmem:[#allocation25_spill] sm:$0xff] %v8339_v5  ;;  %v3754_v58 = vld [vmem:[#allocation6 + $0xf0] sm:$0xff] }
 0x726   :  { %3619 = vmatmul.mubr.f32.vlgmr.msra.gmra.mrb[22].mxu0 %v8220_v4  ;;  %3690 = vmatmul.mubr.f32.vlgmr.msra.gmra.mrb[26].mxu1 %v8220_v4  ;;  %9379 = vst [vmem:[#allocation17_spill] sm:$0xff] %v8315_v34  ;;  %v3733_v4 = vld [vmem:[#allocation6 + $0x48] sm:$0xff] }
 0x727   :  { %6058 = vmatpush1.bf16.msra.mxu0 %v8312_v16  ;;  %6122 = vmatpush1.bf16.msra.mxu1 %v8315_v34  ;;  %v8320_v57 = vpack.c.bf16 %v3737_v12, %v3733_v4  ;;  %v3743_v4 = vld [vmem:[#allocation6 + $0x98] sm:$0xff]  ;;  %v8332_v12 = vpack.c.bf16 %v3745_v7, %v3741_v40  ;;  %v3753_v40 = vld [vmem:[#allocation6 + $0xe8] sm:$0xff] }
 0x728   :  { %6124 = vmatprep.subr.bf16.mxu1 %v8322_v29  ;;  %v8334_v25 = vpack.c.bf16 %v3747_v62, %v3743_v4  ;;  %v3751_v7 = vld [vmem:[#allocation6 + $0xd8] sm:$0xff]  ;;  %v3748_v62 = vld [vmem:[#allocation6 + $0xc0] sm:$0xff] }
 0x729   :  { %9380 = vst [vmem:[#allocation18_spill] sm:$0xff] %v8320_v57  ;;  %6060 = vmatprep.subr.bf16.mxu0 %v8320_v57  ;;  %9384 = vst [vmem:[#allocation22_spill] sm:$0xff] %v8332_v12  ;;  %v3755_v4 = vld [vmem:[#allocation6 + $0xf8] sm:$0xff]  ;;  %v8348_v29 = vpack.c.bf16 %v3752_v49, %v3748_v62  ;;  %v3760_v62 = vld [vmem:[#allocation6 + $0x120] sm:$0xff] }
 0x72a   :  { %9385 = vst [vmem:[#allocation23_spill] sm:$0xff] %v8334_v25  ;;  %v8346_v1 = vpack.c.bf16 %v3755_v4, %v3751_v7  ;;  %v3763_v7 = vld [vmem:[#allocation6 + $0x138] sm:$0xff]  ;;  %v3756_v4 = vld [vmem:[#allocation6 + $0x100] sm:$0xff] }
 0x72b   :  { %6062 = vmatpush1.bf16.msra.mxu0 %v8324_v42  ;;  %6126 = vmatpush1.bf16.msra.mxu1 %v8327_v13  ;;  %v3749_v13 = vld [vmem:[#allocation6 + $0xc8] sm:$0xff]  ;;  %9390 = vst [vmem:[#allocation28_spill] sm:$0xff] %v8348_v29  ;;  %v3839_v57 = vld [vmem:[#allocation6 + $0x398] sm:$0xff] }
 0x72c   :  { %6064 = vmatprep.subr.bf16.mxu0 %v8332_v12  ;;  %6128 = vmatprep.subr.bf16.mxu1 %v8334_v25  ;;  %v8344_v42 = vpack.c.bf16 %v3753_v40, %v3749_v13  ;;  %9389 = vst [vmem:[#allocation27_spill] sm:$0xff] %v8346_v1  ;;  %v8351_v25 = vpack.c.bf16 %v3754_v58, %v3750_v14  ;;  %v3761_v13 = vld [vmem:[#allocation6 + $0x128] sm:$0xff]  ;;  %v3759_v40 = vld [vmem:[#allocation6 + $0x118] sm:$0xff]  ;;  %v3758_v14 = vld [vmem:[#allocation6 + $0x110] sm:$0xff] }
 0x72d   :  { %v8358_v49 = vpack.c.bf16 %v3763_v7, %v3759_v40  ;;  %v8360_v12 = vpack.c.bf16 %v3760_v62, %v3756_v4  ;;  %v3762_v58 = vld [vmem:[#allocation6 + $0x130] sm:$0xff]  ;;  %v3771_v40 = vld [vmem:[#allocation6 + $0x178] sm:$0xff]  ;;  %v3764_v7 = vld [vmem:[#allocation6 + $0x140] sm:$0xff] }
 0x72e   :  { %9388 = vst [vmem:[#allocation26_spill] sm:$0xff] %v8344_v42  ;;  %9391 = vst [vmem:[#allocation29_spill] sm:$0xff] %v8351_v25  ;;  %v3768_v4 = vld [vmem:[#allocation6 + $0x160] sm:$0xff]  ;;  %v3843_v34 = vld [vmem:[#allocation6 + $0x3b8] sm:$0xff] }
 0x72f   :  { %6066 = vmatpush1.bf16.msra.mxu0 %v8336_v3  ;;  %6130 = vmatpush1.bf16.msra.mxu1 %v8339_v5  ;;  %v3757_v5 = vld [vmem:[#allocation6 + $0x108] sm:$0xff]  ;;  %9393 = vst [vmem:[#allocation31_spill] sm:$0xff] %v8358_v49  ;;  %9394 = vst [vmem:[#allocation32_spill] sm:$0xff] %v8360_v12 }
 0x730   :  { %6068 = vmatprep.subr.bf16.mxu0 %v8344_v42  ;;  %6132 = vmatprep.subr.bf16.mxu1 %v8346_v1  ;;  %v8356_v3 = vpack.c.bf16 %v3761_v13, %v3757_v5  ;;  %v8363_v1 = vpack.c.bf16 %v3762_v58, %v3758_v14  ;;  %v3765_v5 = vld [vmem:[#allocation6 + $0x148] sm:$0xff]  ;;  %v8372_v42 = vpack.c.bf16 %v3768_v4, %v3764_v7  ;;  %v3766_v14 = vld [vmem:[#allocation6 + $0x150] sm:$0xff]  ;;  %v3776_v7 = vld [vmem:[#allocation6 + $0x1a0] sm:$0xff] }
 0x731   :  { %v3769_v13 = vld [vmem:[#allocation6 + $0x168] sm:$0xff]  ;;  %v3770_v58 = vld [vmem:[#allocation6 + $0x170] sm:$0xff] }
 0x732   :  { %9392 = vst [vmem:[#allocation30_spill] sm:$0xff] %v8356_v3  ;;  %9395 = vst [vmem:[#allocation33_spill] sm:$0xff] %v8363_v1 }
 0x733   :  { %6070 = vmatpush1.bf16.msra.mxu0 %v8348_v29  ;;  %6134 = vmatpush1.bf16.msra.mxu1 %v8351_v25  ;;  %v3767_v25 = vld [vmem:[#allocation6 + $0x158] sm:$0xff]  ;;  %v8368_v29 = vpack.c.bf16 %v3769_v13, %v3765_v5  ;;  %9398 = vst [vmem:[#allocation36_spill] sm:$0xff] %v8372_v42  ;;  %v3777_v5 = vld [vmem:[#allocation6 + $0x1a8] sm:$0xff] }
 0x734   :  { %6072 = vmatprep.subr.bf16.mxu0 %v8356_v3  ;;  %6136 = vmatprep.subr.bf16.mxu1 %v8358_v49  ;;  %v8370_v62 = vpack.c.bf16 %v3771_v40, %v3767_v25  ;;  %v8375_v49 = vpack.c.bf16 %v3770_v58, %v3766_v14  ;;  %v3775_v13 = vld [vmem:[#allocation6 + $0x198] sm:$0xff]  ;;  %v3772_v40 = vld [vmem:[#allocation6 + $0x180] sm:$0xff]  ;;  %v3774_v14 = vld [vmem:[#allocation6 + $0x190] sm:$0xff] }
 0x735   :  { %9396 = vst [vmem:[#allocation34_spill] sm:$0xff] %v8368_v29  ;;  %v3779_v25 = vld [vmem:[#allocation6 + $0x1b8] sm:$0xff]  ;;  %v8384_v3 = vpack.c.bf16 %v3776_v7, %v3772_v40  ;;  %v3778_v58 = vld [vmem:[#allocation6 + $0x1b0] sm:$0xff]  ;;  %v3784_v40 = vld [vmem:[#allocation6 + $0x1e0] sm:$0xff] }
 0x736   :  { %9397 = vst [vmem:[#allocation35_spill] sm:$0xff] %v8370_v62  ;;  %9399 = vst [vmem:[#allocation37_spill] sm:$0xff] %v8375_v49  ;;  %v8382_v4 = vpack.c.bf16 %v3779_v25, %v3775_v13  ;;  %v3787_v13 = vld [vmem:[#allocation6 + $0x1f8] sm:$0xff]  ;;  %v3780_v25 = vld [vmem:[#allocation6 + $0x1c0] sm:$0xff] }
 0x737   :  { %6074 = vmatpush1.bf16.msra.mxu0 %v8360_v12  ;;  %6138 = vmatpush1.bf16.msra.mxu1 %v8363_v1  ;;  %v3773_v1 = vld [vmem:[#allocation6 + $0x188] sm:$0xff]  ;;  %9402 = vst [vmem:[#allocation40_spill] sm:$0xff] %v8384_v3 }
 0x738   :  { %6076 = vmatprep.subr.bf16.mxu0 %v8368_v29  ;;  %6140 = vmatprep.subr.bf16.mxu1 %v8370_v62  ;;  %v8380_v12 = vpack.c.bf16 %v3777_v5, %v3773_v1  ;;  %9401 = vst [vmem:[#allocation39_spill] sm:$0xff] %v8382_v4  ;;  %v8387_v62 = vpack.c.bf16 %v3778_v58, %v3774_v14  ;;  %v3785_v1 = vld [vmem:[#allocation6 + $0x1e8] sm:$0xff]  ;;  %v3783_v5 = vld [vmem:[#allocation6 + $0x1d8] sm:$0xff]  ;;  %v3782_v14 = vld [vmem:[#allocation6 + $0x1d0] sm:$0xff] }
 0x739   :  { %v8394_v7 = vpack.c.bf16 %v3787_v13, %v3783_v5  ;;  %v8396_v29 = vpack.c.bf16 %v3784_v40, %v3780_v25  ;;  %v3786_v58 = vld [vmem:[#allocation6 + $0x1f0] sm:$0xff]  ;;  %v3795_v5 = vld [vmem:[#allocation6 + $0x238] sm:$0xff]  ;;  %v3788_v13 = vld [vmem:[#allocation6 + $0x200] sm:$0xff] }
 0x73a   :  { %9400 = vst [vmem:[#allocation38_spill] sm:$0xff] %v8380_v12  ;;  %9403 = vst [vmem:[#allocation41_spill] sm:$0xff] %v8387_v62  ;;  %v3792_v25 = vld [vmem:[#allocation6 + $0x220] sm:$0xff] }
 0x73b   :  { %6078 = vmatpush1.bf16.msra.mxu0 %v8372_v42  ;;  %6142 = vmatpush1.bf16.msra.mxu1 %v8375_v49  ;;  %v3781_v49 = vld [vmem:[#allocation6 + $0x1c8] sm:$0xff]  ;;  %9405 = vst [vmem:[#allocation43_spill] sm:$0xff] %v8394_v7  ;;  %9406 = vst [vmem:[#allocation44_spill] sm:$0xff] %v8396_v29 }
 0x73c   :  { %6080 = vmatprep.subr.bf16.mxu0 %v8380_v12  ;;  %6144 = vmatprep.subr.bf16.mxu1 %v8382_v4  ;;  %v8392_v42 = vpack.c.bf16 %v3785_v1, %v3781_v49  ;;  %v8399_v4 = vpack.c.bf16 %v3786_v58, %v3782_v14  ;;  %v3793_v49 = vld [vmem:[#allocation6 + $0x228] sm:$0xff]  ;;  %v3791_v1 = vld [vmem:[#allocation6 + $0x218] sm:$0xff]  ;;  %v8408_v12 = vpack.c.bf16 %v3792_v25, %v3788_v13  ;;  %v3790_v14 = vld [vmem:[#allocation6 + $0x210] sm:$0xff] }
 0x73d   :  { %v8406_v40 = vpack.c.bf16 %v3795_v5, %v3791_v1  ;;  %v3794_v58 = vld [vmem:[#allocation6 + $0x230] sm:$0xff]  ;;  %v3803_v1 = vld [vmem:[#allocation6 + $0x278] sm:$0xff]  ;;  %v3796_v5 = vld [vmem:[#allocation6 + $0x240] sm:$0xff] }
 0x73e   :  { %9404 = vst [vmem:[#allocation42_spill] sm:$0xff] %v8392_v42  ;;  %9407 = vst [vmem:[#allocation45_spill] sm:$0xff] %v8399_v4  ;;  %v3800_v13 = vld [vmem:[#allocation6 + $0x260] sm:$0xff] }
 0x73f   :  { %6082 = vmatpush1.bf16.msra.mxu0 %v8384_v3  ;;  %6146 = vmatpush1.bf16.msra.mxu1 %v8387_v62  ;;  %v3789_v62 = vld [vmem:[#allocation6 + $0x208] sm:$0xff]  ;;  %9409 = vst [vmem:[#allocation47_spill] sm:$0xff] %v8406_v40  ;;  %9410 = vst [vmem:[#allocation48_spill] sm:$0xff] %v8408_v12 }
 0x740   :  { %6084 = vmatprep.subr.bf16.mxu0 %v8392_v42  ;;  %6148 = vmatprep.subr.bf16.mxu1 %v8394_v7  ;;  %v8404_v3 = vpack.c.bf16 %v3793_v49, %v3789_v62  ;;  %v8411_v7 = vpack.c.bf16 %v3794_v58, %v3790_v14  ;;  %v3801_v62 = vld [vmem:[#allocation6 + $0x268] sm:$0xff]  ;;  %v3799_v49 = vld [vmem:[#allocation6 + $0x258] sm:$0xff]  ;;  %v8420_v42 = vpack.c.bf16 %v3800_v13, %v3796_v5  ;;  %v3798_v14 = vld [vmem:[#allocation6 + $0x250] sm:$0xff] }
 0x741   :  { %v8418_v25 = vpack.c.bf16 %v3803_v1, %v3799_v49  ;;  %v3802_v58 = vld [vmem:[#allocation6 + $0x270] sm:$0xff]  ;;  %v3811_v49 = vld [vmem:[#allocation6 + $0x2b8] sm:$0xff]  ;;  %v3804_v1 = vld [vmem:[#allocation6 + $0x280] sm:$0xff] }
 0x742   :  { %9408 = vst [vmem:[#allocation46_spill] sm:$0xff] %v8404_v3  ;;  %9411 = vst [vmem:[#allocation49_spill] sm:$0xff] %v8411_v7  ;;  %v3808_v5 = vld [vmem:[#allocation6 + $0x2a0] sm:$0xff] }
 0x743   :  { %6086 = vmatpush1.bf16.msra.mxu0 %v8396_v29  ;;  %6150 = vmatpush1.bf16.msra.mxu1 %v8399_v4  ;;  %v3797_v4 = vld [vmem:[#allocation6 + $0x248] sm:$0xff]  ;;  %9413 = vst [vmem:[#allocation51_spill] sm:$0xff] %v8418_v25  ;;  %9414 = vst [vmem:[#allocation52_spill] sm:$0xff] %v8420_v42 }
 0x744   :  { %6088 = vmatprep.subr.bf16.mxu0 %v8404_v3  ;;  %6152 = vmatprep.subr.bf16.mxu1 %v8406_v40  ;;  %v8416_v29 = vpack.c.bf16 %v3801_v62, %v3797_v4  ;;  %v8423_v40 = vpack.c.bf16 %v3802_v58, %v3798_v14  ;;  %v3809_v4 = vld [vmem:[#allocation6 + $0x2a8] sm:$0xff]  ;;  %v3807_v62 = vld [vmem:[#allocation6 + $0x298] sm:$0xff]  ;;  %v8432_v3 = vpack.c.bf16 %v3808_v5, %v3804_v1  ;;  %v3806_v14 = vld [vmem:[#allocation6 + $0x290] sm:$0xff] }
 0x745   :  { %v8430_v13 = vpack.c.bf16 %v3811_v49, %v3807_v62  ;;  %v3810_v58 = vld [vmem:[#allocation6 + $0x2b0] sm:$0xff]  ;;  %v3819_v62 = vld [vmem:[#allocation6 + $0x2f8] sm:$0xff]  ;;  %v3812_v49 = vld [vmem:[#allocation6 + $0x2c0] sm:$0xff] }
 0x746   :  { %9412 = vst [vmem:[#allocation50_spill] sm:$0xff] %v8416_v29  ;;  %9415 = vst [vmem:[#allocation53_spill] sm:$0xff] %v8423_v40  ;;  %v3816_v1 = vld [vmem:[#allocation6 + $0x2e0] sm:$0xff] }
 0x747   :  { %6090 = vmatpush1.bf16.msra.mxu0 %v8408_v12  ;;  %6154 = vmatpush1.bf16.msra.mxu1 %v8411_v7  ;;  %v3805_v7 = vld [vmem:[#allocation6 + $0x288] sm:$0xff]  ;;  %9417 = vst [vmem:[#allocation55_spill] sm:$0xff] %v8430_v13  ;;  %9418 = vst [vmem:[#allocation56_spill] sm:$0xff] %v8432_v3 }
 0x748   :  { %6092 = vmatprep.subr.bf16.mxu0 %v8416_v29  ;;  %6156 = vmatprep.subr.bf16.mxu1 %v8418_v25  ;;  %v8428_v12 = vpack.c.bf16 %v3809_v4, %v3805_v7  ;;  %v8435_v25 = vpack.c.bf16 %v3810_v58, %v3806_v14  ;;  %v3817_v7 = vld [vmem:[#allocation6 + $0x2e8] sm:$0xff]  ;;  %v3815_v4 = vld [vmem:[#allocation6 + $0x2d8] sm:$0xff]  ;;  %v8444_v29 = vpack.c.bf16 %v3816_v1, %v3812_v49  ;;  %v3814_v14 = vld [vmem:[#allocation6 + $0x2d0] sm:$0xff] }
 0x749   :  { %v8442_v5 = vpack.c.bf16 %v3819_v62, %v3815_v4  ;;  %v3818_v58 = vld [vmem:[#allocation6 + $0x2f0] sm:$0xff]  ;;  %v3827_v4 = vld [vmem:[#allocation6 + $0x338] sm:$0xff]  ;;  %v3820_v62 = vld [vmem:[#allocation6 + $0x300] sm:$0xff] }
 0x74a   :  { %9416 = vst [vmem:[#allocation54_spill] sm:$0xff] %v8428_v12  ;;  %9419 = vst [vmem:[#allocation57_spill] sm:$0xff] %v8435_v25  ;;  %v3824_v49 = vld [vmem:[#allocation6 + $0x320] sm:$0xff] }
 0x74b   :  { %6094 = vmatpush1.bf16.msra.mxu0 %v8420_v42  ;;  %6158 = vmatpush1.bf16.msra.mxu1 %v8423_v40  ;;  %v3813_v40 = vld [vmem:[#allocation6 + $0x2c8] sm:$0xff]  ;;  %9421 = vst [vmem:[#allocation58_spill] sm:$0xff] %v8442_v5  ;;  %9422 = vst [vmem:[#allocation63_spill] sm:$0xff] %v8444_v29 }
 0x74c   :  { %6096 = vmatprep.subr.bf16.mxu0 %v8428_v12  ;;  %6160 = vmatprep.subr.bf16.mxu1 %v8430_v13  ;;  %v8440_v42 = vpack.c.bf16 %v3817_v7, %v3813_v40  ;;  %v8447_v13 = vpack.c.bf16 %v3818_v58, %v3814_v14  ;;  %v3825_v40 = vld [vmem:[#allocation6 + $0x328] sm:$0xff]  ;;  %v3823_v7 = vld [vmem:[#allocation6 + $0x318] sm:$0xff]  ;;  %v8456_v12 = vpack.c.bf16 %v3824_v49, %v3820_v62  ;;  %v3822_v14 = vld [vmem:[#allocation6 + $0x310] sm:$0xff] }
 0x74d   :  { %v8454_v1 = vpack.c.bf16 %v3827_v4, %v3823_v7  ;;  %v3826_v58 = vld [vmem:[#allocation6 + $0x330] sm:$0xff]  ;;  %v3835_v7 = vld [vmem:[#allocation6 + $0x378] sm:$0xff]  ;;  %v3828_v4 = vld [vmem:[#allocation6 + $0x340] sm:$0xff] }
 0x74e   :  { %9420 = vst [vmem:[#allocation59_spill] sm:$0xff] %v8440_v42  ;;  %9423 = vst [vmem:[#allocation62_spill] sm:$0xff] %v8447_v13  ;;  %v3832_v62 = vld [vmem:[#allocation6 + $0x360] sm:$0xff] }
 0x74f   :  { %6098 = vmatpush1.bf16.msra.mxu0 %v8432_v3  ;;  %6162 = vmatpush1.bf16.msra.mxu1 %v8435_v25  ;;  %v3821_v25 = vld [vmem:[#allocation6 + $0x308] sm:$0xff]  ;;  %9425 = vst [vmem:[#allocation64_spill] sm:$0xff] %v8454_v1  ;;  %9426 = vst [vmem:[#allocation66_spill] sm:$0xff] %v8456_v12 }
 0x750   :  { %6100 = vmatprep.subr.bf16.mxu0 %v8440_v42  ;;  %6164 = vmatprep.subr.bf16.mxu1 %v8442_v5  ;;  %v8452_v3 = vpack.c.bf16 %v3825_v40, %v3821_v25  ;;  %v8459_v5 = vpack.c.bf16 %v3826_v58, %v3822_v14  ;;  %v3833_v25 = vld [vmem:[#allocation6 + $0x368] sm:$0xff]  ;;  %v3831_v40 = vld [vmem:[#allocation6 + $0x358] sm:$0xff]  ;;  %v8468_v42 = vpack.c.bf16 %v3832_v62, %v3828_v4  ;;  %v3830_v14 = vld [vmem:[#allocation6 + $0x350] sm:$0xff] }
 0x751   :  { %v8466_v49 = vpack.c.bf16 %v3835_v7, %v3831_v40  ;;  %v3834_v58 = vld [vmem:[#allocation6 + $0x370] sm:$0xff]  ;;  %v3836_v40 = vld [vmem:[#allocation6 + $0x380] sm:$0xff] }
 0x752   :  { %9424 = vst [vmem:[#allocation65_spill] sm:$0xff] %v8452_v3  ;;  %9427 = vst [vmem:[#allocation67_spill] sm:$0xff] %v8459_v5  ;;  %v3840_v7 = vld [vmem:[#allocation6 + $0x3a0] sm:$0xff]  ;;  %v3838_v4 = vld [vmem:[#allocation6 + $0x390] sm:$0xff] }
 0x753   :  { %6102 = vmatpush1.bf16.msra.mxu0 %v8444_v29  ;;  %6166 = vmatpush1.bf16.msra.mxu1 %v8447_v13  ;;  %v3829_v13 = vld [vmem:[#allocation6 + $0x348] sm:$0xff]  ;;  %9429 = vst [vmem:[#allocation69_spill] sm:$0xff] %v8466_v49  ;;  %9430 = vst [vmem:[#allocation70_spill] sm:$0xff] %v8468_v42  ;;  %v8480_v62 = vpack.c.bf16 %v3840_v7, %v3836_v40  ;;  %v3850_v40 = vld [vmem:[#allocation6 + $0x3f0] sm:$0xff] }
 0x754   :  { %6104 = vmatprep.subr.bf16.mxu0 %v8452_v3  ;;  %6168 = vmatprep.subr.bf16.mxu1 %v8454_v1  ;;  %v8464_v29 = vpack.c.bf16 %v3833_v25, %v3829_v13  ;;  %v3837_v3 = vld [vmem:[#allocation6 + $0x388] sm:$0xff]  ;;  %v8477_v25 = vpack.c.bf16 %v3843_v34, %v3839_v57  ;;  %v3847_v34 = vld [vmem:[#allocation6 + $0x3d8] sm:$0xff] }
 0x755   :  { %v3841_v1 = vld [vmem:[#allocation6 + $0x3a8] sm:$0xff]  ;;  %v3851_v57 = vld [vmem:[#allocation6 + $0x3f8] sm:$0xff] }
 0x756   :  { %9428 = vst [vmem:[#allocation68_spill] sm:$0xff] %v8464_v29  ;;  %v8475_v13 = vpack.c.bf16 %v3841_v1, %v3837_v3  ;;  %v3844_v1 = vld [vmem:[#allocation6 + $0x3c0] sm:$0xff] }
 0x757   :  { %6106 = vmatpush1.bf16.msra.mxu0 %v8456_v12  ;;  %6170 = vmatpush1.bf16.msra.mxu1 %v8459_v5  ;;  %v8471_v12 = vpack.c.bf16 %v3834_v58, %v3830_v14  ;;  %v3842_v14 = vld [vmem:[#allocation6 + $0x3b0] sm:$0xff]  ;;  %v3845_v58 = vld [vmem:[#allocation6 + $0x3c8] sm:$0xff]  ;;  %v3848_v5 = vld [vmem:[#allocation6 + $0x3e0] sm:$0xff] }
 0x758   :  { %6108 = vmatprep.subr.bf16.mxu0 %v8464_v29  ;;  %6172 = vmatprep.subr.bf16.mxu1 %v8466_v49  ;;  %v3849_v29 = vld [vmem:[#allocation6 + $0x3e8] sm:$0xff]  ;;  %v8484_v49 = vpack.c.bf16 %v3842_v14, %v3838_v4  ;;  %v8491_v7 = vpack.c.bf16 %v3848_v5, %v3844_v1 }
 0x759   :  { %9431 = vst [vmem:[#allocation71_spill] sm:$0xff] %v8471_v12  ;;  %v8486_v3 = vpack.c.bf16 %v3849_v29, %v3845_v58 }
 0x75a   :  { %9434 = vst [vmem:[#allocation11_spill] sm:$0xff] %v8491_v7 }
 0x75b   :  { %6110 = vmatpush1.bf16.msra.mxu0 %v8468_v42  ;;  %6174 = vmatpush1.bf16.msra.mxu1 %v8471_v12  ;;  %9432 = vst [vmem:[#allocation72_spill] sm:$0xff] %v8486_v3  ;;  %v8488_v42 = vpack.c.bf16 %v3851_v57, %v3847_v34  ;;  %v3846_v12 = vld [vmem:[#allocation6 + $0x3d0] sm:$0xff] }
 0x75c   :  { %6112 = vmatprep.subr.bf16.mxu0 %v8475_v13  ;;  %6176 = vmatprep.subr.bf16.mxu1 %v8477_v25  ;;  %v8495_v4 = vpack.c.bf16 %v3850_v40, %v3846_v12 }
 0x75d   :  { %9433 = vst [vmem:[#allocation73_spill] sm:$0xff] %v8488_v42 }
 0x75e   :  { %9435 = vst [vmem:[#allocation76_spill] sm:$0xff] %v8495_v4 }
 0x75f   :  { %6114 = vmatpush1.bf16.msra.mxu0 %v8480_v62  ;;  %6178 = vmatpush1.bf16.msra.mxu1 %v8484_v49 }
 0x760   :  { %6116 = vmatprep.subr.bf16.mxu0 %v8486_v3  ;;  %6180 = vmatprep.subr.bf16.mxu1 %v8488_v42 }
 0x763   :  { %6118 = vmatpush1.bf16.msra.mxu0 %v8491_v7  ;;  %6182 = vmatpush1.bf16.msra.mxu1 %v8495_v4 }
 0x764   :  { %6184 = vmatprep.subr.bf16.mxu0 %v8186_v27  ;;  %6216 = vmatprep.subr.bf16.mxu1 %v8188_v35 }
 0x7d9   :  { %v3384_v29 = vpop.f32.mrb[20].mxu0  ;;  %v3455_v14 = vpop.f32.mrb[24].mxu1 }
 0x7da   :  { %v3385_v5 = vadd.f32 %v3384_v29, %v9373_v17  ;;  %v3386_v58 = vpop.f32.mrb[21].mxu0  ;;  %v3457_v34 = vpop.f32.mrb[25].mxu1  ;;  %v3456_v4 = vadd.f32 %v3455_v14, %v9375_v56 }
 0x7db   :  { %v3387_v57 = vadd.f32 %v3386_v58, %v9252_v44  ;;  %v3458_v40 = vadd.f32 %v3457_v34, %v9374_v33  ;;  %v108_v29 = vpop.permute.xlu0 %107 }
 0x7dc   :  { %v4753_v12 = vmul.f32 -1.442695, %v3385_v5  ;;  %v160_v5 = vmul.f32 %v9376_v19, %v108_v29  ;;  %v163_v33 = vmul.f32 %v9133_v23, %v108_v29 }
 0x7dd   :  { %v4754_v1 = vmul.f32 -1.442695, %v3387_v57  ;;  %v4755_v7 = vmul.f32 -1.442695, %v3458_v40 }
 0x7de   :  { %6591 = vpow2.f32 %v4753_v12  ;;  %v161_v12 = vmul.f32 %v9377_v10, %v108_v29 }
 0x7df   :  { %6593 = vpow2.f32 %v4754_v1 }
 0x7e0   :  { %6595 = vpow2.f32 %v4755_v7 }
 0x7e1   :  { %6597 = vtanh.f32 %v3456_v4 }
 0x7e8   :  { %v6592_v27 = vpop.eup %6591 }
 0x7e9   :  { %v6594_v42 = vpop.eup %6593  ;;  %v3463_v35 = vadd.f32 1.0, %v6592_v27  ;;  %v214_v27 = vadd.f32 %v9131_v26, %v160_v5  ;;  %v162_v5 = vmul.f32 %v9134_v15, %v108_v29 }
 0x7ea   :  { %v3469_v3 = vadd.f32 1.0, %v6594_v42  ;;  %v6596_v17 = vpop.eup %6595  ;;  %v215_v42 = vadd.f32 %v9132_v6, %v161_v12 }
 0x7eb   :  { %6599 = vrcp.f32 %v3463_v35  ;;  %v6598_v58 = vpop.eup %6597  ;;  %v3476_v40 = vadd.f32 1.0, %v6596_v17 }
 0x7ec   :  { %6601 = vrcp.f32 %v3469_v3 }
 0x7ed   :  { %6603 = vrcp.f32 %v3476_v40 }
 0x7f5   :  { %v6600_v57 = vpop.eup %6599 }
 0x7f6   :  { %v6602_v34 = vpop.eup %6601  ;;  %v3480_v1 = vmul.f32 %v6600_v57, %v6598_v58 }
 0x7f7   :  { %v3479_v14 = vmul.f32 %v6602_v34, %v8201_v22  ;;  %v217_v22 = vadd.f32 %v7161_v47, %v163_v33  ;;  %v6604_v12 = vpop.eup %6603  ;;  %v216_v34 = vadd.f32 %v9135_v39, %v162_v5 }
 0x7f9   :  { %v3620_v7 = vpop.f32.mrb[22].mxu0  ;;  %v3691_v4 = vpop.f32.mrb[26].mxu1  ;;  %v8511_v3 = vadd.f32 %v3480_v1, %v3479_v14 }
 0x7fa   :  { %v3696_v35 = vadd.f32 %v3620_v7, %v214_v27  ;;  %v3622_v56 = vpop.f32.mrb[23].mxu0  ;;  %v3693_v19 = vpop.f32.mrb[27].mxu1  ;;  %v3698_v14 = vadd.f32 %v3691_v4, %v216_v34  ;;  %v9459_v34 = vld [vmem:[#allocation40_spill] sm:$0xff] }
 0x7fb   :  { %v3697_v10 = vadd.f32 %v3622_v56, %v215_v42  ;;  %6605 = vtanh.f32 %v8511_v3  ;;  %v3699_v57 = vadd.f32 %v3693_v19, %v217_v22 }
 0x7fc   :  { %v4756_v17 = vmul.f32 -1.442695, %v3696_v35 }
 0x7fd   :  { %v4757_v58 = vmul.f32 -1.442695, %v3697_v10  ;;  %v4758_v40 = vmul.f32 -1.442695, %v3699_v57 }
 0x7fe   :  { %6607 = vpow2.f32 %v4756_v17 }
 0x7ff   :  { %6609 = vpow2.f32 %v4757_v58 }
 0x800   :  { %6611 = vpow2.f32 %v4758_v40  ;;  %v9461_v40 = vld [vmem:[#allocation42_spill] sm:$0xff] }
 0x801   :  { %6613 = vtanh.f32 %v3698_v14  ;;  %v9462_v14 = vld [vmem:[#allocation43_spill] sm:$0xff] }
 0x805   :  { %v6606_v1 = vpop.eup %6605 }
 0x806   :  { %v8518_v27 = vmul.f32 %v6606_v1, %v6604_v12  ;;  %v9460_v1 = vld [vmem:[#allocation41_spill] sm:$0xff] }
 0x808   :  { %v6608_v56 = vpop.eup %6607  ;;  %3916 = vmatprep.mubr.f32.mxu0 %v8518_v27  ;;  %3987 = vmatprep.mubr.f32.mxu1 %v8518_v27 }
 0x809   :  { %v6610_v10 = vpop.eup %6609  ;;  %v3703_v7 = vadd.f32 1.0, %v6608_v56  ;;  %v9463_v56 = vld [vmem:[#allocation44_spill] sm:$0xff] }
 0x80a   :  { %v3709_v33 = vadd.f32 1.0, %v6610_v10  ;;  %v6612_v19 = vpop.eup %6611  ;;  %v9464_v10 = vld [vmem:[#allocation45_spill] sm:$0xff] }
 0x80b   :  { %6615 = vrcp.f32 %v3703_v7  ;;  %v6614_v29 = vpop.eup %6613  ;;  %v3716_v4 = vadd.f32 1.0, %v6612_v19  ;;  %v9465_v7 = vld [vmem:[#allocation46_spill] sm:$0xff]  ;;  %v9467_v19 = vld [vmem:[#allocation48_spill] sm:$0xff] }
 0x80c   :  { %6617 = vrcp.f32 %v3709_v33  ;;  %v9466_v33 = vld [vmem:[#allocation47_spill] sm:$0xff] }
 0x80d   :  { %6619 = vrcp.f32 %v3716_v4  ;;  %v9472_v4 = vld [vmem:[#allocation53_spill] sm:$0xff] }
 0x815   :  { %v6616_v42 = vpop.eup %6615 }
 0x816   :  { %v6618_v35 = vpop.eup %6617  ;;  %v3720_v17 = vmul.f32 %v6616_v42, %v6614_v29  ;;  %v9468_v29 = vld [vmem:[#allocation49_spill] sm:$0xff]  ;;  %v9469_v42 = vld [vmem:[#allocation50_spill] sm:$0xff] }
 0x817   :  { %v3719_v58 = vmul.f32 %v6618_v35, %v8213_v54  ;;  %v6620_v5 = vpop.eup %6619  ;;  %v4076_v54 = vld [vmem:[#allocation4 + $0x1a0] sm:$0xff]  ;;  %v9470_v35 = vld [vmem:[#allocation51_spill] sm:$0xff] }
 0x819   :  { %v8523_v22 = vadd.f32 %v3720_v17, %v3719_v58  ;;  %v9471_v17 = vld [vmem:[#allocation52_spill] sm:$0xff]  ;;  %v9473_v58 = vld [vmem:[#allocation54_spill] sm:$0xff] }
 0x81b   :  { %6621 = vtanh.f32 %v8523_v22 }
 0x825   :  { %v6622_v57 = vpop.eup %6621 }
 0x826   :  { %v3723_v12 = vmul.f32 %v6622_v57, %v6620_v5  ;;  %v9474_v5 = vld [vmem:[#allocation55_spill] sm:$0xff]  ;;  %v9475_v57 = vld [vmem:[#allocation56_spill] sm:$0xff] }
 0x828   :  { %3917 = vmatmul.mubr.f32.vlgmr.msra.gmra.mrb[24].mxu0 %v3723_v12  ;;  %3988 = vmatmul.mubr.f32.vlgmr.msra.gmra.mrb[28].mxu1 %v3723_v12 }
 0x829   :  { %6186 = vmatpush1.bf16.msra.mxu0 %v8216_v0  ;;  %6218 = vmatpush1.bf16.msra.mxu1 %v8218_v37  ;;  %v4081_v0 = vld [vmem:[#allocation4 + $0x1c8] sm:$0xff] }
 0x82a   :  { %6188 = vmatprep.subr.bf16.mxu0 %v8222_v30  ;;  %6220 = vmatprep.subr.bf16.mxu1 %v8224_v55  ;;  %v4085_v37 = vld [vmem:[#allocation4 + $0x1e8] sm:$0xff] }
 0x82b   :  { %4152 = vmatprep.mubr.f32.mxu0 %v9074_v61  ;;  %4223 = vmatprep.mubr.f32.mxu1 %v9074_v61  ;;  %v4072_v61 = vld [vmem:[#allocation4 + $0x180] sm:$0xff]  ;;  %v6211_v55 = vpack.c.bf16 %v4085_v37, %v4081_v0  ;;  %v9479_v0 = vld [vmem:[#allocation63_spill] sm:$0xff] }
 0x82c   :  { %v6209_v30 = vpack.c.bf16 %v4076_v54, %v4072_v61  ;;  %v9477_v61 = vld [vmem:[#allocation59_spill] sm:$0xff]  ;;  %v9478_v54 = vld [vmem:[#allocation58_spill] sm:$0xff] }
 0x82d   :  { %6190 = vmatpush1.bf16.msra.mxu0 %v8230_v20  ;;  %6222 = vmatpush1.bf16.msra.mxu1 %v8232_v50  ;;  %v4080_v20 = vld [vmem:[#allocation4 + $0x1c0] sm:$0xff] }
 0x82e   :  { %6192 = vmatprep.subr.bf16.mxu0 %v8236_v53  ;;  %6224 = vmatprep.subr.bf16.mxu1 %v8238_v45  ;;  %v4084_v50 = vld [vmem:[#allocation4 + $0x1e0] sm:$0xff]  ;;  %v9436_v45 = vld [vmem:[#allocation17_spill] sm:$0xff] }
 0x82f   :  { %v6213_v53 = vpack.c.bf16 %v4084_v50, %v4080_v20  ;;  %v9480_v37 = vld [vmem:[#allocation62_spill] sm:$0xff]  ;;  %v9484_v50 = vld [vmem:[#allocation67_spill] sm:$0xff] }
 0x830   :  { %v9483_v20 = vld [vmem:[#allocation66_spill] sm:$0xff] }
 0x831   :  { %6194 = vmatpush1.bf16.msra.mxu0 %v8244_v46  ;;  %6226 = vmatpush1.bf16.msra.mxu1 %v8246_v51  ;;  %v9437_v46 = vld [vmem:[#allocation18_spill] sm:$0xff]  ;;  %v9438_v51 = vld [vmem:[#allocation19_spill] sm:$0xff] }
 0x832   :  { %6196 = vmatprep.subr.bf16.mxu0 %v8250_v24  ;;  %6228 = vmatprep.subr.bf16.mxu1 %v8252_v52  ;;  %v9439_v24 = vld [vmem:[#allocation20_spill] sm:$0xff]  ;;  %v9440_v52 = vld [vmem:[#allocation21_spill] sm:$0xff] }
 0x835   :  { %6198 = vmatpush1.bf16.msra.mxu0 %v8256_v21  ;;  %6230 = vmatpush1.bf16.msra.mxu1 %v8258_v9  ;;  %v9441_v21 = vld [vmem:[#allocation22_spill] sm:$0xff]  ;;  %v9442_v9 = vld [vmem:[#allocation23_spill] sm:$0xff] }
 0x836   :  { %6200 = vmatprep.subr.bf16.mxu0 %v8262_v43  ;;  %6232 = vmatprep.subr.bf16.mxu1 %v8264_v38  ;;  %v9443_v43 = vld [vmem:[#allocation24_spill] sm:$0xff]  ;;  %v9444_v38 = vld [vmem:[#allocation25_spill] sm:$0xff] }
 0x839   :  { %6202 = vmatpush1.bf16.msra.mxu0 %v8268_v63  ;;  %6234 = vmatpush1.bf16.msra.mxu1 %v8270_v28  ;;  %v9445_v63 = vld [vmem:[#allocation26_spill] sm:$0xff]  ;;  %v9446_v28 = vld [vmem:[#allocation27_spill] sm:$0xff] }
 0x83a   :  { %6204 = vmatprep.subr.bf16.mxu0 %v8274_v48  ;;  %6236 = vmatprep.subr.bf16.mxu1 %v8276_v60  ;;  %v9447_v48 = vld [vmem:[#allocation28_spill] sm:$0xff]  ;;  %v9448_v60 = vld [vmem:[#allocation29_spill] sm:$0xff] }
 0x83d   :  { %6206 = vmatpush1.bf16.msra.mxu0 %v8280_v2  ;;  %6238 = vmatpush1.bf16.msra.mxu1 %v8282_v36  ;;  %v9449_v2 = vld [vmem:[#allocation30_spill] sm:$0xff]  ;;  %v9450_v36 = vld [vmem:[#allocation31_spill] sm:$0xff] }
 0x83e   :  { %6208 = vmatprep.subr.bf16.mxu0 %v8286_v31  ;;  %6240 = vmatprep.subr.bf16.mxu1 %v8288_v8  ;;  %v9451_v31 = vld [vmem:[#allocation32_spill] sm:$0xff]  ;;  %v9452_v8 = vld [vmem:[#allocation33_spill] sm:$0xff] }
 0x841   :  { %6210 = vmatpush1.bf16.msra.mxu0 %v6209_v30  ;;  %6242 = vmatpush1.bf16.msra.mxu1 %v8292_v11  ;;  %v9453_v11 = vld [vmem:[#allocation34_spill] sm:$0xff]  ;;  %v9481_v30 = vld [vmem:[#allocation65_spill] sm:$0xff] }
 0x842   :  { %6212 = vmatprep.subr.bf16.mxu0 %v6211_v55  ;;  %6244 = vmatprep.subr.bf16.mxu1 %v8296_v41  ;;  %v9454_v41 = vld [vmem:[#allocation35_spill] sm:$0xff]  ;;  %v9482_v55 = vld [vmem:[#allocation64_spill] sm:$0xff] }
 0x845   :  { %6214 = vmatpush1.bf16.msra.mxu0 %v6213_v53  ;;  %6246 = vmatpush1.bf16.msra.mxu1 %v8300_v32  ;;  %v9455_v32 = vld [vmem:[#allocation36_spill] sm:$0xff] }
 0x846   :  { %6248 = vmatprep.subr.bf16.mxu0 %v8308_v59  ;;  %6312 = vmatprep.subr.bf16.mxu1 %v8310_v18  ;;  %v9456_v59 = vld [vmem:[#allocation37_spill] sm:$0xff]  ;;  %v9457_v18 = vld [vmem:[#allocation38_spill] sm:$0xff]  ;;  %v9485_v53 = vld [vmem:[#allocation68_spill] sm:$0xff] }
 0x848   :  { %4153 = vmatmul.mubr.f32.vlgmr.msra.gmra.mrb[26].mxu0 %v3723_v12  ;;  %4224 = vmatmul.mubr.f32.vlgmr.msra.gmra.mrb[30].mxu1 %v3723_v12  ;;  %v9476_v12 = vld [vmem:[#allocation57_spill] sm:$0xff] }
 0x849   :  { %6250 = vmatpush1.bf16.msra.mxu0 %v8312_v16  ;;  %6314 = vmatpush1.bf16.msra.mxu1 %v9436_v45  ;;  %v9458_v16 = vld [vmem:[#allocation39_spill] sm:$0xff]  ;;  %v9486_v45 = vld [vmem:[#allocation69_spill] sm:$0xff] }
 0x84a   :  { %6252 = vmatprep.subr.bf16.mxu0 %v9437_v46  ;;  %6316 = vmatprep.subr.bf16.mxu1 %v9438_v51  ;;  %v9487_v46 = vld [vmem:[#allocation70_spill] sm:$0xff]  ;;  %v9488_v51 = vld [vmem:[#allocation71_spill] sm:$0xff] }
 0x84d   :  { %6254 = vmatpush1.bf16.msra.mxu0 %v9439_v24  ;;  %6318 = vmatpush1.bf16.msra.mxu1 %v9440_v52  ;;  %v9489_v24 = vld [vmem:[#allocation72_spill] sm:$0xff]  ;;  %v9490_v52 = vld [vmem:[#allocation73_spill] sm:$0xff] }
 0x84e   :  { %6256 = vmatprep.subr.bf16.mxu0 %v9441_v21  ;;  %6320 = vmatprep.subr.bf16.mxu1 %v9442_v9  ;;  %v9491_v21 = vld [vmem:[#allocation11_spill] sm:$0xff]  ;;  %v9492_v9 = vld [vmem:[#allocation76_spill] sm:$0xff] }
 0x851   :  { %6258 = vmatpush1.bf16.msra.mxu0 %v9443_v43  ;;  %6322 = vmatpush1.bf16.msra.mxu1 %v9444_v38  ;;  %v4562_v43 = vld [vmem:[%s8751_s8] sm:$0xff] }
 0x852   :  { %6260 = vmatprep.subr.bf16.mxu0 %v9445_v63  ;;  %6324 = vmatprep.subr.bf16.mxu1 %v9446_v28  ;;  %v9493_v38 = vld [vmem:[#allocation10_spill] sm:$0xff] }
 0x855   :  { %6262 = vmatpush1.bf16.msra.mxu0 %v9447_v48  ;;  %6326 = vmatpush1.bf16.msra.mxu1 %v9448_v60 }
 0x856   :  { %6264 = vmatprep.subr.bf16.mxu0 %v9449_v2  ;;  %6328 = vmatprep.subr.bf16.mxu1 %v9450_v36 }
 0x859   :  { %6266 = vmatpush1.bf16.msra.mxu0 %v9451_v31  ;;  %6330 = vmatpush1.bf16.msra.mxu1 %v9452_v8  ;;  %v9494_v31 = vld [vmem:[#allocation12_spill] sm:$0xff] }
 0x85a   :  { %6268 = vmatprep.subr.bf16.mxu0 %v9453_v11  ;;  %6332 = vmatprep.subr.bf16.mxu1 %v9454_v41  ;;  %v9495_v41 = vld [vmem:[#allocation13_spill] sm:$0xff] }
 0x85d   :  { %6270 = vmatpush1.bf16.msra.mxu0 %v9455_v32  ;;  %6334 = vmatpush1.bf16.msra.mxu1 %v9456_v59 }
 0x85e   :  { %6272 = vmatprep.subr.bf16.mxu0 %v9457_v18  ;;  %6336 = vmatprep.subr.bf16.mxu1 %v9458_v16 }
 0x861   :  { %6274 = vmatpush1.bf16.msra.mxu0 %v9459_v34  ;;  %6338 = vmatpush1.bf16.msra.mxu1 %v9460_v1  ;;  %v113_v1 = vpop.permute.xlu1 %112 }
 0x862   :  { %6276 = vmatprep.subr.bf16.mxu0 %v9461_v40  ;;  %6340 = vmatprep.subr.bf16.mxu1 %v9462_v14 }
 0x865   :  { %6278 = vmatpush1.bf16.msra.mxu0 %v9463_v56  ;;  %6342 = vmatpush1.bf16.msra.mxu1 %v9464_v10  ;;  %v9496_v56 = vld [vmem:[#allocation61_spill] sm:$0xff] }
 0x866   :  { %6280 = vmatprep.subr.bf16.mxu0 %v9465_v7  ;;  %6344 = vmatprep.subr.bf16.mxu1 %v9466_v33  ;;  %v164_v10 = vmul.f32 %v9496_v56, %v113_v1  ;;  %v9497_v33 = vld [vmem:[#allocation60_spill] sm:$0xff] }
 0x867   :  { %v4572_v56 = vld [vmem:[%s8751_s8 + $0x50] sm:$0xff] }
 0x869   :  { %6282 = vmatpush1.bf16.msra.mxu0 %v9467_v19  ;;  %6346 = vmatpush1.bf16.msra.mxu1 %v9468_v29  ;;  %v165_v19 = vmul.f32 %v9497_v33, %v113_v1  ;;  %v4574_v33 = vld [vmem:[%s8751_s8 + $0x60] sm:$0xff] }
 0x86a   :  { %6284 = vmatprep.subr.bf16.mxu0 %v9469_v42  ;;  %6348 = vmatprep.subr.bf16.mxu1 %v9470_v35 }
 0x86d   :  { %6286 = vmatpush1.bf16.msra.mxu0 %v9471_v17  ;;  %6350 = vmatpush1.bf16.msra.mxu1 %v9472_v4  ;;  %v218_v4 = vadd.f32 %v9131_v26, %v164_v10  ;;  %v4573_v10 = vld [vmem:[%s8751_s8 + $0x58] sm:$0xff] }
 0x86e   :  { %6288 = vmatprep.subr.bf16.mxu0 %v9473_v58  ;;  %6352 = vmatprep.subr.bf16.mxu1 %v9474_v5 }
 0x871   :  { %6290 = vmatpush1.bf16.msra.mxu0 %v9475_v57  ;;  %6354 = vmatpush1.bf16.msra.mxu1 %v9476_v12  ;;  %v219_v57 = vadd.f32 %v9132_v6, %v165_v19  ;;  %v4575_v19 = vld [vmem:[%s8751_s8 + $0x68] sm:$0xff] }
 0x872   :  { %6292 = vmatprep.subr.bf16.mxu0 %v9477_v61  ;;  %6356 = vmatprep.subr.bf16.mxu1 %v9478_v54 }
 0x875   :  { %6294 = vmatpush1.bf16.msra.mxu0 %v9479_v0  ;;  %6358 = vmatpush1.bf16.msra.mxu1 %v9480_v37  ;;  %v167_v37 = vmul.f32 %v9133_v23, %v113_v1 }
 0x876   :  { %6296 = vmatprep.subr.bf16.mxu0 %v9481_v30  ;;  %6360 = vmatprep.subr.bf16.mxu1 %v9482_v55 }
 0x877   :  { %v221_v26 = vadd.f32 %v7161_v47, %v167_v37 }
 0x879   :  { %6298 = vmatpush1.bf16.msra.mxu0 %v9483_v20  ;;  %6362 = vmatpush1.bf16.msra.mxu1 %v9484_v50 }
 0x87a   :  { %6300 = vmatprep.subr.bf16.mxu0 %v9485_v53  ;;  %6364 = vmatprep.subr.bf16.mxu1 %v9486_v45 }
 0x87d   :  { %6302 = vmatpush1.bf16.msra.mxu0 %v9487_v46  ;;  %6366 = vmatpush1.bf16.msra.mxu1 %v9488_v51 }
 0x87e   :  { %6304 = vmatprep.subr.bf16.mxu0 %v8475_v13  ;;  %6368 = vmatprep.subr.bf16.mxu1 %v8477_v25  ;;  %v4563_v13 = vld [vmem:[%s8751_s8 + $0x8] sm:$0xff] }
 0x87f   :  { %v8625_v25 = vpack.c.bf16 %v4563_v13, %v4562_v43 }
 0x881   :  { %6306 = vmatpush1.bf16.msra.mxu0 %v8480_v62  ;;  %6370 = vmatpush1.bf16.msra.mxu1 %v8484_v49 }
 0x882   :  { %6308 = vmatprep.subr.bf16.mxu0 %v9489_v24  ;;  %6372 = vmatprep.subr.bf16.mxu1 %v9490_v52 }
 0x885   :  { %6310 = vmatpush1.bf16.msra.mxu0 %v9491_v21  ;;  %6374 = vmatpush1.bf16.msra.mxu1 %v9492_v9 }
 0x886   :  { %6376 = vmatprep.subr.bf16.mxu0 %v8625_v25 }
 0x8fb   :  { %v3918_v49 = vpop.f32.mrb[24].mxu0  ;;  %v3989_v62 = vpop.f32.mrb[28].mxu1 }
 0x8fc   :  { %v3919_v63 = vadd.f32 %v3918_v49, %v9493_v38  ;;  %v3920_v28 = vpop.f32.mrb[25].mxu0  ;;  %v3991_v48 = vpop.f32.mrb[29].mxu1  ;;  %v3990_v32 = vadd.f32 %v3989_v62, %v9495_v41 }
 0x8fd   :  { %v3921_v60 = vadd.f32 %v3920_v28, %v9252_v44  ;;  %v3992_v8 = vadd.f32 %v3991_v48, %v9494_v31  ;;  %v4564_v28 = vld [vmem:[%s8751_s8 + $0x10] sm:$0xff]  ;;  %v4565_v48 = vld [vmem:[%s8751_s8 + $0x18] sm:$0xff] }
 0x8fe   :  { %v4759_v2 = vmul.f32 -1.442695, %v3919_v63 }
 0x8ff   :  { %v4760_v36 = vmul.f32 -1.442695, %v3921_v60  ;;  %v4761_v11 = vmul.f32 -1.442695, %v3992_v8  ;;  %v6379_v8 = vpack.c.bf16 %v4565_v48, %v4564_v28 }
 0x900   :  { %6623 = vpow2.f32 %v4759_v2 }
 0x901   :  { %6625 = vpow2.f32 %v4760_v36 }
 0x902   :  { %6627 = vpow2.f32 %v4761_v11 }
 0x903   :  { %6629 = vtanh.f32 %v3990_v32  ;;  %v4566_v32 = vld [vmem:[%s8751_s8 + $0x20] sm:$0xff] }
 0x90a   :  { %v6624_v59 = vpop.eup %6623 }
 0x90b   :  { %v6626_v18 = vpop.eup %6625  ;;  %v3997_v16 = vadd.f32 1.0, %v6624_v59  ;;  %v4567_v59 = vld [vmem:[%s8751_s8 + $0x28] sm:$0xff] }
 0x90c   :  { %v4003_v34 = vadd.f32 1.0, %v6626_v18  ;;  %v6628_v40 = vpop.eup %6627  ;;  %v6383_v18 = vpack.c.bf16 %v4567_v59, %v4566_v32 }
 0x90d   :  { %6631 = vrcp.f32 %v3997_v16  ;;  %v6630_v14 = vpop.eup %6629  ;;  %v4010_v35 = vadd.f32 1.0, %v6628_v40  ;;  %v4568_v16 = vld [vmem:[%s8751_s8 + $0x30] sm:$0xff]  ;;  %v4570_v40 = vld [vmem:[%s8751_s8 + $0x40] sm:$0xff] }
 0x90e   :  { %6633 = vrcp.f32 %v4003_v34  ;;  %v4569_v34 = vld [vmem:[%s8751_s8 + $0x38] sm:$0xff] }
 0x90f   :  { %6635 = vrcp.f32 %v4010_v35  ;;  %v4577_v35 = vld [vmem:[%s8751_s8 + $0x78] sm:$0xff] }
 0x917   :  { %v6632_v7 = vpop.eup %6631 }
 0x918   :  { %v6634_v29 = vpop.eup %6633  ;;  %v4014_v42 = vmul.f32 %v6632_v7, %v6630_v14  ;;  %v6395_v7 = vpack.c.bf16 %v4573_v10, %v4572_v56 }
 0x919   :  { %v4013_v17 = vmul.f32 %v6634_v29, %v8511_v3  ;;  %v166_v3 = vmul.f32 %v9134_v15, %v113_v1  ;;  %v6636_v50 = vpop.eup %6635  ;;  %v6387_v1 = vpack.c.bf16 %v4569_v34, %v4568_v16  ;;  %v6399_v29 = vpack.c.bf16 %v4575_v19, %v4574_v33 }
 0x91b   :  { %v4154_v58 = vpop.f32.mrb[26].mxu0  ;;  %v4225_v5 = vpop.f32.mrb[30].mxu1  ;;  %v8637_v12 = vadd.f32 %v4014_v42, %v4013_v17  ;;  %v220_v53 = vadd.f32 %v9135_v39, %v166_v3  ;;  %v4576_v42 = vld [vmem:[%s8751_s8 + $0x70] sm:$0xff] }
 0x91c   :  { %v4230_v61 = vadd.f32 %v4154_v58, %v218_v4  ;;  %v4156_v54 = vpop.f32.mrb[27].mxu0  ;;  %v4227_v0 = vpop.f32.mrb[31].mxu1  ;;  %v6403_v17 = vpack.c.bf16 %v4577_v35, %v4576_v42  ;;  %v9499_v4 = vld [vmem:[#allocation74_spill] sm:$0xff] }
 0x91d   :  { %v4231_v30 = vadd.f32 %v4156_v54, %v219_v57  ;;  %6637 = vtanh.f32 %v8637_v12  ;;  %v4233_v6 = vadd.f32 %v4227_v0, %v221_v26  ;;  %v4232_v51 = vadd.f32 %v4225_v5, %v220_v53  ;;  %v9500_v5 = vld [vmem:[#allocation15_spill] sm:$0xff]  ;;  %v9502_v0 = vld [vmem:[#allocation16_spill] sm:$0xff] }
 0x91e   :  { %v4762_v55 = vmul.f32 -1.442695, %v4230_v61  ;;  %v1348_v58 = vmax.f32 %v9499_v4, 0.0  ;;  %v1882_v57 = vmax.f32 %v9500_v5, 0.0  ;;  %v9501_v61 = vld [vmem:[#allocation75_spill] sm:$0xff]  ;;  %v2950_v37 = vmax.f32 %v9502_v0, 0.0 }
 0x91f   :  { %v4763_v20 = vmul.f32 -1.442695, %v4231_v30  ;;  %v4764_v46 = vmul.f32 -1.442695, %v4233_v6  ;;  %v2416_v54 = vmax.f32 %v9501_v61, 0.0  ;;  %v3484_v30 = vmax.f32 %v8518_v27, 0.0 }
 0x920   :  { %6639 = vpow2.f32 %v4762_v55 }
 0x921   :  { %6641 = vpow2.f32 %v4763_v20 }
 0x922   :  { %6643 = vpow2.f32 %v4764_v46 }
 0x923   :  { %6645 = vtanh.f32 %v4232_v51 }
 0x927   :  { %v6638_v45 = vpop.eup %6637 }
 0x928   :  { %v8644_v24 = vmul.f32 %v6638_v45, %v6636_v50 }
 0x92a   :  { %v6640_v23 = vpop.eup %6639  ;;  %4450 = vmatprep.mubr.f32.mxu0 %v8644_v24  ;;  %4521 = vmatprep.mubr.f32.mxu1 %v8644_v24  ;;  %v4018_v55 = vmax.f32 %v8644_v24, 0.0 }
 0x92b   :  { %v6642_v52 = vpop.eup %6641  ;;  %v4237_v21 = vadd.f32 1.0, %v6640_v23 }
 0x92c   :  { %v4243_v47 = vadd.f32 1.0, %v6642_v52  ;;  %v6644_v15 = vpop.eup %6643 }
 0x92d   :  { %6647 = vrcp.f32 %v4237_v21  ;;  %v6646_v9 = vpop.eup %6645  ;;  %v4250_v49 = vadd.f32 1.0, %v6644_v15 }
 0x92e   :  { %6649 = vrcp.f32 %v4243_v47 }
 0x92f   :  { %6651 = vrcp.f32 %v4250_v49 }
 0x937   :  { %v6648_v39 = vpop.eup %6647 }
 0x938   :  { %v6650_v43 = vpop.eup %6649  ;;  %v4254_v13 = vmul.f32 %v6648_v39, %v6646_v9 }
 0x939   :  { %v4253_v62 = vmul.f32 %v6650_v43, %v8523_v22  ;;  %v6652_v60 = vpop.eup %6651  ;;  %v9498_v22 = vld [vmem:[#allocation14_spill] sm:$0xff] }
 0x93a   :  { %v814_v11 = vmax.f32 %v9498_v22, 0.0 }
 0x93b   :  { %v4255_v63 = vadd.f32 %v4254_v13, %v4253_v62 }
 0x93d   :  { %4701 = vst [vmem:[%s8755_s12] sm:$0xff] %v4255_v63  ;;  %6653 = vtanh.f32 %v4255_v63 }
 0x947   :  { %v6654_v2 = vpop.eup %6653 }
 0x948   :  { %v4257_v36 = vmul.f32 %v6654_v2, %v6652_v60 }
 0x94a   :  { %4451 = vmatmul.mubr.f32.vlgmr.msra.gmra.mrb[28].mxu0 %v4257_v36  ;;  %4698 = vst [vmem:[%s8754_s11] sm:$0xff] %v4257_v36  ;;  %4522 = vmatmul.mubr.f32.vlgmr.msra.gmra.mrb[32].mxu1 %v4257_v36 }
 0x94b   :  { %6378 = vmatpush3.bf16.msra.mxu0 %v8625_v25  ;;  %4827 = vmatprep.mubr.f32.mxu0 %v814_v11  ;;  %v4571_v25 = vld [vmem:[%s8751_s8 + $0x48] sm:$0xff] }
 0x94c   :  { %6380 = vmatprep.subr.bf16.mxu0 %v6379_v8  ;;  %v6391_v14 = vpack.c.bf16 %v4571_v25, %v4570_v40 }
 0x94f   :  { %6382 = vmatpush3.bf16.msra.mxu0 %v6379_v8 }
 0x950   :  { %6384 = vmatprep.subr.bf16.mxu0 %v6383_v18 }
 0x953   :  { %6386 = vmatpush3.bf16.msra.mxu0 %v6383_v18 }
 0x954   :  { %6388 = vmatprep.subr.bf16.mxu0 %v6387_v1 }
 0x957   :  { %6390 = vmatpush3.bf16.msra.mxu0 %v6387_v1 }
 0x958   :  { %6392 = vmatprep.subr.bf16.mxu0 %v6391_v14 }
 0x95b   :  { %6394 = vmatpush3.bf16.msra.mxu0 %v6391_v14 }
 0x95c   :  { %6396 = vmatprep.subr.bf16.mxu0 %v6395_v7 }
 0x95f   :  { %6398 = vmatpush3.bf16.msra.mxu0 %v6395_v7 }
 0x960   :  { %6400 = vmatprep.subr.bf16.mxu0 %v6399_v29 }
 0x963   :  { %6402 = vmatpush3.bf16.msra.mxu0 %v6399_v29 }
 0x964   :  { %6404 = vmatprep.subr.bf16.mxu0 %v6403_v17 }
 0x967   :  { %6406 = vmatpush3.bf16.msra.mxu0 %v6403_v17 }
 0x96a   :  { %4828 = vmatmul.mubr.f32.vlgmr.msra.gmra.mrb[30].mxu0 %v1348_v58 }
 0x96b   :  { %4830 = vmatprep.mubr.f32.mxu0 %v1882_v57 }
 0x96e   :  { %4831 = vmatmul.mubr.f32.gmra.mrb[32].mxu0 %v2416_v54 }
 0x96f   :  { %4833 = vmatprep.mubr.f32.mxu0 %v2950_v37 }
 0x972   :  { %4834 = vmatmul.mubr.f32.gmra.mrb[34].mxu0 %v3484_v30 }
 0x973   :  { %4836 = vmatprep.mubr.f32.mxu0 %v4018_v55 }
 0xa1d   :  { %v4452_v20 = vpop.f32.mrb[28].mxu0  ;;  %v4523_v26 = vpop.f32.mrb[32].mxu1 }
 0xa1e   :  { %v4453_v3 = vadd.f32 %v4452_v20, %v9493_v38  ;;  %v4454_v6 = vpop.f32.mrb[29].mxu0  ;;  %v4525_v50 = vpop.f32.mrb[33].mxu1  ;;  %v4524_v27 = vadd.f32 %v4523_v26, %v9495_v41 }
 0xa1f   :  { %v4455_v53 = vadd.f32 %v4454_v6, %v9252_v44  ;;  %v4526_v51 = vadd.f32 %v4525_v50, %v9494_v31  ;;  %v4768_v31 = vld [vmem:[%s8752_s9] ss:$0 sm:$0xff] }
 0xa20   :  { %v4765_v45 = vmul.f32 -1.442695, %v4453_v3 }
 0xa21   :  { %v4766_v46 = vmul.f32 -1.442695, %v4455_v53  ;;  %v4767_v23 = vmul.f32 -1.442695, %v4526_v51 }
 0xa22   :  { %6655 = vpow2.f32 %v4765_v45 }
 0xa23   :  { %6657 = vpow2.f32 %v4766_v46 }
 0xa24   :  { %6659 = vpow2.f32 %v4767_v23 }
 0xa25   :  { %6661 = vtanh.f32 %v4524_v27 }
 0xa2c   :  { %v6656_v24 = vpop.eup %6655 }
 0xa2d   :  { %v6658_v52 = vpop.eup %6657  ;;  %v4531_v21 = vadd.f32 1.0, %v6656_v24 }
 0xa2e   :  { %v4537_v47 = vadd.f32 1.0, %v6658_v52  ;;  %v6660_v38 = vpop.eup %6659 }
 0xa2f   :  { %6663 = vrcp.f32 %v4531_v21  ;;  %v6662_v15 = vpop.eup %6661  ;;  %v4544_v43 = vadd.f32 1.0, %v6660_v38 }
 0xa30   :  { %6665 = vrcp.f32 %v4537_v47 }
 0xa31   :  { %6667 = vrcp.f32 %v4544_v43 }
 0xa39   :  { %v6664_v44 = vpop.eup %6663 }
 0xa3a   :  { %v6666_v9 = vpop.eup %6665  ;;  %v4548_v39 = vmul.f32 %v6664_v44, %v6662_v15 }
 0xa3b   :  { %v4547_v13 = vmul.f32 %v6666_v9, %v8637_v12  ;;  %v6668_v32 = vpop.eup %6667 }
 0xa3d   :  { %v4549_v41 = vadd.f32 %v4548_v39, %v4547_v13  ;;  %v4829_v49 = vpop.f32.mrb[30].mxu0 }
 0xa3e   :  { %v4657_v62 = vadd.f32 %v4829_v49, %v4768_v31  ;;  %v4651_v63 = vpop.f32.mrb[31].mxu0 }
 0xa3f   :  { %4770 = vst [vmem:[%s8755_s12 + $0x8] sm:$0xff] %v4549_v41  ;;  %v4652_v28 = vadd.f32 %v4768_v31, %v4651_v63  ;;  %6669 = vtanh.f32 %v4549_v41 }
 0xa40   :  { %4691 = vst [vmem:[%s8753_s10 + $0x8] sm:$0xff] %v4657_v62 }
 0xa41   :  { %4690 = vst [vmem:[%s8753_s10] sm:$0xff] %v4652_v28  ;;  %v4832_v12 = vpop.f32.mrb[32].mxu0 }
 0xa42   :  { %v4667_v48 = vadd.f32 %v4832_v12, %v4768_v31  ;;  %v4661_v60 = vpop.f32.mrb[33].mxu0 }
 0xa43   :  { %v4662_v2 = vadd.f32 %v4768_v31, %v4661_v60 }
 0xa44   :  { %4693 = vst [vmem:[%s8753_s10 + $0x18] sm:$0xff] %v4667_v48 }
 0xa45   :  { %4692 = vst [vmem:[%s8753_s10 + $0x10] sm:$0xff] %v4662_v2  ;;  %v4835_v36 = vpop.f32.mrb[34].mxu0 }
 0xa46   :  { %v4677_v8 = vadd.f32 %v4835_v36, %v4768_v31  ;;  %v4671_v22 = vpop.f32.mrb[35].mxu0 }
 0xa47   :  { %v4672_v11 = vadd.f32 %v4768_v31, %v4671_v22 }
 0xa48   :  { %4695 = vst [vmem:[%s8753_s10 + $0x28] sm:$0xff] %v4677_v8 }
 0xa49   :  { %v6670_v59 = vpop.eup %6669  ;;  %4694 = vst [vmem:[%s8753_s10 + $0x20] sm:$0xff] %v4672_v11 }
 0xa4a   :  { %v4551_v18 = vmul.f32 %v6670_v59, %v6668_v32 }
 0xa4c   :  { %v4552_v16 = vmax.f32 %v4551_v18, 0.0  ;;  %4769 = vst [vmem:[%s8754_s11 + $0x8] sm:$0xff] %v4551_v18 }
 0xa4e   :  { %4837 = vmatmul.mubr.f32.gmra.mrb[36].mxu0 %v4552_v16 }
 0xb21   :  { %v4838_v34 = vpop.f32.mrb[36].mxu0 }
 0xb22   :  { %v4687_v1 = vadd.f32 %v4838_v34, %v4768_v31  ;;  %v4681_v40 = vpop.f32.mrb[37].mxu0 }
 0xb23   :  { %v4682_v25 = vadd.f32 %v4768_v31, %v4681_v40 }
 0xb24   :  { %4697 = vst [vmem:[%s8753_s10 + $0x38] sm:$0xff] %v4687_v1 }
 0xb25   :  { %4696 = vst [vmem:[%s8753_s10 + $0x30] sm:$0xff] %v4682_v25 }
 0xb26   :  { %4716 = vsyncpa [#allocation5], 1 }
 0xb27   :  { %4717 = vsyncpa [#allocation7], 1 }

</bundles_post_ra>
